<compile_context>
chip_gen: v5e
topology: v5e:2x2
jax: 0.10.0
libtpu: 0.0.40
codegen_flags: <defaults>
</compile_context>

<pallas_src>
import jax
import jax.numpy as jnp
from jax.experimental import pallas as pl
from jax.experimental.pallas import tpu as pltpu

EPS = 1e-5
LAYER_SIZES = [512, 512, 256, 128, 64, 32, 1]  # hidden1..hidden6, output
LANE = 128
SUBLANE_PACK = 16  # sublane multiple that is safe for bf16-packed tiles


def _cdiv(a, b):
    return -(-a // b)


def _round_up(n, m):
    return _cdiv(n, m) * m


def _choose_batch_tiling(batch, max_tile_m):
    """Pick (tile_m, n_steps, padded_batch) with minimal padding waste and an
    even >=2-step grid (so v7x's two TensorCores both get batch tiles)."""
    padded_min = _round_up(batch, SUBLANE_PACK)
    n_steps = max(1, _cdiv(padded_min, max_tile_m))
    if padded_min >= 2 * SUBLANE_PACK:
        n_steps = max(n_steps, 2)      # give both v7x TensorCores a tile
        if n_steps % 2:
            n_steps += 1               # even step count -> balanced cores
    tm = _round_up(_cdiv(batch, n_steps), SUBLANE_PACK)
    return tm, n_steps, tm * n_steps


def _mlp_kernel(x_ref, *refs):
    """One batch tile of: (BN-folded) Linear+ReLU x6 -> Linear.

    refs = [w1, b1, w2, b2, ..., w7, b7, out].  Weights/biases use constant
    index_maps so they stay VMEM-resident across grid steps.  Matmuls run on
    the MXU with f32 accumulation; the per-layer epilogue (bias + ReLU) runs
    in the bias dtype (bf16 on v6e/v7x, f32 if so prepared); the final layer's
    bias is f32.
    """
    out_ref = refs[-1]
    wb_refs = refs[:-1]
    n_layers = len(wb_refs) // 2

    h = x_ref[...]
    for li in range(n_layers):
        w_ref = wb_refs[2 * li]
        b_ref = wb_refs[2 * li + 1]
        acc = jnp.dot(h.astype(w_ref.dtype), w_ref[...],
                      preferred_element_type=jnp.float32)
        h = acc.astype(b_ref.dtype) + b_ref[...]
        if li < n_layers - 1:          # output layer has no ReLU
            h = jnp.maximum(h, 0.0)
    out_ref[...] = h.astype(out_ref.dtype)   # lane-dense (tm, 128) store


def prepare_params(params, *, matmul_dtype=jnp.bfloat16, epilogue_dtype=None):
    """One-time padding / casting of the weights (hoist out of the forward).

    bf16 matmuls are full-rate on v5e/v6e/v7x, so bf16 is the default
    everywhere; pass epilogue_dtype=jnp.float32 on v5e (no bf16 VALU there).
    The first Linear layer is kept unpadded in f32 so the per-batch BatchNorm
    scale/shift can be folded into it at call time (its 512-wide output needs
    no padding).  Tail layers with narrow outputs (64/32/1) are zero-padded to
    lane width 128 — exact, since ReLU(0 + 0) = 0 and the pad lanes carry zero
    weights into the next layer.
    """
    if epilogue_dtype is None:
        epilogue_dtype = matmul_dtype
    (w1, b1), *tail = params["weights"]

    tail_w, tail_b = [], []
    in_p = w1.shape[1]                                  # 512
    for li, (w, b) in enumerate(tail):
        in_dim, out_dim = w.shape
        out_p = _round_up(out_dim, LANE)
        is_last = li == len(tail) - 1
        b_dtype = jnp.float32 if is_last else epilogue_dtype
        w_p = jnp.zeros((in_p, out_p), matmul_dtype)
        w_p = w_p.at[:in_dim, :out_dim].set(w.astype(matmul_dtype))
        b_p = jnp.zeros((1, out_p), b_dtype)
        b_p = b_p.at[:, :out_dim].set(b.reshape(1, out_dim).astype(b_dtype))
        tail_w.append(w_p)
        tail_b.append(b_p)
        in_p = out_p

    return {
        "gamma": params["gamma"].reshape(-1).astype(jnp.float32),
        "beta": params["beta"].reshape(-1).astype(jnp.float32),
        "w1": w1.astype(jnp.float32),
        "b1": b1.reshape(-1).astype(jnp.float32),
        "tail_w": tail_w,
        "tail_b": tail_b,
    }


def simple_nn_forward(x, prepared, *, max_tile_m=1024):
    """SimpleNN forward (training-mode BatchNorm1d).  Returns (batch, 1) f32.

    `prepared` comes from prepare_params(); matmul / epilogue precision is
    inferred from the prepared arrays.
    """
    x = x.astype(jnp.float32)
    batch, feat = x.shape

    matmul_dtype = prepared["tail_w"][0].dtype
    ep_dtype = prepared["tail_b"][0].dtype

    # --- BatchNorm1d stats (unpadded batch, f32, biased variance) folded into
    #     the first Linear layer: W1' = diag(scale) W1, b1' = shift @ W1 + b1.
    mean = jnp.mean(x, axis=0)
    var = jnp.mean(jnp.square(x - mean), axis=0)
    scale = prepared["gamma"] * jax.lax.rsqrt(var + EPS)
    shift = prepared["beta"] - mean * scale
    w1 = (scale[:, None] * prepared["w1"]).astype(matmul_dtype)
    b1 = (shift @ prepared["w1"] + prepared["b1"]).reshape(1, -1).astype(ep_dtype)

    wb = [w1, b1]
    for w, b in zip(prepared["tail_w"], prepared["tail_b"]):
        wb += [w, b]
    out_width = wb[-2].shape[1]                          # 128 (lane-dense)

    # --- Adaptive batch tiling -----------------------------------------------
    tm, n_steps, padded_batch = _choose_batch_tiling(batch, max_tile_m)

    xk = x.astype(matmul_dtype)                          # halve x DMA on bf16 path
    if padded_batch != batch:
        xk = jnp.pad(xk, ((0, padded_batch - batch), (0, 0)))

    flops = 2 * padded_batch * sum(w.shape[0] * w.shape[1] for w in wb[0::2])
    bytes_accessed = int(xk.size) * xk.dtype.itemsize
    bytes_accessed += sum(int(a.size) * a.dtype.itemsize for a in wb)
    bytes_accessed += padded_batch * out_width * jnp.dtype(matmul_dtype).itemsize

    def _resident(arr):
        # Constant block index -> fetched once, stays VMEM-resident across grid
        # steps (~1 MB of bf16 weights; even if double-buffered by the pipeline
        # this is far under every generation's scoped-VMEM limit).
        return pl.BlockSpec(arr.shape, lambda i: (0, 0))

    out = pl.pallas_call(
        _mlp_kernel,
        out_shape=jax.ShapeDtypeStruct((padded_batch, out_width), matmul_dtype),
        grid_spec=pltpu.PrefetchScalarGridSpec(
            num_scalar_prefetch=0,
            grid=(n_steps,),
            in_specs=[pl.BlockSpec((tm, feat), lambda i: (i, 0))]  # pipelined x tile
                     + [_resident(a) for a in wb],
            out_specs=pl.BlockSpec((tm, out_width), lambda i: (i, 0)),
        ),
        compiler_params=pltpu.CompilerParams(
            dimension_semantics=("parallel",),           # megacore sharding on v7x
        ),
        cost_estimate=pl.CostEstimate(
            flops=flops, transcendentals=0, bytes_accessed=bytes_accessed),
    )(xk, *wb)

    # Only column 0 of the lane-padded output is the real result.
    return out[:batch, :1].astype(jnp.float32)


def init_params(feature_count, key):
    """Deterministic parameter init matching the PyTorch module's shapes."""
    keys = jax.random.split(key, 2 * len(LAYER_SIZES))
    weights = []
    in_dim = feature_count
    for i, out_dim in enumerate(LAYER_SIZES):
        bound = 1.0 / jnp.sqrt(in_dim)
        w = jax.random.uniform(
            keys[2 * i], (in_dim, out_dim), jnp.float32, -bound, bound)
        b = jax.random.uniform(
            keys[2 * i + 1], (1, out_dim), jnp.float32, -bound, bound)
        weights.append((w, b))
        in_dim = out_dim
    return {
        "gamma": jnp.ones((1, feature_count), jnp.float32),
        "beta": jnp.zeros((1, feature_count), jnp.float32),
        "weights": weights,
    }


def reference_forward(x, params, matmul_dtype=jnp.float32):
    """Pure-JAX reference (BN in f32, matmuls in matmul_dtype, f32 accumulate)."""
    x = x.astype(jnp.float32)
    mean = jnp.mean(x, axis=0, keepdims=True)
    var = jnp.mean(jnp.square(x - mean), axis=0, keepdims=True)
    h = (x - mean) * jax.lax.rsqrt(var + EPS) * params["gamma"] + params["beta"]
    ws = params["weights"]
    for w, b in ws[:-1]:
        h = jnp.dot(h.astype(matmul_dtype), w.astype(matmul_dtype),
                    preferred_element_type=jnp.float32) + b
        h = jnp.maximum(h, 0.0)
    w, b = ws[-1]
    return jnp.dot(h.astype(matmul_dtype), w.astype(matmul_dtype),
                   preferred_element_type=jnp.float32) + b


if __name__ == "__main__":
    feature_count = 32
    batch = 300   # not a multiple of the tile size -> exercises padding + 2-step grid

    key = jax.random.PRNGKey(0)
    k_x, k_p = jax.random.split(key)
    x = jax.random.normal(k_x, (batch, feature_count), jnp.float32)
    params = init_params(feature_count, k_p)

    fwd = jax.jit(simple_nn_forward)

    # Full-precision path: tight check against the f32 reference.
    prep_f32 = prepare_params(params, matmul_dtype=jnp.float32)
    out_f32 = jax.block_until_ready(fwd(x, prep_f32))
    ref_f32 = reference_forward(x, params, matmul_dtype=jnp.float32)
    assert out_f32.shape == (batch, 1), out_f32.shape
    assert jnp.allclose(out_f32, ref_f32, atol=1e-4, rtol=1e-4), (
        float(jnp.max(jnp.abs(out_f32 - ref_f32))))

    # Default mixed-precision path (bf16 MXU inputs + bf16 epilogue): check
    # against a precision-matched reference with bf16-level tolerances.
    prep_bf16 = prepare_params(params)
    out_bf16 = jax.block_until_ready(fwd(x, prep_bf16))
    ref_bf16 = reference_forward(x, params, matmul_dtype=jnp.bfloat16)
    assert out_bf16.shape == (batch, 1), out_bf16.shape
    assert jnp.allclose(out_bf16, ref_bf16, atol=5e-3, rtol=2e-2), (
        float(jnp.max(jnp.abs(out_bf16 - ref_bf16))))

    print("KERNEL_OK")
</pallas_src>

<mosaic_0001>
module attributes {stable_mosaic.version = 11 : i64} {
  func.func @_mlp_kernel(%arg0: i32, %arg1: memref<160x32xf32, #tpu.memory_space<vmem>>, %arg2: memref<32x512xf32, #tpu.memory_space<vmem>>, %arg3: memref<1x512xf32, #tpu.memory_space<vmem>>, %arg4: memref<512x512xf32, #tpu.memory_space<vmem>>, %arg5: memref<1x512xf32, #tpu.memory_space<vmem>>, %arg6: memref<512x256xf32, #tpu.memory_space<vmem>>, %arg7: memref<1x256xf32, #tpu.memory_space<vmem>>, %arg8: memref<256x128xf32, #tpu.memory_space<vmem>>, %arg9: memref<1x128xf32, #tpu.memory_space<vmem>>, %arg10: memref<128x128xf32, #tpu.memory_space<vmem>>, %arg11: memref<1x128xf32, #tpu.memory_space<vmem>>, %arg12: memref<128x128xf32, #tpu.memory_space<vmem>>, %arg13: memref<1x128xf32, #tpu.memory_space<vmem>>, %arg14: memref<128x128xf32, #tpu.memory_space<vmem>>, %arg15: memref<1x128xf32, #tpu.memory_space<vmem>>, %arg16: memref<160x128xf32, #tpu.memory_space<vmem>>) attributes {dimension_semantics = [#tpu.dimension_semantics<parallel>], iteration_bounds = array<i64: 2>, scalar_prefetch = 0 : i64, scratch_operands = 0 : i64, tpu.core_type = #tpu.core_type<tc>, window_params = [{transform_indices = @transform_0, window_bounds = array<i64: 160, 32>}, {pipeline_mode = #tpu.pipeline_mode<synchronous>, transform_indices = @transform_1, window_bounds = array<i64: 32, 512>}, {pipeline_mode = #tpu.pipeline_mode<synchronous>, transform_indices = @transform_2, window_bounds = array<i64: 1, 512>}, {pipeline_mode = #tpu.pipeline_mode<synchronous>, transform_indices = @transform_3, window_bounds = array<i64: 512, 512>}, {pipeline_mode = #tpu.pipeline_mode<synchronous>, transform_indices = @transform_4, window_bounds = array<i64: 1, 512>}, {pipeline_mode = #tpu.pipeline_mode<synchronous>, transform_indices = @transform_5, window_bounds = array<i64: 512, 256>}, {pipeline_mode = #tpu.pipeline_mode<synchronous>, transform_indices = @transform_6, window_bounds = array<i64: 1, 256>}, {pipeline_mode = #tpu.pipeline_mode<synchronous>, transform_indices = @transform_7, window_bounds = array<i64: 256, 128>}, {pipeline_mode = #tpu.pipeline_mode<synchronous>, transform_indices = @transform_8, window_bounds = array<i64: 1, 128>}, {pipeline_mode = #tpu.pipeline_mode<synchronous>, transform_indices = @transform_9, window_bounds = array<i64: 128, 128>}, {pipeline_mode = #tpu.pipeline_mode<synchronous>, transform_indices = @transform_10, window_bounds = array<i64: 1, 128>}, {pipeline_mode = #tpu.pipeline_mode<synchronous>, transform_indices = @transform_11, window_bounds = array<i64: 128, 128>}, {pipeline_mode = #tpu.pipeline_mode<synchronous>, transform_indices = @transform_12, window_bounds = array<i64: 1, 128>}, {pipeline_mode = #tpu.pipeline_mode<synchronous>, transform_indices = @transform_13, window_bounds = array<i64: 128, 128>}, {pipeline_mode = #tpu.pipeline_mode<synchronous>, transform_indices = @transform_14, window_bounds = array<i64: 1, 128>}, {transform_indices = @transform_15, window_bounds = array<i64: 160, 128>}]} {
    %c0 = arith.constant 0 : index
    %c0_0 = arith.constant 0 : index
    %0 = vector.load %arg1[%c0, %c0_0] : memref<160x32xf32, #tpu.memory_space<vmem>>, vector<160x32xf32>
    %c0_1 = arith.constant 0 : index
    %c0_2 = arith.constant 0 : index
    %1 = vector.load %arg2[%c0_1, %c0_2] : memref<32x512xf32, #tpu.memory_space<vmem>>, vector<32x512xf32>
    %cst = arith.constant dense<0.000000e+00> : vector<160x512xf32>
    %2 = tpu.matmul %0, %1, %cst {dimension_numbers = #tpu.dot_dimension_numbers<[1], [0], [0], [1], [0, 0, 1, 1], [], []>} : vector<160x32xf32>, vector<32x512xf32>, vector<160x512xf32> -> vector<160x512xf32>
    %c0_3 = arith.constant 0 : index
    %c0_4 = arith.constant 0 : index
    %3 = vector.load %arg3[%c0_3, %c0_4] : memref<1x512xf32, #tpu.memory_space<vmem>>, vector<1x512xf32>
    %4 = vector.broadcast %3 : vector<1x512xf32> to vector<160x512xf32>
    %5 = arith.addf %2, %4 : vector<160x512xf32>
    %cst_5 = arith.constant 0.000000e+00 : f32
    %6 = vector.broadcast %cst_5 : f32 to vector<160x512xf32>
    %7 = arith.maximumf %5, %6 : vector<160x512xf32>
    %c0_6 = arith.constant 0 : index
    %c0_7 = arith.constant 0 : index
    %8 = vector.load %arg4[%c0_6, %c0_7] : memref<512x512xf32, #tpu.memory_space<vmem>>, vector<512x512xf32>
    %cst_8 = arith.constant dense<0.000000e+00> : vector<160x512xf32>
    %9 = tpu.matmul %7, %8, %cst_8 {dimension_numbers = #tpu.dot_dimension_numbers<[1], [0], [0], [1], [0, 0, 1, 1], [], []>} : vector<160x512xf32>, vector<512x512xf32>, vector<160x512xf32> -> vector<160x512xf32>
    %c0_9 = arith.constant 0 : index
    %c0_10 = arith.constant 0 : index
    %10 = vector.load %arg5[%c0_9, %c0_10] : memref<1x512xf32, #tpu.memory_space<vmem>>, vector<1x512xf32>
    %11 = vector.broadcast %10 : vector<1x512xf32> to vector<160x512xf32>
    %12 = arith.addf %9, %11 : vector<160x512xf32>
    %cst_11 = arith.constant 0.000000e+00 : f32
    %13 = vector.broadcast %cst_11 : f32 to vector<160x512xf32>
    %14 = arith.maximumf %12, %13 : vector<160x512xf32>
    %c0_12 = arith.constant 0 : index
    %c0_13 = arith.constant 0 : index
    %15 = vector.load %arg6[%c0_12, %c0_13] : memref<512x256xf32, #tpu.memory_space<vmem>>, vector<512x256xf32>
    %cst_14 = arith.constant dense<0.000000e+00> : vector<160x256xf32>
    %16 = tpu.matmul %14, %15, %cst_14 {dimension_numbers = #tpu.dot_dimension_numbers<[1], [0], [0], [1], [0, 0, 1, 1], [], []>} : vector<160x512xf32>, vector<512x256xf32>, vector<160x256xf32> -> vector<160x256xf32>
    %c0_15 = arith.constant 0 : index
    %c0_16 = arith.constant 0 : index
    %17 = vector.load %arg7[%c0_15, %c0_16] : memref<1x256xf32, #tpu.memory_space<vmem>>, vector<1x256xf32>
    %18 = vector.broadcast %17 : vector<1x256xf32> to vector<160x256xf32>
    %19 = arith.addf %16, %18 : vector<160x256xf32>
    %cst_17 = arith.constant 0.000000e+00 : f32
    %20 = vector.broadcast %cst_17 : f32 to vector<160x256xf32>
    %21 = arith.maximumf %19, %20 : vector<160x256xf32>
    %c0_18 = arith.constant 0 : index
    %c0_19 = arith.constant 0 : index
    %22 = vector.load %arg8[%c0_18, %c0_19] : memref<256x128xf32, #tpu.memory_space<vmem>>, vector<256x128xf32>
    %cst_20 = arith.constant dense<0.000000e+00> : vector<160x128xf32>
    %23 = tpu.matmul %21, %22, %cst_20 {dimension_numbers = #tpu.dot_dimension_numbers<[1], [0], [0], [1], [0, 0, 1, 1], [], []>} : vector<160x256xf32>, vector<256x128xf32>, vector<160x128xf32> -> vector<160x128xf32>
    %c0_21 = arith.constant 0 : index
    %c0_22 = arith.constant 0 : index
    %24 = vector.load %arg9[%c0_21, %c0_22] : memref<1x128xf32, #tpu.memory_space<vmem>>, vector<1x128xf32>
    %25 = vector.broadcast %24 : vector<1x128xf32> to vector<160x128xf32>
    %26 = arith.addf %23, %25 : vector<160x128xf32>
    %cst_23 = arith.constant 0.000000e+00 : f32
    %27 = vector.broadcast %cst_23 : f32 to vector<160x128xf32>
    %28 = arith.maximumf %26, %27 : vector<160x128xf32>
    %c0_24 = arith.constant 0 : index
    %c0_25 = arith.constant 0 : index
    %29 = vector.load %arg10[%c0_24, %c0_25] : memref<128x128xf32, #tpu.memory_space<vmem>>, vector<128x128xf32>
    %cst_26 = arith.constant dense<0.000000e+00> : vector<160x128xf32>
    %30 = tpu.matmul %28, %29, %cst_26 {dimension_numbers = #tpu.dot_dimension_numbers<[1], [0], [0], [1], [0, 0, 1, 1], [], []>} : vector<160x128xf32>, vector<128x128xf32>, vector<160x128xf32> -> vector<160x128xf32>
    %c0_27 = arith.constant 0 : index
    %c0_28 = arith.constant 0 : index
    %31 = vector.load %arg11[%c0_27, %c0_28] : memref<1x128xf32, #tpu.memory_space<vmem>>, vector<1x128xf32>
    %32 = vector.broadcast %31 : vector<1x128xf32> to vector<160x128xf32>
    %33 = arith.addf %30, %32 : vector<160x128xf32>
    %cst_29 = arith.constant 0.000000e+00 : f32
    %34 = vector.broadcast %cst_29 : f32 to vector<160x128xf32>
    %35 = arith.maximumf %33, %34 : vector<160x128xf32>
    %c0_30 = arith.constant 0 : index
    %c0_31 = arith.constant 0 : index
    %36 = vector.load %arg12[%c0_30, %c0_31] : memref<128x128xf32, #tpu.memory_space<vmem>>, vector<128x128xf32>
    %cst_32 = arith.constant dense<0.000000e+00> : vector<160x128xf32>
    %37 = tpu.matmul %35, %36, %cst_32 {dimension_numbers = #tpu.dot_dimension_numbers<[1], [0], [0], [1], [0, 0, 1, 1], [], []>} : vector<160x128xf32>, vector<128x128xf32>, vector<160x128xf32> -> vector<160x128xf32>
    %c0_33 = arith.constant 0 : index
    %c0_34 = arith.constant 0 : index
    %38 = vector.load %arg13[%c0_33, %c0_34] : memref<1x128xf32, #tpu.memory_space<vmem>>, vector<1x128xf32>
    %39 = vector.broadcast %38 : vector<1x128xf32> to vector<160x128xf32>
    %40 = arith.addf %37, %39 : vector<160x128xf32>
    %cst_35 = arith.constant 0.000000e+00 : f32
    %41 = vector.broadcast %cst_35 : f32 to vector<160x128xf32>
    %42 = arith.maximumf %40, %41 : vector<160x128xf32>
    %c0_36 = arith.constant 0 : index
    %c0_37 = arith.constant 0 : index
    %43 = vector.load %arg14[%c0_36, %c0_37] : memref<128x128xf32, #tpu.memory_space<vmem>>, vector<128x128xf32>
    %cst_38 = arith.constant dense<0.000000e+00> : vector<160x128xf32>
    %44 = tpu.matmul %42, %43, %cst_38 {dimension_numbers = #tpu.dot_dimension_numbers<[1], [0], [0], [1], [0, 0, 1, 1], [], []>} : vector<160x128xf32>, vector<128x128xf32>, vector<160x128xf32> -> vector<160x128xf32>
    %c0_39 = arith.constant 0 : index
    %c0_40 = arith.constant 0 : index
    %45 = vector.load %arg15[%c0_39, %c0_40] : memref<1x128xf32, #tpu.memory_space<vmem>>, vector<1x128xf32>
    %46 = vector.broadcast %45 : vector<1x128xf32> to vector<160x128xf32>
    %47 = arith.addf %44, %46 : vector<160x128xf32>
    %c0_41 = arith.constant 0 : index
    %c0_42 = arith.constant 0 : index
    %48 = vector.load %arg16[%c0_41, %c0_42] : memref<160x128xf32, #tpu.memory_space<vmem>>, vector<160x128xf32>
    tpu.vector_store %arg16[%c0_41, %c0_42], %47 {strides = array<i32>} : memref<160x128xf32, #tpu.memory_space<vmem>>, vector<160x128xf32>,
    return
  }
  func.func @transform_0(%arg0: i32) -> (i32, i32) {
    %c0_i32 = arith.constant 0 : i32
    %c0_i32_0 = arith.constant 0 : i32
    return %arg0, %c0_i32 : i32, i32
  }
  func.func @transform_1(%arg0: i32) -> (i32, i32) {
    %c0_i32 = arith.constant 0 : i32
    %c0_i32_0 = arith.constant 0 : i32
    %c0_i32_1 = arith.constant 0 : i32
    return %c0_i32, %c0_i32_0 : i32, i32
  }
  func.func @transform_2(%arg0: i32) -> (i32, i32) {
    %c0_i32 = arith.constant 0 : i32
    %c0_i32_0 = arith.constant 0 : i32
    %c0_i32_1 = arith.constant 0 : i32
    return %c0_i32, %c0_i32_0 : i32, i32
  }
  func.func @transform_3(%arg0: i32) -> (i32, i32) {
    %c0_i32 = arith.constant 0 : i32
    %c0_i32_0 = arith.constant 0 : i32
    %c0_i32_1 = arith.constant 0 : i32
    return %c0_i32, %c0_i32_0 : i32, i32
  }
  func.func @transform_4(%arg0: i32) -> (i32, i32) {
    %c0_i32 = arith.constant 0 : i32
    %c0_i32_0 = arith.constant 0 : i32
    %c0_i32_1 = arith.constant 0 : i32
    return %c0_i32, %c0_i32_0 : i32, i32
  }
  func.func @transform_5(%arg0: i32) -> (i32, i32) {
    %c0_i32 = arith.constant 0 : i32
    %c0_i32_0 = arith.constant 0 : i32
    %c0_i32_1 = arith.constant 0 : i32
    return %c0_i32, %c0_i32_0 : i32, i32
  }
  func.func @transform_6(%arg0: i32) -> (i32, i32) {
    %c0_i32 = arith.constant 0 : i32
    %c0_i32_0 = arith.constant 0 : i32
    %c0_i32_1 = arith.constant 0 : i32
    return %c0_i32, %c0_i32_0 : i32, i32
  }
  func.func @transform_7(%arg0: i32) -> (i32, i32) {
    %c0_i32 = arith.constant 0 : i32
    %c0_i32_0 = arith.constant 0 : i32
    %c0_i32_1 = arith.constant 0 : i32
    return %c0_i32, %c0_i32_0 : i32, i32
  }
  func.func @transform_8(%arg0: i32) -> (i32, i32) {
    %c0_i32 = arith.constant 0 : i32
    %c0_i32_0 = arith.constant 0 : i32
    %c0_i32_1 = arith.constant 0 : i32
    return %c0_i32, %c0_i32_0 : i32, i32
  }
  func.func @transform_9(%arg0: i32) -> (i32, i32) {
    %c0_i32 = arith.constant 0 : i32
    %c0_i32_0 = arith.constant 0 : i32
    %c0_i32_1 = arith.constant 0 : i32
    return %c0_i32, %c0_i32_0 : i32, i32
  }
  func.func @transform_10(%arg0: i32) -> (i32, i32) {
    %c0_i32 = arith.constant 0 : i32
    %c0_i32_0 = arith.constant 0 : i32
    %c0_i32_1 = arith.constant 0 : i32
    return %c0_i32, %c0_i32_0 : i32, i32
  }
  func.func @transform_11(%arg0: i32) -> (i32, i32) {
    %c0_i32 = arith.constant 0 : i32
    %c0_i32_0 = arith.constant 0 : i32
    %c0_i32_1 = arith.constant 0 : i32
    return %c0_i32, %c0_i32_0 : i32, i32
  }
  func.func @transform_12(%arg0: i32) -> (i32, i32) {
    %c0_i32 = arith.constant 0 : i32
    %c0_i32_0 = arith.constant 0 : i32
    %c0_i32_1 = arith.constant 0 : i32
    return %c0_i32, %c0_i32_0 : i32, i32
  }
  func.func @transform_13(%arg0: i32) -> (i32, i32) {
    %c0_i32 = arith.constant 0 : i32
    %c0_i32_0 = arith.constant 0 : i32
    %c0_i32_1 = arith.constant 0 : i32
    return %c0_i32, %c0_i32_0 : i32, i32
  }
  func.func @transform_14(%arg0: i32) -> (i32, i32) {
    %c0_i32 = arith.constant 0 : i32
    %c0_i32_0 = arith.constant 0 : i32
    %c0_i32_1 = arith.constant 0 : i32
    return %c0_i32, %c0_i32_0 : i32, i32
  }
  func.func @transform_15(%arg0: i32) -> (i32, i32) {
    %c0_i32 = arith.constant 0 : i32
    %c0_i32_0 = arith.constant 0 : i32
    return %arg0, %c0_i32 : i32, i32
  }
}

</mosaic_0001>

<bundles_post_ra>
// kernel: simple_nn_forward.1
= control target key start
LH: loop header
LB: loop body
LE: loop exit
PB: predicated region body
PF: predicated region fallthrough
CT: control target
= control target key end

     0   :  { %s7307_s0 = inlined_call_operand.vmem [shape: f32[320,32], index: 0, kind: input, shape index: {}]   ;;  %s7308_s1 = inlined_call_operand.vmem [shape: f32[32,512], index: 1, kind: input, shape index: {}]   ;;  %s7309_s2 = inlined_call_operand.vmem [shape: f32[1,512], index: 2, kind: input, shape index: {}]   ;;  %s7310_s3 = inlined_call_operand.hbm [shape: f32[512,512], index: 3, kind: input, shape index: {}]   ;;  %s7311_s4 = inlined_call_operand.vmem [shape: f32[1,512], index: 4, kind: input, shape index: {}]   ;;  %s7312_s5 = inlined_call_operand.vmem [shape: f32[512,256], index: 5, kind: input, shape index: {}]   ;;  %s7313_s6 = inlined_call_operand.vmem [shape: f32[1,256], index: 6, kind: input, shape index: {}]   ;;  %s7314_s7 = inlined_call_operand.vmem [shape: f32[256,128], index: 7, kind: input, shape index: {}]   ;;  %s7315_s8 = inlined_call_operand.vmem [shape: f32[1,128], index: 8, kind: input, shape index: {}]   ;;  %s7316_s9 = inlined_call_operand.vmem [shape: f32[128,128], index: 9, kind: input, shape index: {}]   ;;  %s7317_s10 = inlined_call_operand.vmem [shape: f32[1,128], index: 10, kind: input, shape index: {}]   ;;  %s7318_s11 = inlined_call_operand.hbm [shape: f32[128,128], index: 11, kind: input, shape index: {}]   ;;  %s7319_s12 = inlined_call_operand.vmem [shape: f32[1,128], index: 12, kind: input, shape index: {}]   ;;  %s7320_s13 = inlined_call_operand.hbm [shape: f32[128,128], index: 13, kind: input, shape index: {}]   ;;  %s7321_s14 = inlined_call_operand.vmem [shape: f32[1,128], index: 14, kind: input, shape index: {}]   ;;  %s7322_s15 = inlined_call_operand.vmem [shape: f32[320,128], index: 15, kind: output, shape index: {}]  }
   0x1   :  { %7578 = sst [smem:[#allocation89_spill]] %s7310_s3 }
   0x2   :  { %7579 = sst [smem:[#allocation90_spill]] %s7318_s11 }
   0x3   :  { %7580 = sst [smem:[#allocation91_spill]] %s7322_s15 }
   0x4   :  { %20 = vsyncpa [#allocation3], 0 }
   0x5   :  { %21 = vsyncpa [#allocation5], 0  ;;  %s4407_s18 = smov 0  }
   0x6 LB: > { %s7581_s11 = sld [smem:[#allocation90_spill]]  ;;  %s7323_s22 = sadd.s32 4294967295, %s4318_s18   ;;  %s4318_s18 = sphi %s4407_s18, %s27_s18  }
   0x7   : > { %p4061_p0 = scmp.ge.s32.totalorder %s4318_s18, 1  ;;  %p378_p1 = scmp.lt.s32.totalorder %s4318_s18, 3 }
   0x8   : > { %p4420_p2 = scmp.eq.s32.totalorder %s7323_s22, 0  ;;  %s4320_s25 = smov [#allocation4]  }
   0x9   : > { %p4424_p3 = pnand %p4061_p0, %p378_p1  ;;  %s432_s26 = sshll.u32 %s4320_s25, 4  ;;  %s433_s26 = int_to_ptr.vmem [resolvable:$true] %s432_s26 }
   0xa   : > { %s7584_s3 = sld [smem:[#allocation89_spill]]  ;;  %s4321_s16 = smov [#allocation2]  }
   0xb   : > { %p4178_p4 = pneg %p4424_p3  ;;  %s397_s17 = sshll.u32 %s4321_s16, 4  ;;  %s398_s17 = int_to_ptr.vmem [resolvable:$true] %s397_s17 }
   0xc   : > { %s430_s21 = sshll.u32 %s7581_s11, 4  ;;  %s4322_s19 = smov 128   ;;  %s431_s21 = int_to_ptr.hbm [resolvable:$true] %s430_s21 }
   0xd   : > { %p4435_p5 = pnand %p4420_p2, %p4178_p4  ;;  %s4323_s20 = smov 8  }
   0xe   : > { %s447_s27 = sshll.u32 %s7320_s13, 4  ;;  %s4324_s28 = smov 512   ;;  %s448_s27 = int_to_ptr.hbm [resolvable:$true] %s447_s27 }
   0xf   : > { %4184 = dma.hbm_to_vmem [thread:$0]  (!%p4435_p5), %s431_s21, 2048, %s433_s26, [#allocation5], %s4322_s19, %s4322_s19, %s4323_s20  }
  0x10   : > { %s395_s29 = sshll.u32 %s7584_s3, 4  ;;  %s4325_s3 = smov 32   ;;  %s396_s29 = int_to_ptr.hbm [resolvable:$true] %s395_s29 }
  0x11   : > { %4181 = dma.hbm_to_vmem [thread:$0]  (!%p4435_p5), %s396_s29, 32768, %s398_s17, [#allocation3], %s4324_s28, %s4324_s28, %s4325_s3  }
  0x12   : > { %s4326_s11 = smov [#allocation6]   ;;  %477 = sbr.rel (%p4424_p3) target bundleno = 1878 (0x756), region = 80 }
  0x13   : > { %s449_s15 = sshll.u32 %s4326_s11, 4  ;;  %s450_s15 = int_to_ptr.vmem [resolvable:$true] %s449_s15 }
  0x14   : > { %4187 = dma.hbm_to_vmem [thread:$0]  (!%p4435_p5), %s448_s27, 2048, %s450_s15, [#allocation5], %s4322_s19, %s4322_s19, %s4323_s20  }
  0x17   : > { %4309 = dma.done.wait (%p4420_p2), [#allocation3], 32768  }
  0x18   : > { %4311 = vsyncadd (%p4420_p2), [#allocation3], 4294934528 }
  0x19   : > { %4313 = dma.done.wait (%p4420_p2), [#allocation5], 4096  }
  0x1a   : > { %4315 = vsyncadd (%p4420_p2), [#allocation5], 4294963200  ;;  %s7586_s3 = sadd.s32 4294967295, %s4318_s18   ;;  %v580_v0 = vld [vmem:[%s7308_s1 + $0x60] sm:$0xff]  ;;  %vm594_vm0 = vcmask 261120   ;;  %v581_v8 = vld [vmem:[%s7308_s1 + $0x68] sm:$0xff] }
  0x1b   : > { %s536_s11 = smul.u32 20, %s7586_s3  ;;  %v576_v1 = vld [vmem:[%s7308_s1 + $0x40] sm:$0xff]  ;;  %667 = vmatpush.msra.mxu0 %v580_v0  ;;  %4154 = vmatpush.msra.mxu1 %v580_v0  ;;  %v582_v9 = vld [vmem:[%s7308_s1 + $0x70] sm:$0xff]  ;;  %v583_v10 = vld [vmem:[%s7308_s1 + $0x78] sm:$0xff]  ;;  %s7981_s21 = sld [smem:[#allocation91_spill]] }
  0x1c   : > { %4155 = vmatpush.msra.mxu2 %v580_v0  ;;  %4156 = vmatpush.msra.mxu3 %v580_v0  ;;  %v572_v2 = vld [vmem:[%s7308_s1 + $0x20] sm:$0xff]  ;;  %v577_v11 = vld [vmem:[%s7308_s1 + $0x48] sm:$0xff]  ;;  %v578_v12 = vld [vmem:[%s7308_s1 + $0x50] sm:$0xff] }
  0x1d   : > { %p537_p6 = scmp.lt.s32.totalorder %s536_s11, 39  ;;  %668 = vmatpush.msra.mxu0 %v576_v1  ;;  %4157 = vmatpush.msra.mxu1 %v576_v1  ;;  %v568_v3 = vld [vmem:[%s7308_s1] sm:$0xff]  ;;  %v573_v13 = vld [vmem:[%s7308_s1 + $0x28] sm:$0xff]  ;;  %v579_v14 = vld [vmem:[%s7308_s1 + $0x58] sm:$0xff] }
  0x1e   : > { %4158 = vmatpush.msra.mxu2 %v576_v1  ;;  %4159 = vmatpush.msra.mxu3 %v576_v1  ;;  %v574_v15 = vld [vmem:[%s7308_s1 + $0x30] sm:$0xff]  ;;  %v575_v16 = vld [vmem:[%s7308_s1 + $0x38] sm:$0xff]  ;;  %v569_v21 = vld [vmem:[%s7308_s1 + $0x8] sm:$0xff] }
  0x1f   : > { %s7983_s11 = smov (!%p537_p6, %s536_s11), 39  ;;  %669 = vmatpush.msra.mxu0 %v572_v2  ;;  %4160 = vmatpush.msra.mxu1 %v572_v2  ;;  %v570_v22 = vld [vmem:[%s7308_s1 + $0x10] sm:$0xff]  ;;  %v571_v23 = vld [vmem:[%s7308_s1 + $0x18] sm:$0xff]  ;;  %v1167_v24 = vld [vmem:[#allocation2 + $0x3e0] sm:$0xff] }
  0x20   : > { %s4070_s26 = sshll.u32 %s7983_s11, 3  ;;  %4161 = vmatpush.msra.mxu2 %v572_v2  ;;  %4162 = vmatpush.msra.mxu3 %v572_v2  ;;  %v1163_v29 = vld [vmem:[#allocation2 + $0x3c0] sm:$0xff] }
  0x21   : > { %s4477_s17 = scalar_lea.vmem %s7307_s0, %s4070_s26  ;;  %670 = vmatpush.msra.mxu0 %v568_v3  ;;  %4163 = vmatpush.msra.mxu1 %v568_v3  ;;  %v1159_v34 = vld [vmem:[#allocation2 + $0x3a0] sm:$0xff]  ;;  %s7259_s22 = scalar_lea.vmem %s7981_s21, %s4070_s26 }
  0x22   : > { %v4483_v4 = vld [vmem:[%s4477_s17] sm:$0xff]  ;;  %v4486_v5 = vld [vmem:[%s4477_s17 + $0x28] sm:$0xff]  ;;  %v4489_v6 = vld [vmem:[%s4477_s17 + $0x50] sm:$0xff]  ;;  %4164 = vmatpush.msra.mxu2 %v568_v3  ;;  %4165 = vmatpush.msra.mxu3 %v568_v3 }
  0x23   : > { %v4492_v7 = vld [vmem:[%s4477_s17 + $0x78] sm:$0xff]  ;;  %4072 = vmatmul.msk.f32.vlgmr.msra.gmra.mxu0 %vm594_vm0, %v4483_v4  ;;  %4077 = vmatmul.msk.f32.vlgmr.msra.gmra.mxu1 %vm594_vm0, %v4486_v5  ;;  %v4530_v17 = vld [vmem:[%s4477_s17 + $0x8] sm:$0xff]  ;;  %v4533_v18 = vld [vmem:[%s4477_s17 + $0x30] sm:$0xff] }
  0x24   : > { %4082 = vmatmul.msk.f32.vlgmr.msra.gmra.mxu2 %vm594_vm0, %v4489_v6  ;;  %4087 = vmatmul.msk.f32.vlgmr.msra.gmra.mxu3 %vm594_vm0, %v4492_v7  ;;  %v4536_v19 = vld [vmem:[%s4477_s17 + $0x58] sm:$0xff]  ;;  %v4539_v20 = vld [vmem:[%s4477_s17 + $0x80] sm:$0xff]  ;;  %v550_v25 = vld [vmem:[%s4477_s17 + $0x10] sm:$0xff] }
  0x25   : > { %744 = vmatpush.msrb.mxu1 %v581_v8  ;;  %821 = vmatpush.msrb.mxu2 %v582_v9  ;;  %v4560_v26 = vld [vmem:[%s4477_s17 + $0x38] sm:$0xff]  ;;  %v4563_v27 = vld [vmem:[%s4477_s17 + $0x60] sm:$0xff]  ;;  %v4566_v28 = vld [vmem:[%s4477_s17 + $0x88] sm:$0xff] }
  0x26   : > { %898 = vmatpush.msrb.mxu3 %v583_v10  ;;  %v551_v30 = vld [vmem:[%s4477_s17 + $0x18] sm:$0xff]  ;;  %v4577_v31 = vld [vmem:[%s4477_s17 + $0x40] sm:$0xff]  ;;  %v4580_v32 = vld [vmem:[%s4477_s17 + $0x68] sm:$0xff] }
  0x27   : > { %745 = vmatpush.msrb.mxu1 %v577_v11  ;;  %822 = vmatpush.msrb.mxu2 %v578_v12  ;;  %v4583_v33 = vld [vmem:[%s4477_s17 + $0x90] sm:$0xff]  ;;  %v1231_v35 = vld [vmem:[#allocation2 + $0x5e0] sm:$0xff]  ;;  %v4594_v37 = vld [vmem:[%s4477_s17 + $0x48] sm:$0xff] }
  0x28   : > { %899 = vmatpush.msrb.mxu3 %v579_v14  ;;  %v552_v36 = vld [vmem:[%s4477_s17 + $0x20] sm:$0xff]  ;;  %v4597_v38 = vld [vmem:[%s4477_s17 + $0x70] sm:$0xff]  ;;  %v4600_v39 = vld [vmem:[%s4477_s17 + $0x98] sm:$0xff] }
  0x29   : > { %746 = vmatpush.msrb.mxu1 %v573_v13  ;;  %823 = vmatpush.msrb.mxu2 %v574_v15  ;;  %v1295_v40 = vld [vmem:[#allocation2 + $0x7e0] sm:$0xff] }
  0x2a   : > { %900 = vmatpush.msrb.mxu3 %v575_v16  ;;  %v1155_v41 = vld [vmem:[#allocation2 + $0x380] sm:$0xff] }
  0x2b   : > { %4073 = vmatmul.msk.f32.gmra.mxu0 %vm594_vm0, %v4530_v17  ;;  %4078 = vmatmul.msk.f32.gmra.mxu1 %vm594_vm0, %v4533_v18  ;;  %v1227_v42 = vld [vmem:[#allocation2 + $0x5c0] sm:$0xff] }
  0x2c   : > { %4083 = vmatmul.msk.f32.gmra.mxu2 %vm594_vm0, %v4536_v19  ;;  %4088 = vmatmul.msk.f32.gmra.mxu3 %vm594_vm0, %v4539_v20  ;;  %v1291_v43 = vld [vmem:[#allocation2 + $0x7c0] sm:$0xff] }
  0x2d   : > { %747 = vmatpush.msrb.mxu1 %v569_v21  ;;  %824 = vmatpush.msrb.mxu2 %v570_v22  ;;  %v1151_v44 = vld [vmem:[#allocation2 + $0x360] sm:$0xff] }
  0x2e   : > { %901 = vmatpush.msrb.mxu3 %v571_v23  ;;  %v1223_v45 = vld [vmem:[#allocation2 + $0x5a0] sm:$0xff] }
  0x2f   : > { %1386 = vmatpush.msra.mxu1 %v1167_v24  ;;  %1463 = vmatpush.msra.mxu2 %v1231_v35  ;;  %v1287_v46 = vld [vmem:[#allocation2 + $0x7a0] sm:$0xff] }
  0x30   : > { %1540 = vmatpush.msra.mxu3 %v1295_v40  ;;  %v1147_v47 = vld [vmem:[#allocation2 + $0x340] sm:$0xff] }
  0x31   : > { %1387 = vmatpush.msra.mxu1 %v1163_v29  ;;  %1464 = vmatpush.msra.mxu2 %v1227_v42  ;;  %v1219_v48 = vld [vmem:[#allocation2 + $0x580] sm:$0xff] }
  0x32   : > { %1541 = vmatpush.msra.mxu3 %v1291_v43  ;;  %v1283_v49 = vld [vmem:[#allocation2 + $0x780] sm:$0xff] }
  0x33   : > { %4074 = vmatmul.msk.f32.gmra.mxu0 %vm594_vm0, %v550_v25  ;;  %4079 = vmatmul.msk.f32.gmra.mxu1 %vm594_vm0, %v4560_v26  ;;  %v1103_v50 = vld [vmem:[#allocation2 + $0x1e0] sm:$0xff] }
  0x34   : > { %4084 = vmatmul.msk.f32.gmra.mxu2 %vm594_vm0, %v4563_v27  ;;  %4089 = vmatmul.msk.f32.gmra.mxu3 %vm594_vm0, %v4566_v28  ;;  %v1143_v51 = vld [vmem:[#allocation2 + $0x320] sm:$0xff] }
  0x35   : > { %1388 = vmatpush.msra.mxu1 %v1159_v34  ;;  %1465 = vmatpush.msra.mxu2 %v1223_v45  ;;  %v1099_v52 = vld [vmem:[#allocation2 + $0x1c0] sm:$0xff] }
  0x36   : > { %1542 = vmatpush.msra.mxu3 %v1287_v46  ;;  %1309 = vmatpush.msrb.mxu0 %v1103_v50  ;;  %v1215_v53 = vld [vmem:[#allocation2 + $0x560] sm:$0xff] }
  0x37   : > { %1389 = vmatpush.msra.mxu1 %v1155_v41  ;;  %1466 = vmatpush.msra.mxu2 %v1219_v48  ;;  %v1095_v54 = vld [vmem:[#allocation2 + $0x1a0] sm:$0xff] }
  0x38   : > { %1543 = vmatpush.msra.mxu3 %v1283_v49  ;;  %1310 = vmatpush.msrb.mxu0 %v1099_v52  ;;  %v1279_v55 = vld [vmem:[#allocation2 + $0x760] sm:$0xff] }
  0x39   : > { %1390 = vmatpush.msra.mxu1 %v1151_v44  ;;  %1467 = vmatpush.msra.mxu2 %v1215_v53  ;;  %v1091_v56 = vld [vmem:[#allocation2 + $0x180] sm:$0xff] }
  0x3a   : > { %1311 = vmatpush.msrb.mxu0 %v1095_v54  ;;  %v1087_v57 = vld [vmem:[#allocation2 + $0x160] sm:$0xff]  ;;  %1544 = vmatpush.msra.mxu3 %v1279_v55 }
  0x3b   : > { %4075 = vmatmul.msk.f32.gmra.mxu0 %vm594_vm0, %v551_v30  ;;  %4080 = vmatmul.msk.f32.gmra.mxu1 %vm594_vm0, %v4577_v31  ;;  %v1139_v58 = vld [vmem:[#allocation2 + $0x300] sm:$0xff] }
  0x3c   : > { %4085 = vmatmul.msk.f32.gmra.mxu2 %vm594_vm0, %v4580_v32  ;;  %4090 = vmatmul.msk.f32.gmra.mxu3 %vm594_vm0, %v4583_v33  ;;  %v1083_v59 = vld [vmem:[#allocation2 + $0x140] sm:$0xff] }
  0x3d   : > { %1391 = vmatpush.msra.mxu1 %v1147_v47  ;;  %1312 = vmatpush.msrb.mxu0 %v1091_v56  ;;  %v1079_v60 = vld [vmem:[#allocation2 + $0x120] sm:$0xff] }
  0x3e   : > { %v1211_v61 = vld [vmem:[#allocation2 + $0x540] sm:$0xff] }
  0x3f   : > { %1392 = vmatpush.msra.mxu1 %v1143_v51  ;;  %1313 = vmatpush.msrb.mxu0 %v1087_v57  ;;  %v1075_v62 = vld [vmem:[#allocation2 + $0x100] sm:$0xff] }
  0x40   : > { %v1275_v63 = vld [vmem:[#allocation2 + $0x740] sm:$0xff]  ;;  %1468 = vmatpush.msra.mxu2 %v1211_v61 }
  0x41   : > { %1393 = vmatpush.msra.mxu1 %v1139_v58  ;;  %1314 = vmatpush.msrb.mxu0 %v1083_v59  ;;  %v1071_v0 = vld [vmem:[#allocation2 + $0xe0] sm:$0xff] }
  0x42   : > { %1545 = vmatpush.msra.mxu3 %v1275_v63  ;;  %v1067_v1 = vld [vmem:[#allocation2 + $0xc0] sm:$0xff] }
  0x43   : > { %4076 = vmatmul.msk.f32.gmra.mxu0 %vm594_vm0, %v552_v36  ;;  %4081 = vmatmul.msk.f32.gmra.mxu1 %vm594_vm0, %v4594_v37  ;;  %v1063_v2 = vld [vmem:[#allocation2 + $0xa0] sm:$0xff] }
  0x44   : > { %4086 = vmatmul.msk.f32.gmra.mxu2 %vm594_vm0, %v4597_v38  ;;  %4091 = vmatmul.msk.f32.gmra.mxu3 %vm594_vm0, %v4600_v39  ;;  %v1135_v3 = vld [vmem:[#allocation2 + $0x2e0] sm:$0xff] }
  0x45   : > { %1315 = vmatpush.msrb.mxu0 %v1079_v60  ;;  %1394 = vmatpush.msra.mxu1 %v1135_v3  ;;  %v1055_v8 = vld [vmem:[#allocation2 + $0x60] sm:$0xff] }
  0x46   : > { %v1271_v9 = vld [vmem:[#allocation2 + $0x720] sm:$0xff] }
  0x47   : > { %1316 = vmatpush.msrb.mxu0 %v1075_v62  ;;  %1546 = vmatpush.msra.mxu3 %v1271_v9  ;;  %v1051_v10 = vld [vmem:[#allocation2 + $0x40] sm:$0xff] }
  0x48   : > { %v1047_v11 = vld [vmem:[#allocation2 + $0x20] sm:$0xff] }
  0x49   : > { %1317 = vmatpush.msrb.mxu0 %v1071_v0  ;;  %v1043_v12 = vld [vmem:[#allocation2] sm:$0xff] }
  0x4a   : > { %v1131_v13 = vld [vmem:[#allocation2 + $0x2c0] sm:$0xff] }
  0x4b   : > { %4092 = vmatmul.msk.f32.vlgmr.msrb.gmra.mxu1 %vm594_vm0, %v4483_v4  ;;  %1318 = vmatpush.msrb.mxu0 %v1067_v1  ;;  %v1203_v14 = vld [vmem:[#allocation2 + $0x500] sm:$0xff] }
  0x4c   : > { %4112 = vmatmul.msk.f32.vlgmr.msrb.gmra.mxu2 %vm594_vm0, %v4483_v4  ;;  %4132 = vmatmul.msk.f32.vlgmr.msrb.gmra.mxu3 %vm594_vm0, %v4483_v4  ;;  %v1059_v4 = vld [vmem:[#allocation2 + $0x80] sm:$0xff] }
  0x4d   : > { %1319 = vmatpush.msrb.mxu0 %v1063_v2  ;;  %1395 = vmatpush.msra.mxu1 %v1131_v13  ;;  %v1267_v15 = vld [vmem:[#allocation2 + $0x700] sm:$0xff] }
  0x4e   : > { %1547 = vmatpush.msra.mxu3 %v1267_v15  ;;  %v1127_v16 = vld [vmem:[#allocation2 + $0x2a0] sm:$0xff] }
  0x4f   : > { %1320 = vmatpush.msrb.mxu0 %v1059_v4  ;;  %1396 = vmatpush.msra.mxu1 %v1127_v16  ;;  %v4663_v21 = vld [vmem:[%s7309_s2] sm:$0xf] }
  0x50   : > { %v1123_v22 = vld [vmem:[#allocation2 + $0x280] sm:$0xff]  ;;  %v4672_v24 = vperm.slane %v4663_v21, 0 }
  0x51   : > { %1321 = vmatpush.msrb.mxu0 %v1055_v8  ;;  %v1195_v23 = vld [vmem:[#allocation2 + $0x4c0] sm:$0xff]  ;;  %1397 = vmatpush.msra.mxu1 %v1123_v22  ;;  %v1168_v22 = vld [vmem:[#allocation2 + $0x3e8] sm:$0xff] }
  0x52   : > { %v1191_v34 = vld [vmem:[#allocation2 + $0x4a0] sm:$0xff] }
  0x53   : > { %4093 = vmatmul.msk.f32.gmra.mxu1 %vm594_vm0, %v4530_v17  ;;  %1322 = vmatpush.msrb.mxu0 %v1051_v10  ;;  %v1255_v43 = vld [vmem:[#allocation2 + $0x6a0] sm:$0xff] }
  0x54   : > { %4113 = vmatmul.msk.f32.gmra.mxu2 %vm594_vm0, %v4530_v17  ;;  %4133 = vmatmul.msk.f32.gmra.mxu3 %vm594_vm0, %v4530_v17  ;;  %v1199_v17 = vld [vmem:[#allocation2 + $0x4e0] sm:$0xff] }
  0x55   : > { %1323 = vmatpush.msrb.mxu0 %v1047_v11  ;;  %v1187_v51 = vld [vmem:[#allocation2 + $0x480] sm:$0xff] }
  0x56   : > { %v1111_v59 = vld [vmem:[#allocation2 + $0x220] sm:$0xff] }
  0x57   : > { %1324 = vmatpush.msrb.mxu0 %v1043_v12  ;;  %v1247_v61 = vld [vmem:[#allocation2 + $0x660] sm:$0xff] }
  0x58   : > { %v1243_v8 = vld [vmem:[#allocation2 + $0x640] sm:$0xff] }
  0x59   : > { %v1239_v15 = vld [vmem:[#allocation2 + $0x620] sm:$0xff] }
  0x5a   : > { %v1235_v16 = vld [vmem:[#allocation2 + $0x600] sm:$0xff] }
  0x5b   : > { %4094 = vmatmul.msk.f32.gmra.mxu1 %vm594_vm0, %v550_v25 }
  0x5c   : > { %4114 = vmatmul.msk.f32.gmra.mxu2 %vm594_vm0, %v550_v25  ;;  %4134 = vmatmul.msk.f32.gmra.mxu3 %vm594_vm0, %v550_v25  ;;  %v1259_v25 = vld [vmem:[#allocation2 + $0x6c0] sm:$0xff] }
  0x63   : > { %4095 = vmatmul.msk.f32.gmra.mxu1 %vm594_vm0, %v551_v30 }
  0x64   : > { %4115 = vmatmul.msk.f32.gmra.mxu2 %vm594_vm0, %v551_v30  ;;  %4135 = vmatmul.msk.f32.gmra.mxu3 %vm594_vm0, %v551_v30 }
  0x6b   : > { %4096 = vmatmul.msk.f32.gmra.mxu1 %vm594_vm0, %v552_v36 }
  0x6c   : > { %4116 = vmatmul.msk.f32.gmra.mxu2 %vm594_vm0, %v552_v36  ;;  %4136 = vmatmul.msk.f32.gmra.mxu3 %vm594_vm0, %v552_v36 }
  0x73   : > { %4097 = vmatmul.msk.f32.gmra.mxu1 %vm594_vm0, %v4486_v5 }
  0x74   : > { %4117 = vmatmul.msk.f32.gmra.mxu2 %vm594_vm0, %v4486_v5  ;;  %4137 = vmatmul.msk.f32.gmra.mxu3 %vm594_vm0, %v4486_v5  ;;  %v1207_v5 = vld [vmem:[#allocation2 + $0x520] sm:$0xff] }
  0x75   : > { %1469 = vmatpush.msra.mxu2 %v1207_v5  ;;  %v1179_v5 = vld [vmem:[#allocation2 + $0x440] sm:$0xff] }
  0x77   : > { %1470 = vmatpush.msra.mxu2 %v1203_v14  ;;  %v1175_v14 = vld [vmem:[#allocation2 + $0x420] sm:$0xff] }
  0x79   : > { %1471 = vmatpush.msra.mxu2 %v1199_v17 }
  0x7b   : > { %4098 = vmatmul.msk.f32.gmra.mxu1 %vm594_vm0, %v4533_v18  ;;  %1472 = vmatpush.msra.mxu2 %v1195_v23 }
  0x7c   : > { %4118 = vmatmul.msk.f32.gmra.mxu2 %vm594_vm0, %v4533_v18  ;;  %4138 = vmatmul.msk.f32.gmra.mxu3 %vm594_vm0, %v4533_v18  ;;  %v1263_v18 = vld [vmem:[#allocation2 + $0x6e0] sm:$0xff] }
  0x7d   : > { %1548 = vmatpush.msra.mxu3 %v1263_v18  ;;  %1473 = vmatpush.msra.mxu2 %v1191_v34  ;;  %v1104_v18 = vld [vmem:[#allocation2 + $0x1e8] sm:$0xff] }
  0x7e   : > { %1617 = vmatpush.msra.mxu0 %v1104_v18 }
  0x7f   : > { %1549 = vmatpush.msra.mxu3 %v1259_v25  ;;  %1474 = vmatpush.msra.mxu2 %v1187_v51  ;;  %v4805_v51 = vperm.slane %v4663_v21, 2 }
  0x81   : > { %1550 = vmatpush.msra.mxu3 %v1255_v43 }
  0x83   : > { %4099 = vmatmul.msk.f32.gmra.mxu1 %vm594_vm0, %v4560_v26 }
  0x84   : > { %4119 = vmatmul.msk.f32.gmra.mxu2 %vm594_vm0, %v4560_v26  ;;  %4139 = vmatmul.msk.f32.gmra.mxu3 %vm594_vm0, %v4560_v26 }
  0x8b   : > { %4100 = vmatmul.msk.f32.gmra.mxu1 %vm594_vm0, %v4577_v31 }
  0x8c   : > { %4120 = vmatmul.msk.f32.gmra.mxu2 %vm594_vm0, %v4577_v31  ;;  %4140 = vmatmul.msk.f32.gmra.mxu3 %vm594_vm0, %v4577_v31 }
  0x93   : > { %4101 = vmatmul.msk.f32.gmra.mxu1 %vm594_vm0, %v4594_v37 }
  0x94   : > { %4121 = vmatmul.msk.f32.gmra.mxu2 %vm594_vm0, %v4594_v37  ;;  %4141 = vmatmul.msk.f32.gmra.mxu3 %vm594_vm0, %v4594_v37 }
  0x9b   : > { %4102 = vmatmul.msk.f32.gmra.mxu1 %vm594_vm0, %v4489_v6 }
  0x9c   : > { %4122 = vmatmul.msk.f32.gmra.mxu2 %vm594_vm0, %v4489_v6  ;;  %4142 = vmatmul.msk.f32.gmra.mxu3 %vm594_vm0, %v4489_v6  ;;  %v1119_v6 = vld [vmem:[#allocation2 + $0x260] sm:$0xff] }
  0x9d   : > { %1398 = vmatpush.msra.mxu1 %v1119_v6  ;;  %v1164_v6 = vld [vmem:[#allocation2 + $0x3c8] sm:$0xff] }
  0xa0   : > { %v672_v26 = vpop.f32.mrf.mxu0  ;;  %v4674_v29 = vpop.f32.mrf.mxu1 }
  0xa1   : > { %v673_v30 = vadd.f32 %v672_v26, %v4672_v24  ;;  %v688_v9 = vadd.f32 %v4674_v29, %v4672_v24 }
  0xa3   : > { %v4677_v31 = vmax.f32 %v673_v30, 0.0  ;;  %4103 = vmatmul.msk.f32.gmra.mxu1 %vm594_vm0, %v4536_v19  ;;  %v4761_v17 = vmax.f32 %v688_v9, 0.0 }
  0xa4   : > { %4123 = vmatmul.msk.f32.gmra.mxu2 %vm594_vm0, %v4536_v19  ;;  %4143 = vmatmul.msk.f32.gmra.mxu3 %vm594_vm0, %v4536_v19  ;;  %v1115_v19 = vld [vmem:[#allocation2 + $0x240] sm:$0xff] }
  0xa5   : > { %7587 = vst [vmem:[#allocation9_spill] sm:$0xff] %v4677_v31  ;;  %1325 = vmatmul.f32.vlgmr.msrb.gmra.mxu0 %v4677_v31  ;;  %1399 = vmatpush.msra.mxu1 %v1115_v19 }
  0xa6   : > { %7592 = vst [vmem:[#allocation14_spill] sm:$0xff] %v4761_v17 }
  0xa7   : > { %v4686_v35 = vpop.f32.mrf.mxu2  ;;  %v717_v36 = vpop.f32.mrf.mxu3  ;;  %1400 = vmatpush.msra.mxu1 %v1111_v59 }
  0xa8   : > { %v4689_v37 = vadd.f32 %v717_v36, %v4672_v24  ;;  %v675_v40 = vpop.f32.mrf.mxu0  ;;  %v4691_v41 = vpop.f32.mrf.mxu1 }
  0xa9   : > { %v676_v42 = vadd.f32 %v675_v40, %v4672_v24  ;;  %v691_v23 = vadd.f32 %v4691_v41, %v4672_v24 }
  0xab   : > { %v4694_v44 = vmax.f32 %v676_v42, 0.0  ;;  %4104 = vmatmul.msk.f32.gmra.mxu1 %vm594_vm0, %v4563_v27  ;;  %v4772_v30 = vmax.f32 %v691_v23, 0.0 }
  0xac   : > { %4124 = vmatmul.msk.f32.gmra.mxu2 %vm594_vm0, %v4563_v27  ;;  %4144 = vmatmul.msk.f32.gmra.mxu3 %vm594_vm0, %v4563_v27  ;;  %v1251_v27 = vld [vmem:[#allocation2 + $0x680] sm:$0xff] }
  0xad   : > { %7588 = vst [vmem:[#allocation10_spill] sm:$0xff] %v4694_v44  ;;  %1328 = vmatmul.f32.gmra.mxu0 %v4694_v44  ;;  %1551 = vmatpush.msra.mxu3 %v1251_v27 }
  0xaf   : > { %v4703_v45 = vpop.f32.mrf.mxu2  ;;  %v720_v46 = vpop.f32.mrf.mxu3  ;;  %1552 = vmatpush.msra.mxu3 %v1247_v61 }
  0xb0   : > { %v4706_v47 = vadd.f32 %v720_v46, %v4672_v24  ;;  %v678_v48 = vpop.f32.mrf.mxu0  ;;  %v4708_v49 = vpop.f32.mrf.mxu1 }
  0xb1   : > { %v679_v50 = vadd.f32 %v678_v48, %v4672_v24  ;;  %1553 = vmatpush.msra.mxu3 %v1243_v8  ;;  %v694_v34 = vadd.f32 %v4708_v49, %v4672_v24  ;;  %v4797_v48 = vperm.slane %v4663_v21, 3  ;;  %v1156_v8 = vld [vmem:[#allocation2 + $0x388] sm:$0xff] }
  0xb3   : > { %v4711_v52 = vmax.f32 %v679_v50, 0.0  ;;  %4105 = vmatmul.msk.f32.gmra.mxu1 %vm594_vm0, %v4580_v32  ;;  %1554 = vmatpush.msra.mxu3 %v1239_v15  ;;  %v4785_v42 = vmax.f32 %v694_v34, 0.0  ;;  %v4802_v50 = vperm.slane %v4663_v21, 1  ;;  %v703_v15 = vadd.f32 %v4686_v35, %v4672_v24  ;;  %v1152_v35 = vld [vmem:[#allocation2 + $0x368] sm:$0xff] }
  0xb4   : > { %4125 = vmatmul.msk.f32.gmra.mxu2 %vm594_vm0, %v4580_v32  ;;  %4145 = vmatmul.msk.f32.gmra.mxu3 %vm594_vm0, %v4580_v32  ;;  %v1183_v32 = vld [vmem:[#allocation2 + $0x460] sm:$0xff]  ;;  %v1224_v34 = vld [vmem:[#allocation2 + $0x5a8] sm:$0xff] }
  0xb5   : > { %7589 = vst [vmem:[#allocation11_spill] sm:$0xff] %v4711_v52  ;;  %1331 = vmatmul.f32.gmra.mxu0 %v4711_v52  ;;  %1475 = vmatpush.msra.mxu2 %v1183_v32 }
  0xb6   : > { %1555 = vmatpush.msra.mxu3 %v1235_v16 }
  0xb7   : > { %v4720_v53 = vpop.f32.mrf.mxu2  ;;  %v723_v54 = vpop.f32.mrf.mxu3  ;;  %1476 = vmatpush.msra.mxu2 %v1179_v5 }
  0xb8   : > { %v4723_v55 = vadd.f32 %v723_v54, %v4672_v24  ;;  %v681_v56 = vpop.f32.mrf.mxu0  ;;  %v4725_v57 = vpop.f32.mrf.mxu1  ;;  %v1232_v54 = vld [vmem:[#allocation2 + $0x5e8] sm:$0xff] }
  0xb9   : > { %v682_v58 = vadd.f32 %v681_v56, %v4672_v24  ;;  %1477 = vmatpush.msra.mxu2 %v1175_v14  ;;  %v697_v43 = vadd.f32 %v4725_v57, %v4672_v24  ;;  %v1296_v57 = vld [vmem:[#allocation2 + $0x7e8] sm:$0xff] }
  0xba   : > { %1848 = vmatpush.msrb.mxu3 %v1296_v57 }
  0xbb   : > { %v4728_v60 = vmax.f32 %v682_v58, 0.0  ;;  %4106 = vmatmul.msk.f32.gmra.mxu1 %vm594_vm0, %v4597_v38  ;;  %v4807_v27 = vmax.f32 %v697_v43, 0.0 }
  0xbc   : > { %4126 = vmatmul.msk.f32.gmra.mxu2 %vm594_vm0, %v4597_v38  ;;  %4146 = vmatmul.msk.f32.gmra.mxu3 %vm594_vm0, %v4597_v38  ;;  %v1107_v38 = vld [vmem:[#allocation2 + $0x200] sm:$0xff] }
  0xbd   : > { %7590 = vst [vmem:[#allocation12_spill] sm:$0xff] %v4728_v60  ;;  %1334 = vmatmul.f32.gmra.mxu0 %v4728_v60  ;;  %1401 = vmatpush.msra.mxu1 %v1107_v38  ;;  %v1092_v38 = vld [vmem:[#allocation2 + $0x188] sm:$0xff] }
  0xbf   : > { %v4737_v62 = vpop.f32.mrf.mxu2  ;;  %v726_v63 = vpop.f32.mrf.mxu3  ;;  %1694 = vmatpush.msrb.mxu1 %v1168_v22 }
  0xc0   : > { %v4740_v0 = vadd.f32 %v726_v63, %v4672_v24  ;;  %v684_v1 = vpop.f32.mrf.mxu0  ;;  %v4742_v2 = vpop.f32.mrf.mxu1 }
  0xc1   : > { %v685_v3 = vadd.f32 %v684_v1, %v4672_v24  ;;  %1695 = vmatpush.msrb.mxu1 %v1164_v6  ;;  %v700_v59 = vadd.f32 %v4742_v2, %v4672_v24  ;;  %v1228_v2 = vld [vmem:[#allocation2 + $0x5c8] sm:$0xff] }
  0xc3   : > { %v4745_v4 = vmax.f32 %v685_v3, 0.0  ;;  %4107 = vmatmul.msk.f32.gmra.mxu1 %vm594_vm0, %v4492_v7  ;;  %v4829_v5 = vmax.f32 %v700_v59, 0.0 }
  0xc4   : > { %4127 = vmatmul.msk.f32.gmra.mxu2 %vm594_vm0, %v4492_v7  ;;  %4147 = vmatmul.msk.f32.gmra.mxu3 %vm594_vm0, %v4492_v7  ;;  %v1171_v7 = vld [vmem:[#allocation2 + $0x400] sm:$0xff] }
  0xc5   : > { %7591 = vst [vmem:[#allocation13_spill] sm:$0xff] %v4745_v4  ;;  %1337 = vmatmul.f32.gmra.mxu0 %v4745_v4  ;;  %1478 = vmatpush.msra.mxu2 %v1171_v7 }
  0xc7   : > { %v4756_v10 = vpop.f32.mrf.mxu2  ;;  %v729_v11 = vpop.f32.mrf.mxu3  ;;  %1771 = vmatpush.msrb.mxu2 %v1232_v54 }
  0xc8   : > { %v4759_v12 = vadd.f32 %v729_v11, %v4672_v24  ;;  %v749_v13 = vpop.f32.mrf.mxu1 }
  0xc9   : > { %v750_v58 = vadd.f32 %v749_v13, %v4802_v50  ;;  %v1292_v13 = vld [vmem:[#allocation2 + $0x7c8] sm:$0xff]  ;;  %1772 = vmatpush.msrb.mxu2 %v1228_v2 }
  0xca   : > { %1849 = vmatpush.msrb.mxu3 %v1292_v13 }
  0xcb   : > { %4108 = vmatmul.msk.f32.gmra.mxu1 %vm594_vm0, %v4539_v20  ;;  %1773 = vmatpush.msrb.mxu2 %v1224_v34 }
  0xcc   : > { %4128 = vmatmul.msk.f32.gmra.mxu2 %vm594_vm0, %v4539_v20  ;;  %4148 = vmatmul.msk.f32.gmra.mxu3 %vm594_vm0, %v4539_v20  ;;  %v1100_v20 = vld [vmem:[#allocation2 + $0x1c8] sm:$0xff] }
  0xcd   : > { %1340 = vmatmul.f32.gmra.mxu0 %v4761_v17 }
  0xce   : > { %1618 = vmatpush.msra.mxu0 %v1100_v20 }
  0xcf   : > { %v826_v25 = vpop.f32.mrf.mxu2  ;;  %v903_v26 = vpop.f32.mrf.mxu3 }
  0xd0   : > { %v752_v29 = vpop.f32.mrf.mxu1  ;;  %v904_v56 = vadd.f32 %v903_v26, %v4797_v48  ;;  %v827_v21 = vadd.f32 %v826_v25, %v4805_v51  ;;  %v4848_v26 = vmax.f32 %v703_v15, 0.0 }
  0xd1   : > { %v753_v11 = vadd.f32 %v752_v29, %v4802_v50  ;;  %v1088_v29 = vld [vmem:[#allocation2 + $0x168] sm:$0xff] }
  0xd2   : > { %v4821_v63 = vmax.f32 %v904_v56, 0.0  ;;  %v4827_v3 = vmax.f32 %v827_v21, 0.0  ;;  %v1288_v56 = vld [vmem:[#allocation2 + $0x7a8] sm:$0xff] }
  0xd3   : > { %4109 = vmatmul.msk.f32.gmra.mxu1 %vm594_vm0, %v4566_v28  ;;  %v4844_v23 = vmax.f32 %v753_v11, 0.0  ;;  %1850 = vmatpush.msrb.mxu3 %v1288_v56  ;;  %v1148_v21 = vld [vmem:[#allocation2 + $0x348] sm:$0xff] }
  0xd4   : > { %4129 = vmatmul.msk.f32.gmra.mxu2 %vm594_vm0, %v4566_v28  ;;  %4149 = vmatmul.msk.f32.gmra.mxu3 %vm594_vm0, %v4566_v28  ;;  %v1096_v28 = vld [vmem:[#allocation2 + $0x1a8] sm:$0xff]  ;;  %7593 = vst [vmem:[#allocation15_spill] sm:$0xff] %v4821_v63 }
  0xd5   : > { %1343 = vmatmul.f32.gmra.mxu0 %v4772_v30  ;;  %v1144_v56 = vld [vmem:[#allocation2 + $0x328] sm:$0xff] }
  0xd6   : > { %1619 = vmatpush.msra.mxu0 %v1096_v28 }
  0xd7   : > { %v829_v36 = vpop.f32.mrf.mxu2  ;;  %v906_v40 = vpop.f32.mrf.mxu3 }
  0xd8   : > { %v4783_v41 = vpop.f32.mrf.mxu1  ;;  %1620 = vmatpush.msra.mxu0 %v1092_v38  ;;  %v907_v9 = vadd.f32 %v906_v40, %v4797_v48  ;;  %v830_v14 = vadd.f32 %v829_v36, %v4805_v51  ;;  %v706_v40 = vadd.f32 %v4703_v45, %v4672_v24  ;;  %v1084_v45 = vld [vmem:[#allocation2 + $0x148] sm:$0xff]  ;;  %v709_v38 = vadd.f32 %v4720_v53, %v4672_v24 }
  0xd9   : > { %v756_v6 = vadd.f32 %v4783_v41, %v4802_v50 }
  0xda   : > { %v4840_v18 = vmax.f32 %v907_v9, 0.0  ;;  %v4846_v25 = vmax.f32 %v830_v14, 0.0  ;;  %1621 = vmatpush.msra.mxu0 %v1088_v29  ;;  %v4868_v57 = vmax.f32 %v706_v40, 0.0  ;;  %v4888_v14 = vmax.f32 %v709_v38, 0.0  ;;  %v1080_v29 = vld [vmem:[#allocation2 + $0x128] sm:$0xff] }
  0xdb   : > { %4110 = vmatmul.msk.f32.gmra.mxu1 %vm594_vm0, %v4583_v33  ;;  %v4864_v54 = vmax.f32 %v756_v6, 0.0 }
  0xdc   : > { %4130 = vmatmul.msk.f32.gmra.mxu2 %vm594_vm0, %v4583_v33  ;;  %4150 = vmatmul.msk.f32.gmra.mxu3 %vm594_vm0, %v4583_v33  ;;  %v1160_v33 = vld [vmem:[#allocation2 + $0x3a8] sm:$0xff] }
  0xdd   : > { %1346 = vmatmul.f32.gmra.mxu0 %v4785_v42  ;;  %1696 = vmatpush.msrb.mxu1 %v1160_v33 }
  0xde   : > { %1622 = vmatpush.msra.mxu0 %v1084_v45 }
  0xdf   : > { %v832_v19 = vpop.f32.mrf.mxu2  ;;  %v909_v46 = vpop.f32.mrf.mxu3  ;;  %1697 = vmatpush.msrb.mxu1 %v1156_v8 }
  0xe0   : > { %v4799_v49 = vpop.f32.mrf.mxu1  ;;  %v910_v20 = vadd.f32 %v909_v46, %v4797_v48  ;;  %v833_v36 = vadd.f32 %v832_v19, %v4805_v51  ;;  %1623 = vmatpush.msra.mxu0 %v1080_v29 }
  0xe1   : > { %1698 = vmatpush.msrb.mxu1 %v1152_v35  ;;  %v712_v35 = vadd.f32 %v4737_v62, %v4672_v24  ;;  %v1280_v62 = vld [vmem:[#allocation2 + $0x768] sm:$0xff] }
  0xe2   : > { %v4860_v46 = vmax.f32 %v910_v20, 0.0  ;;  %v4866_v41 = vmax.f32 %v833_v36, 0.0 }
  0xe3   : > { %4111 = vmatmul.msk.f32.gmra.mxu1 %vm594_vm0, %v4600_v39 }
  0xe4   : > { %4131 = vmatmul.msk.f32.gmra.mxu2 %vm594_vm0, %v4600_v39  ;;  %4151 = vmatmul.msk.f32.gmra.mxu3 %vm594_vm0, %v4600_v39  ;;  %v4825_v39 = vmax.f32 %v750_v58, 0.0  ;;  %v759_v58 = vadd.f32 %v4799_v49, %v4802_v50  ;;  %v1220_v49 = vld [vmem:[#allocation2 + $0x588] sm:$0xff] }
  0xe5   : > { %1349 = vmatmul.f32.gmra.mxu0 %v4807_v27  ;;  %1699 = vmatpush.msrb.mxu1 %v1148_v21 }
  0xe6   : > { %v4884_v11 = vmax.f32 %v759_v58, 0.0  ;;  %1774 = vmatpush.msrb.mxu2 %v1220_v49 }
  0xe7   : > { %v835_v32 = vpop.f32.mrf.mxu2  ;;  %v912_v61 = vpop.f32.mrf.mxu3  ;;  %1700 = vmatpush.msrb.mxu1 %v1144_v56 }
  0xe8   : > { %v4823_v1 = vpop.f32.mrf.mxu1  ;;  %v913_v19 = vadd.f32 %v912_v61, %v4797_v48  ;;  %v836_v59 = vadd.f32 %v835_v32, %v4805_v51  ;;  %v1284_v32 = vld [vmem:[#allocation2 + $0x788] sm:$0xff] }
  0xe9   : > { %v762_v53 = vadd.f32 %v4823_v1, %v4802_v50  ;;  %1851 = vmatpush.msrb.mxu3 %v1284_v32 }
  0xea   : > { %v4880_v9 = vmax.f32 %v913_v19, 0.0  ;;  %v4886_v13 = vmax.f32 %v836_v59, 0.0  ;;  %v4910_v19 = vmax.f32 %v712_v35, 0.0  ;;  %v715_v59 = vadd.f32 %v4756_v10, %v4672_v24  ;;  %v1212_v10 = vld [vmem:[#allocation2 + $0x548] sm:$0xff] }
  0xeb   : > { %1402 = vmatmul.f32.vlgmr.msra.gmra.mxu1 %v4825_v39  ;;  %v4906_v40 = vmax.f32 %v762_v53, 0.0  ;;  %1852 = vmatpush.msrb.mxu3 %v1280_v62  ;;  %v1076_v53 = vld [vmem:[#allocation2 + $0x108] sm:$0xff] }
  0xec   : > { %1479 = vmatmul.f32.vlgmr.msra.gmra.mxu2 %v4827_v3  ;;  %1556 = vmatmul.f32.vlgmr.msra.gmra.mxu3 %v4821_v63  ;;  %v4934_v29 = vmax.f32 %v715_v59, 0.0  ;;  %v1276_v35 = vld [vmem:[#allocation2 + $0x748] sm:$0xff] }
  0xed   : > { %1352 = vmatmul.f32.gmra.mxu0 %v4829_v5  ;;  %1853 = vmatpush.msrb.mxu3 %v1276_v35  ;;  %v1208_v35 = vld [vmem:[#allocation2 + $0x528] sm:$0xff] }
  0xee   : > { %7595 = vst [vmem:[#allocation17_spill] sm:$0xff] %v4934_v29  ;;  %1624 = vmatpush.msra.mxu0 %v1076_v53  ;;  %v1064_v53 = vld [vmem:[#allocation2 + $0xa8] sm:$0xff] }
  0xef   : > { %v838_v7 = vpop.f32.mrf.mxu2  ;;  %v915_v16 = vpop.f32.mrf.mxu3 }
  0xf0   : > { %v4842_v22 = vpop.f32.mrf.mxu1  ;;  %v916_v15 = vadd.f32 %v915_v16, %v4797_v48  ;;  %v839_v20 = vadd.f32 %v838_v7, %v4805_v51  ;;  %v1216_v7 = vld [vmem:[#allocation2 + $0x568] sm:$0xff] }
  0xf1   : > { %v765_v58 = vadd.f32 %v4842_v22, %v4802_v50  ;;  %1775 = vmatpush.msrb.mxu2 %v1216_v7  ;;  %v1072_v7 = vld [vmem:[#allocation2 + $0xe8] sm:$0xff] }
  0xf2   : > { %v4902_v34 = vmax.f32 %v916_v15, 0.0  ;;  %v4908_v1 = vmax.f32 %v839_v20, 0.0  ;;  %1625 = vmatpush.msra.mxu0 %v1072_v7 }
  0xf3   : > { %1405 = vmatmul.f32.gmra.mxu1 %v4844_v23  ;;  %v4930_v15 = vmax.f32 %v765_v58, 0.0  ;;  %1776 = vmatpush.msrb.mxu2 %v1212_v10  ;;  %v1060_v10 = vld [vmem:[#allocation2 + $0x88] sm:$0xff] }
  0xf4   : > { %1482 = vmatmul.f32.gmra.mxu2 %v4846_v25  ;;  %1559 = vmatmul.f32.gmra.mxu3 %v4840_v18 }
  0xf5   : > { %1355 = vmatmul.f32.gmra.mxu0 %v4848_v26  ;;  %1777 = vmatpush.msrb.mxu2 %v1208_v35  ;;  %v1132_v35 = vld [vmem:[#allocation2 + $0x2c8] sm:$0xff] }
  0xf7   : > { %v841_v28 = vpop.f32.mrf.mxu2  ;;  %v918_v43 = vpop.f32.mrf.mxu3 }
  0xf8   : > { %v4862_v33 = vpop.f32.mrf.mxu1  ;;  %v919_v45 = vadd.f32 %v918_v43, %v4797_v48  ;;  %v842_v21 = vadd.f32 %v841_v28, %v4805_v51  ;;  %v1140_v28 = vld [vmem:[#allocation2 + $0x308] sm:$0xff] }
  0xf9   : > { %v768_v20 = vadd.f32 %v4862_v33, %v4802_v50  ;;  %1701 = vmatpush.msrb.mxu1 %v1140_v28 }
  0xfa   : > { %v4926_v49 = vmax.f32 %v919_v45, 0.0  ;;  %v4932_v22 = vmax.f32 %v842_v21, 0.0  ;;  %v1068_v21 = vld [vmem:[#allocation2 + $0xc8] sm:$0xff] }
  0xfb   : > { %1408 = vmatmul.f32.gmra.mxu1 %v4864_v54  ;;  %v4952_v33 = vmax.f32 %v768_v20, 0.0  ;;  %1626 = vmatpush.msra.mxu0 %v1068_v21 }
  0xfc   : > { %1485 = vmatmul.f32.gmra.mxu2 %v4866_v41  ;;  %1562 = vmatmul.f32.gmra.mxu3 %v4860_v46  ;;  %7594 = vst [vmem:[#allocation16_spill] sm:$0xff] %v4926_v49 }
  0xfd   : > { %1358 = vmatmul.f32.gmra.mxu0 %v4868_v57  ;;  %7597 = vst [vmem:[#allocation19_spill] sm:$0xff] %v4952_v33 }
  0xfe   : > { %1627 = vmatpush.msra.mxu0 %v1064_v53 }
  0xff   : > { %v844_v8 = vpop.f32.mrf.mxu2  ;;  %v921_v61 = vpop.f32.mrf.mxu3 }
 0x100   : > { %v4882_v2 = vpop.f32.mrf.mxu1  ;;  %v922_v24 = vadd.f32 %v921_v61, %v4797_v48  ;;  %v845_v56 = vadd.f32 %v844_v8, %v4805_v51  ;;  %v4957_v8 = vmax.f32 %v4689_v37, 0.0  ;;  %1628 = vmatpush.msra.mxu0 %v1060_v10 }
 0x101   : > { %v771_v20 = vadd.f32 %v4882_v2, %v4802_v50 }
 0x102   : > { %v4948_v62 = vmax.f32 %v922_v24, 0.0  ;;  %v4954_v59 = vmax.f32 %v845_v56, 0.0  ;;  %7599 = vst [vmem:[#allocation21_spill] sm:$0xff] %v4957_v8  ;;  %v1136_v24 = vld [vmem:[#allocation2 + $0x2e8] sm:$0xff] }
 0x103   : > { %1411 = vmatmul.f32.gmra.mxu1 %v4884_v11  ;;  %v1056_v56 = vld [vmem:[#allocation2 + $0x68] sm:$0xff]  ;;  %v4974_v2 = vmax.f32 %v771_v20, 0.0 }
 0x104   : > { %1488 = vmatmul.f32.gmra.mxu2 %v4886_v13  ;;  %1565 = vmatmul.f32.gmra.mxu3 %v4880_v9  ;;  %7596 = vst [vmem:[#allocation18_spill] sm:$0xff] %v4948_v62 }
 0x105   : > { %1361 = vmatmul.f32.gmra.mxu0 %v4888_v14  ;;  %7598 = vst [vmem:[#allocation20_spill] sm:$0xff] %v4954_v59  ;;  %1702 = vmatpush.msrb.mxu1 %v1136_v24 }
 0x106   : > { %1629 = vmatpush.msra.mxu0 %v1056_v56  ;;  %7601 = vst [vmem:[#allocation23_spill] sm:$0xff] %v4974_v2 }
 0x107   : > { %v4900_v6 = vpop.f32.mrf.mxu2  ;;  %v924_v16 = vpop.f32.mrf.mxu3  ;;  %1703 = vmatpush.msrb.mxu1 %v1132_v35 }
 0x108   : > { %v4904_v36 = vpop.f32.mrf.mxu1  ;;  %v925_v28 = vadd.f32 %v924_v16, %v4797_v48  ;;  %v848_v37 = vadd.f32 %v4900_v6, %v4805_v51  ;;  %v4981_v6 = vmax.f32 %v4706_v47, 0.0 }
 0x109   : > { %v774_v20 = vadd.f32 %v4904_v36, %v4802_v50 }
 0x10a   : > { %v4970_v21 = vmax.f32 %v925_v28, 0.0  ;;  %7603 = vst [vmem:[#allocation25_spill] sm:$0xff] %v4981_v6  ;;  %v1048_v28 = vld [vmem:[#allocation2 + $0x28] sm:$0xff] }
 0x10b   : > { %1414 = vmatmul.f32.gmra.mxu1 %v4906_v40 }
 0x10c   : > { %1491 = vmatmul.f32.gmra.mxu2 %v4908_v1  ;;  %1568 = vmatmul.f32.gmra.mxu3 %v4902_v34  ;;  %7600 = vst [vmem:[#allocation22_spill] sm:$0xff] %v4970_v21 }
 0x10d   : > { %1364 = vmatmul.f32.gmra.mxu0 %v4910_v19 }
 0x10f   : > { %v4922_v38 = vpop.f32.mrf.mxu2  ;;  %v4924_v43 = vpop.f32.mrf.mxu3 }
 0x110   : > { %v4928_v32 = vpop.f32.mrf.mxu1  ;;  %v928_v10 = vadd.f32 %v4924_v43, %v4797_v48  ;;  %v851_v47 = vadd.f32 %v4922_v38, %v4805_v51  ;;  %v1268_v38 = vld [vmem:[#allocation2 + $0x708] sm:$0xff] }
 0x112   : > { %v4993_v56 = vmax.f32 %v928_v10, 0.0  ;;  %v777_v10 = vadd.f32 %v4928_v32, %v4802_v50  ;;  %v5027_v32 = vmax.f32 %v4740_v0, 0.0 }
 0x113   : > { %1417 = vmatmul.f32.gmra.mxu1 %v4930_v15 }
 0x114   : > { %1494 = vmatmul.f32.gmra.mxu2 %v4932_v22  ;;  %1571 = vmatmul.f32.gmra.mxu3 %v4926_v49  ;;  %7604 = vst [vmem:[#allocation26_spill] sm:$0xff] %v4993_v56 }
 0x115   : > { %1367 = vmatmul.f32.gmra.mxu0 %v4934_v29  ;;  %7611 = vst [vmem:[#allocation33_spill] sm:$0xff] %v5027_v32 }
 0x117   : > { %v4944_v45 = vpop.f32.mrf.mxu2  ;;  %v4946_v61 = vpop.f32.mrf.mxu3 }
 0x118   : > { %v4950_v58 = vpop.f32.mrf.mxu1 }
 0x11b   : > { %1420 = vmatmul.f32.gmra.mxu1 %v4952_v33  ;;  %v1240_v33 = vld [vmem:[#allocation2 + $0x628] sm:$0xff] }
 0x11c   : > { %1497 = vmatmul.f32.gmra.mxu2 %v4954_v59  ;;  %1574 = vmatmul.f32.gmra.mxu3 %v4948_v62  ;;  %v1052_v62 = vld [vmem:[#allocation2 + $0x48] sm:$0xff] }
 0x11d   : > { %1370 = vmatmul.f32.gmra.mxu0 %v4957_v8  ;;  %v4976_v8 = vmax.f32 %v848_v37, 0.0  ;;  %v1272_v59 = vld [vmem:[#allocation2 + $0x728] sm:$0xff] }
 0x11e   : > { %1630 = vmatpush.msra.mxu0 %v1052_v62  ;;  %1854 = vmatpush.msrb.mxu3 %v1272_v59  ;;  %v1044_v62 = vld [vmem:[#allocation2 + $0x8] sm:$0xff] }
 0x11f   : > { %v4968_v16 = vpop.f32.mrf.mxu2  ;;  %v933_v7 = vpop.f32.mrf.mxu3  ;;  %7602 = vst [vmem:[#allocation24_spill] sm:$0xff] %v4976_v8 }
 0x120   : > { %v4972_v53 = vpop.f32.mrf.mxu1  ;;  %1631 = vmatpush.msra.mxu0 %v1048_v28  ;;  %v931_v28 = vadd.f32 %v4946_v61, %v4797_v48  ;;  %1855 = vmatpush.msrb.mxu3 %v1268_v38  ;;  %v5020_v61 = vmax.f32 %v777_v10, 0.0  ;;  %v1200_v38 = vld [vmem:[#allocation2 + $0x4e8] sm:$0xff]  ;;  %v780_v10 = vadd.f32 %v4950_v58, %v4802_v50  ;;  %v857_v0 = vadd.f32 %v4968_v16, %v4805_v51 }
 0x121   : > { %v5049_v58 = vmax.f32 %v4759_v12, 0.0 }
 0x122   : > { %v4978_v24 = vpop.f32.mrf.mxu0  ;;  %1632 = vmatpush.msra.mxu0 %v1044_v62  ;;  %7609 = vst [vmem:[#allocation31_spill] sm:$0xff] %v5020_v61 }
 0x123   : > { %1423 = vmatmul.f32.gmra.mxu1 %v4974_v2  ;;  %v5004_v2 = vmax.f32 %v4723_v55, 0.0  ;;  %v854_v55 = vadd.f32 %v4944_v45, %v4805_v51  ;;  %v934_v45 = vadd.f32 %v933_v7, %v4797_v48  ;;  %7615 = vst [vmem:[#allocation37_spill] sm:$0xff] %v5049_v58 }
 0x124   : > { %1500 = vmatmul.f32.gmra.mxu2 %v4976_v8  ;;  %1577 = vmatmul.f32.gmra.mxu3 %v4970_v21  ;;  %v4997_v21 = vmax.f32 %v774_v20, 0.0  ;;  %v4999_v8 = vmax.f32 %v851_v47, 0.0 }
 0x125   : > { %1373 = vmatmul.f32.gmra.mxu0 %v4981_v6  ;;  %v1204_v6 = vld [vmem:[#allocation2 + $0x508] sm:$0xff]  ;;  %7607 = vst [vmem:[#allocation29_spill] sm:$0xff] %v5004_v2  ;;  %v5022_v47 = vmax.f32 %v854_v55, 0.0 }
 0x126   : > { %7605 = vst [vmem:[#allocation27_spill] sm:$0xff] %v4997_v21  ;;  %1778 = vmatpush.msrb.mxu2 %v1204_v6  ;;  %v5016_v6 = vmax.f32 %v931_v28, 0.0  ;;  %v1264_v28 = vld [vmem:[#allocation2 + $0x6e8] sm:$0xff] }
 0x127   : > { %v859_v59 = vpop.f32.mrf.mxu2  ;;  %v936_v37 = vpop.f32.mrf.mxu3  ;;  %7606 = vst [vmem:[#allocation28_spill] sm:$0xff] %v4999_v8  ;;  %1856 = vmatpush.msrb.mxu3 %v1264_v28  ;;  %v1260_v28 = vld [vmem:[#allocation2 + $0x6c8] sm:$0xff] }
 0x128   : > { %v4995_v43 = vpop.f32.mrf.mxu1  ;;  %7608 = vst [vmem:[#allocation30_spill] sm:$0xff] %v5016_v6  ;;  %1779 = vmatpush.msrb.mxu2 %v1200_v38  ;;  %v937_v16 = vadd.f32 %v936_v37, %v4797_v48  ;;  %v1196_v38 = vld [vmem:[#allocation2 + $0x4c8] sm:$0xff]  ;;  %v860_v12 = vadd.f32 %v859_v59, %v4805_v51 }
 0x129   : > { %7610 = vst [vmem:[#allocation32_spill] sm:$0xff] %v5022_v47  ;;  %1857 = vmatpush.msrb.mxu3 %v1260_v28  ;;  %v1120_v59 = vld [vmem:[#allocation2 + $0x268] sm:$0xff] }
 0x12a   : > { %v5001_v36 = vpop.f32.mrf.mxu0  ;;  %1780 = vmatpush.msrb.mxu2 %v1196_v38 }
 0x12b   : > { %1426 = vmatmul.f32.gmra.mxu1 %v4997_v21 }
 0x12c   : > { %1503 = vmatmul.f32.gmra.mxu2 %v4999_v8  ;;  %1580 = vmatmul.f32.gmra.mxu3 %v4993_v56  ;;  %v1128_v8 = vld [vmem:[#allocation2 + $0x2a8] sm:$0xff] }
 0x12d   : > { %1376 = vmatmul.f32.gmra.mxu0 %v5004_v2  ;;  %1704 = vmatpush.msrb.mxu1 %v1128_v8  ;;  %v5038_v2 = vmax.f32 %v934_v45, 0.0  ;;  %v1124_v8 = vld [vmem:[#allocation2 + $0x288] sm:$0xff]  ;;  %v783_v45 = vadd.f32 %v4972_v53, %v4802_v50 }
 0x12f   : > { %v862_v20 = vpop.f32.mrf.mxu2  ;;  %v939_v62 = vpop.f32.mrf.mxu3  ;;  %7612 = vst [vmem:[#allocation34_spill] sm:$0xff] %v5038_v2  ;;  %1705 = vmatpush.msrb.mxu1 %v1124_v8  ;;  %v786_v8 = vadd.f32 %v4995_v43, %v4802_v50  ;;  %v1256_v43 = vld [vmem:[#allocation2 + $0x6a8] sm:$0xff] }
 0x130   : > { %v5018_v35 = vpop.f32.mrf.mxu1  ;;  %v940_v53 = vadd.f32 %v939_v62, %v4797_v48  ;;  %v863_v38 = vadd.f32 %v862_v20, %v4805_v51  ;;  %1858 = vmatpush.msrb.mxu3 %v1256_v43 }
 0x131   : > { %1706 = vmatpush.msrb.mxu1 %v1120_v59  ;;  %v789_v20 = vadd.f32 %v5018_v35, %v4802_v50 }
 0x132   : > { %v5024_v56 = vpop.f32.mrf.mxu0 }
 0x133   : > { %1429 = vmatmul.f32.gmra.mxu1 %v5020_v61 }
 0x134   : > { %1506 = vmatmul.f32.gmra.mxu2 %v5022_v47  ;;  %1583 = vmatmul.f32.gmra.mxu3 %v5016_v6  ;;  %v5042_v47 = vmax.f32 %v780_v10, 0.0  ;;  %v5044_v6 = vmax.f32 %v857_v0, 0.0 }
 0x135   : > { %1379 = vmatmul.f32.gmra.mxu0 %v5027_v32 }
 0x136   : > { %7613 = vst [vmem:[#allocation35_spill] sm:$0xff] %v5042_v47 }
 0x137   : > { %v865_v55 = vpop.f32.mrf.mxu2  ;;  %v942_v61 = vpop.f32.mrf.mxu3  ;;  %7614 = vst [vmem:[#allocation36_spill] sm:$0xff] %v5044_v6 }
 0x138   : > { %v5040_v7 = vpop.f32.mrf.mxu1  ;;  %v943_v59 = vadd.f32 %v942_v61, %v4797_v48  ;;  %v5099_v61 = vmax.f32 %v789_v20, 0.0 }
 0x13a   : > { %v5046_v21 = vpop.f32.mrf.mxu0  ;;  %7623 = vst [vmem:[#allocation45_spill] sm:$0xff] %v5099_v61 }
 0x13b   : > { %1432 = vmatmul.f32.gmra.mxu1 %v5042_v47  ;;  %v5059_v47 = vmax.f32 %v937_v16, 0.0  ;;  %v1192_v16 = vld [vmem:[#allocation2 + $0x4a8] sm:$0xff] }
 0x13c   : > { %1509 = vmatmul.f32.gmra.mxu2 %v5044_v6  ;;  %1586 = vmatmul.f32.gmra.mxu3 %v5038_v2  ;;  %v5063_v6 = vmax.f32 %v783_v45, 0.0  ;;  %v5065_v2 = vmax.f32 %v860_v12, 0.0  ;;  %v5077_v12 = vmax.f32 %v940_v53, 0.0  ;;  %v1116_v53 = vld [vmem:[#allocation2 + $0x248] sm:$0xff] }
 0x13d   : > { %1382 = vmatmul.f32.gmra.mxu0 %v5049_v58  ;;  %7616 = vst [vmem:[#allocation38_spill] sm:$0xff] %v5059_v47  ;;  %1781 = vmatpush.msrb.mxu2 %v1192_v16 }
 0x13e   : > { %7617 = vst [vmem:[#allocation39_spill] sm:$0xff] %v5063_v6  ;;  %1707 = vmatpush.msrb.mxu1 %v1116_v53  ;;  %v1252_v53 = vld [vmem:[#allocation2 + $0x688] sm:$0xff] }
 0x13f   : > { %v868_v10 = vpop.f32.mrf.mxu2  ;;  %v945_v0 = vpop.f32.mrf.mxu3  ;;  %7618 = vst [vmem:[#allocation40_spill] sm:$0xff] %v5065_v2  ;;  %1859 = vmatpush.msrb.mxu3 %v1252_v53 }
 0x140   : > { %v5061_v37 = vpop.f32.mrf.mxu1  ;;  %7619 = vst [vmem:[#allocation41_spill] sm:$0xff] %v5077_v12  ;;  %v946_v35 = vadd.f32 %v945_v0, %v4797_v48  ;;  %v869_v20 = vadd.f32 %v868_v10, %v4805_v51  ;;  %v1112_v10 = vld [vmem:[#allocation2 + $0x228] sm:$0xff] }
 0x141   : > { %v795_v53 = vadd.f32 %v5061_v37, %v4802_v50  ;;  %1708 = vmatpush.msrb.mxu1 %v1112_v10  ;;  %v1180_v10 = vld [vmem:[#allocation2 + $0x448] sm:$0xff] }
 0x142   : > { %v5067_v32 = vpop.f32.mrf.mxu0 }
 0x143   : > { %1435 = vmatmul.f32.gmra.mxu1 %v5063_v6 }
 0x144   : > { %1512 = vmatmul.f32.gmra.mxu2 %v5065_v2  ;;  %1589 = vmatmul.f32.gmra.mxu3 %v5059_v47  ;;  %v5081_v2 = vmax.f32 %v786_v8, 0.0  ;;  %v5083_v47 = vmax.f32 %v863_v38, 0.0  ;;  %v866_v8 = vadd.f32 %v865_v55, %v4805_v51  ;;  %v1188_v55 = vld [vmem:[#allocation2 + $0x488] sm:$0xff] }
 0x145   : > { %1633 = vmatmul.f32.vlgmr.msra.gmra.mxu0 %v4677_v31  ;;  %v5095_v31 = vmax.f32 %v943_v59, 0.0  ;;  %v792_v59 = vadd.f32 %v5040_v7, %v4802_v50  ;;  %1782 = vmatpush.msrb.mxu2 %v1188_v55  ;;  %v1184_v55 = vld [vmem:[#allocation2 + $0x468] sm:$0xff] }
 0x146   : > { %7620 = vst [vmem:[#allocation42_spill] sm:$0xff] %v5081_v2 }
 0x147   : > { %v871_v45 = vpop.f32.mrf.mxu2  ;;  %v948_v28 = vpop.f32.mrf.mxu3  ;;  %7621 = vst [vmem:[#allocation43_spill] sm:$0xff] %v5083_v47  ;;  %1783 = vmatpush.msrb.mxu2 %v1184_v55 }
 0x148   : > { %v5079_v62 = vpop.f32.mrf.mxu1  ;;  %7622 = vst [vmem:[#allocation44_spill] sm:$0xff] %v5095_v31  ;;  %v949_v7 = vadd.f32 %v948_v28, %v4797_v48 }
 0x149   : > { %v798_v55 = vadd.f32 %v5079_v62, %v4802_v50  ;;  %1784 = vmatpush.msrb.mxu2 %v1180_v10 }
 0x14a   : > { %v5085_v6 = vpop.f32.mrf.mxu0 }
 0x14b   : > { %1438 = vmatmul.f32.gmra.mxu1 %v5081_v2  ;;  %v5165_v62 = vmax.f32 %v798_v55, 0.0 }
 0x14c   : > { %1515 = vmatmul.f32.gmra.mxu2 %v5083_v47  ;;  %1592 = vmatmul.f32.gmra.mxu3 %v5077_v12  ;;  %v5101_v47 = vmax.f32 %v866_v8, 0.0 }
 0x14d   : > { %1636 = vmatmul.f32.gmra.mxu0 %v4694_v44  ;;  %v5115_v44 = vmax.f32 %v946_v35, 0.0  ;;  %v1248_v35 = vld [vmem:[#allocation2 + $0x668] sm:$0xff]  ;;  %7633 = vst [vmem:[#allocation55_spill] sm:$0xff] %v5165_v62 }
 0x14e   : > { %7624 = vst [vmem:[#allocation46_spill] sm:$0xff] %v5101_v47  ;;  %1860 = vmatpush.msrb.mxu3 %v1248_v35  ;;  %v1244_v35 = vld [vmem:[#allocation2 + $0x648] sm:$0xff] }
 0x14f   : > { %v874_v16 = vpop.f32.mrf.mxu2  ;;  %v951_v38 = vpop.f32.mrf.mxu3  ;;  %7625 = vst [vmem:[#allocation47_spill] sm:$0xff] %v5115_v44 }
 0x150   : > { %v5097_v43 = vpop.f32.mrf.mxu1  ;;  %v952_v37 = vadd.f32 %v951_v38, %v4797_v48  ;;  %v875_v38 = vadd.f32 %v874_v16, %v4805_v51  ;;  %1861 = vmatpush.msrb.mxu3 %v1244_v35  ;;  %v1172_v35 = vld [vmem:[#allocation2 + $0x408] sm:$0xff] }
 0x152   : > { %v5103_v12 = vpop.f32.mrf.mxu0  ;;  %1862 = vmatpush.msrb.mxu3 %v1240_v33  ;;  %v1169_v33 = vld [vmem:[#allocation2 + $0x3f0] sm:$0xff] }
 0x153   : > { %1441 = vmatmul.f32.gmra.mxu1 %v5099_v61 }
 0x154   : > { %1518 = vmatmul.f32.gmra.mxu2 %v5101_v47  ;;  %1595 = vmatmul.f32.gmra.mxu3 %v5095_v31  ;;  %v5119_v47 = vmax.f32 %v792_v59, 0.0  ;;  %v5121_v31 = vmax.f32 %v869_v20, 0.0  ;;  %v872_v59 = vadd.f32 %v871_v45, %v4805_v51  ;;  %v1108_v45 = vld [vmem:[#allocation2 + $0x208] sm:$0xff] }
 0x155   : > { %1639 = vmatmul.f32.gmra.mxu0 %v4711_v52  ;;  %1709 = vmatpush.msrb.mxu1 %v1108_v45  ;;  %v5169_v45 = vmax.f32 %v875_v38, 0.0 }
 0x156   : > { %7626 = vst [vmem:[#allocation48_spill] sm:$0xff] %v5119_v47  ;;  %v5141_v52 = vmax.f32 %v872_v59, 0.0 }
 0x157   : > { %v5113_v8 = vpop.f32.mrf.mxu2  ;;  %v954_v61 = vpop.f32.mrf.mxu3  ;;  %7627 = vst [vmem:[#allocation49_spill] sm:$0xff] %v5121_v31  ;;  %2002 = vmatpush.msra.mxu1 %v1169_v33 }
 0x158   : > { %v5117_v0 = vpop.f32.mrf.mxu1  ;;  %7630 = vst [vmem:[#allocation52_spill] sm:$0xff] %v5141_v52  ;;  %v878_v55 = vadd.f32 %v5113_v8, %v4805_v51  ;;  %v1101_v8 = vld [vmem:[#allocation2 + $0x1d0] sm:$0xff] }
 0x159   : > { %7634 = vst [vmem:[#allocation56_spill] sm:$0xff] %v5169_v45 }
 0x15a   : > { %v5123_v2 = vpop.f32.mrf.mxu0  ;;  %v5188_v29 = vmax.f32 %v878_v55, 0.0 }
 0x15b   : > { %1444 = vmatmul.f32.gmra.mxu1 %v5119_v47  ;;  %v5135_v47 = vmax.f32 %v949_v7, 0.0  ;;  %v5152_v7 = vld [vmem:[%s7311_s4] sm:$0xf] }
 0x15c   : > { %1521 = vmatmul.f32.gmra.mxu2 %v5121_v31  ;;  %1598 = vmatmul.f32.gmra.mxu3 %v5115_v44  ;;  %v5139_v44 = vmax.f32 %v795_v53, 0.0  ;;  %7631 = vst [vmem:[#allocation53_spill] sm:$0xff] %v5152_v7 }
 0x15d   : > { %1642 = vmatmul.f32.gmra.mxu0 %v4728_v60  ;;  %7628 = vst [vmem:[#allocation50_spill] sm:$0xff] %v5135_v47  ;;  %v1176_v60 = vld [vmem:[#allocation2 + $0x428] sm:$0xff] }
 0x15e   : > { %7629 = vst [vmem:[#allocation51_spill] sm:$0xff] %v5139_v44  ;;  %1785 = vmatpush.msrb.mxu2 %v1176_v60  ;;  %v1105_v60 = vld [vmem:[#allocation2 + $0x1f0] sm:$0xff] }
 0x15f   : > { %v5133_v20 = vpop.f32.mrf.mxu2  ;;  %v957_v28 = vpop.f32.mrf.mxu3  ;;  %1925 = vmatpush.msrb.mxu0 %v1105_v60 }
 0x160   : > { %v5137_v31 = vpop.f32.mrf.mxu1  ;;  %1786 = vmatpush.msrb.mxu2 %v1172_v35 }
 0x161   : > { %1926 = vmatpush.msrb.mxu0 %v1101_v8 }
 0x162   : > { %v5143_v58 = vpop.f32.mrf.mxu0 }
 0x163   : > { %1447 = vmatmul.f32.gmra.mxu1 %v5139_v44 }
 0x164   : > { %1524 = vmatmul.f32.gmra.mxu2 %v5141_v52  ;;  %1601 = vmatmul.f32.gmra.mxu3 %v5135_v47  ;;  %v5161_v47 = vperm.slane %v5152_v7, 0  ;;  %v5163_v52 = vmax.f32 %v952_v37, 0.0  ;;  %v955_v37 = vadd.f32 %v954_v61, %v4797_v48 }
 0x165   : > { %1645 = vmatmul.f32.gmra.mxu0 %v4745_v4  ;;  %v1236_v4 = vld [vmem:[#allocation2 + $0x608] sm:$0xff] }
 0x166   : > { %7632 = vst [vmem:[#allocation54_spill] sm:$0xff] %v5163_v52  ;;  %v1327_v16 = vadd.f32 %v4978_v24, %v5161_v47  ;;  %v801_v24 = vadd.f32 %v5097_v43, %v4802_v50  ;;  %1863 = vmatpush.msrb.mxu3 %v1236_v4  ;;  %v1330_v43 = vadd.f32 %v5001_v36, %v5161_v47  ;;  %v1165_v36 = vld [vmem:[#allocation2 + $0x3d0] sm:$0xff] }
 0x167   : > { %v5158_v53 = vpop.f32.mrf.mxu2  ;;  %v960_v59 = vpop.f32.mrf.mxu3  ;;  %2003 = vmatpush.msra.mxu1 %v1165_v36 }
 0x168   : > { %v1403_v44 = vpop.f32.mrf.mxu1  ;;  %v5184_v7 = vmax.f32 %v801_v24, 0.0 }
 0x169   : > { %v1404_v38 = vadd.f32 %v1403_v44, %v1327_v16  ;;  %v958_v44 = vadd.f32 %v957_v28, %v4797_v48  ;;  %v804_v16 = vadd.f32 %v5117_v0, %v4802_v50  ;;  %v1333_v0 = vadd.f32 %v5024_v56, %v5161_v47  ;;  %v1097_v56 = vld [vmem:[#allocation2 + $0x1b0] sm:$0xff] }
 0x16a   : > { %v5171_v10 = vpop.f32.mrf.mxu0  ;;  %1927 = vmatpush.msrb.mxu0 %v1097_v56 }
 0x16b   : > { %1450 = vmatmul.f32.gmra.mxu1 %v5165_v62  ;;  %v5182_v62 = vmax.f32 %v955_v37, 0.0  ;;  %v5203_v28 = vmax.f32 %v958_v44, 0.0 }
 0x16c   : > { %1527 = vmatmul.f32.gmra.mxu2 %v5169_v45  ;;  %1604 = vmatmul.f32.gmra.mxu3 %v5163_v52 }
 0x16d   : > { %1648 = vmatmul.f32.gmra.mxu0 %v4761_v17 }
 0x16f   : > { %v1480_v35 = vpop.f32.mrf.mxu2  ;;  %v1557_v61 = vpop.f32.mrf.mxu3 }
 0x170   : > { %v1481_v45 = vadd.f32 %v1480_v35, %v1404_v38  ;;  %v1406_v52 = vpop.f32.mrf.mxu1  ;;  %v5205_v38 = vmax.f32 %v804_v16, 0.0 }
 0x171   : > { %v1407_v37 = vadd.f32 %v1406_v52, %v1330_v43  ;;  %v961_v52 = vadd.f32 %v960_v59, %v4797_v48  ;;  %v884_v43 = vadd.f32 %v5158_v53, %v4805_v51  ;;  %v1233_v53 = vld [vmem:[#allocation2 + $0x5f0] sm:$0xff] }
 0x172   : > { %v5190_v4 = vadd.f32 %v1557_v61, %v1481_v45  ;;  %v5192_v17 = vpop.f32.mrf.mxu0  ;;  %v881_v45 = vadd.f32 %v5133_v20, %v4805_v51  ;;  %v807_v20 = vadd.f32 %v5137_v31, %v4802_v50  ;;  %v1161_v51 = vld [vmem:[#allocation2 + $0x3b0] sm:$0xff]  ;;  %2079 = vmatpush.msra.mxu2 %v1233_v53 }
 0x173   : > { %1453 = vmatmul.f32.gmra.mxu1 %v5184_v7  ;;  %v5224_v36 = vmax.f32 %v961_v52, 0.0  ;;  %v5230_v31 = vmax.f32 %v884_v43, 0.0 }
 0x174   : > { %7635 = vst [vmem:[#allocation57_spill] sm:$0xff] %v5190_v4  ;;  %1530 = vmatmul.f32.gmra.mxu2 %v5188_v29  ;;  %1607 = vmatmul.f32.gmra.mxu3 %v5182_v62  ;;  %v5209_v35 = vmax.f32 %v881_v45, 0.0  ;;  %v5226_v45 = vmax.f32 %v807_v20, 0.0  ;;  %v1339_v20 = vadd.f32 %v5067_v32, %v5161_v47 }
 0x175   : > { %1651 = vmatmul.f32.gmra.mxu0 %v4772_v30  ;;  %2004 = vmatpush.msra.mxu1 %v1161_v51 }
 0x177   : > { %v1483_v60 = vpop.f32.mrf.mxu2  ;;  %v1560_v33 = vpop.f32.mrf.mxu3 }
 0x178   : > { %v1484_v24 = vadd.f32 %v1483_v60, %v1407_v37  ;;  %v1409_v55 = vpop.f32.mrf.mxu1  ;;  %v1336_v37 = vadd.f32 %v5046_v21, %v5161_v47 }
 0x179   : > { %v1410_v44 = vadd.f32 %v1409_v55, %v1333_v0 }
 0x17a   : > { %v5211_v61 = vadd.f32 %v1560_v33, %v1484_v24  ;;  %v5213_v4 = vpop.f32.mrf.mxu0  ;;  %v1297_v33 = vld [vmem:[#allocation2 + $0x7f0] sm:$0xff] }
 0x17b   : > { %1456 = vmatmul.f32.gmra.mxu1 %v5205_v38  ;;  %2156 = vmatpush.msra.mxu3 %v1297_v33 }
 0x17c   : > { %7636 = vst [vmem:[#allocation58_spill] sm:$0xff] %v5211_v61  ;;  %1533 = vmatmul.f32.gmra.mxu2 %v5209_v35  ;;  %1610 = vmatmul.f32.gmra.mxu3 %v5203_v28 }
 0x17d   : > { %1654 = vmatmul.f32.gmra.mxu0 %v4785_v42 }
 0x17f   : > { %v1486_v8 = vpop.f32.mrf.mxu2  ;;  %v1563_v16 = vpop.f32.mrf.mxu3 }
 0x180   : > { %v1487_v48 = vadd.f32 %v1486_v8, %v1410_v44  ;;  %v1412_v59 = vpop.f32.mrf.mxu1  ;;  %v1093_v44 = vld [vmem:[#allocation2 + $0x190] sm:$0xff] }
 0x181   : > { %v1413_v24 = vadd.f32 %v1412_v59, %v1336_v37  ;;  %v1157_v8 = vld [vmem:[#allocation2 + $0x390] sm:$0xff]  ;;  %1928 = vmatpush.msrb.mxu0 %v1093_v44 }
 0x182   : > { %v5232_v50 = vadd.f32 %v1563_v16, %v1487_v48  ;;  %v5234_v60 = vpop.f32.mrf.mxu0  ;;  %v1229_v16 = vld [vmem:[#allocation2 + $0x5d0] sm:$0xff]  ;;  %2005 = vmatpush.msra.mxu1 %v1157_v8 }
 0x183   : > { %1459 = vmatmul.f32.gmra.mxu1 %v5226_v45  ;;  %v1293_v48 = vld [vmem:[#allocation2 + $0x7d0] sm:$0xff]  ;;  %2080 = vmatpush.msra.mxu2 %v1229_v16 }
 0x184   : > { %7637 = vst [vmem:[#allocation59_spill] sm:$0xff] %v5232_v50  ;;  %1536 = vmatmul.f32.gmra.mxu2 %v5230_v31  ;;  %1613 = vmatmul.f32.gmra.mxu3 %v5224_v36 }
 0x185   : > { %1657 = vmatmul.f32.gmra.mxu0 %v4807_v27  ;;  %2157 = vmatpush.msra.mxu3 %v1293_v48 }
 0x187   : > { %v1489_v21 = vpop.f32.mrf.mxu2  ;;  %v1566_v55 = vpop.f32.mrf.mxu3 }
 0x188   : > { %v1490_v0 = vadd.f32 %v1489_v21, %v1413_v24  ;;  %v1415_v52 = vpop.f32.mrf.mxu1  ;;  %v1342_v21 = vadd.f32 %v5085_v6, %v5161_v47 }
 0x189   : > { %v1416_v59 = vadd.f32 %v1415_v52, %v1339_v20  ;;  %v1225_v52 = vld [vmem:[#allocation2 + $0x5b0] sm:$0xff] }
 0x18a   : > { %v5242_v56 = vadd.f32 %v1566_v55, %v1490_v0  ;;  %v5244_v43 = vpop.f32.mrf.mxu0  ;;  %v1089_v55 = vld [vmem:[#allocation2 + $0x170] sm:$0xff]  ;;  %2081 = vmatpush.msra.mxu2 %v1225_v52 }
 0x18b   : > { %1710 = vmatmul.f32.vlgmr.msrb.gmra.mxu1 %v4825_v39  ;;  %v1153_v0 = vld [vmem:[#allocation2 + $0x370] sm:$0xff]  ;;  %1929 = vmatpush.msrb.mxu0 %v1089_v55 }
 0x18c   : > { %7638 = vst [vmem:[#allocation60_spill] sm:$0xff] %v5242_v56  ;;  %1787 = vmatmul.f32.vlgmr.msrb.gmra.mxu2 %v4827_v3  ;;  %1864 = vmatmul.f32.vlgmr.msrb.gmra.mxu3 %v4821_v63  ;;  %v7646_v56 = vld [vmem:[#allocation19_spill] sm:$0xff] }
 0x18d   : > { %1660 = vmatmul.f32.gmra.mxu0 %v4829_v5  ;;  %2006 = vmatpush.msra.mxu1 %v1153_v0 }
 0x18f   : > { %v1492_v32 = vpop.f32.mrf.mxu2  ;;  %v1569_v37 = vpop.f32.mrf.mxu3 }
 0x190   : > { %v1493_v51 = vadd.f32 %v1492_v32, %v1416_v59  ;;  %v1418_v53 = vpop.f32.mrf.mxu1  ;;  %v1345_v32 = vadd.f32 %v5103_v12, %v5161_v47 }
 0x191   : > { %v1419_v20 = vadd.f32 %v1418_v53, %v1342_v21  ;;  %v1149_v53 = vld [vmem:[#allocation2 + $0x350] sm:$0xff] }
 0x192   : > { %v5250_v33 = vadd.f32 %v1569_v37, %v1493_v51  ;;  %v5252_v24 = vpop.f32.mrf.mxu0  ;;  %v1289_v37 = vld [vmem:[#allocation2 + $0x7b0] sm:$0xff]  ;;  %2007 = vmatpush.msra.mxu1 %v1149_v53 }
 0x193   : > { %1713 = vmatmul.f32.gmra.mxu1 %v4844_v23  ;;  %v1085_v51 = vld [vmem:[#allocation2 + $0x150] sm:$0xff]  ;;  %2158 = vmatpush.msra.mxu3 %v1289_v37 }
 0x194   : > { %7639 = vst [vmem:[#allocation61_spill] sm:$0xff] %v5250_v33  ;;  %1790 = vmatmul.f32.gmra.mxu2 %v4846_v25  ;;  %1867 = vmatmul.f32.gmra.mxu3 %v4840_v18 }
 0x195   : > { %1663 = vmatmul.f32.gmra.mxu0 %v4848_v26 }
 0x196   : > { %1930 = vmatpush.msrb.mxu0 %v1085_v51 }
 0x197   : > { %v1495_v44 = vpop.f32.mrf.mxu2  ;;  %v1572_v8 = vpop.f32.mrf.mxu3 }
 0x198   : > { %v1496_v16 = vadd.f32 %v1495_v44, %v1419_v20  ;;  %v1421_v48 = vpop.f32.mrf.mxu1 }
 0x199   : > { %v1422_v21 = vadd.f32 %v1421_v48, %v1345_v32  ;;  %v1285_v48 = vld [vmem:[#allocation2 + $0x790] sm:$0xff] }
 0x19a   : > { %v5260_v59 = vadd.f32 %v1572_v8, %v1496_v16  ;;  %v5262_v6 = vpop.f32.mrf.mxu0  ;;  %v1348_v8 = vadd.f32 %v5123_v2, %v5161_v47  ;;  %v1221_v16 = vld [vmem:[#allocation2 + $0x590] sm:$0xff]  ;;  %2159 = vmatpush.msra.mxu3 %v1285_v48 }
 0x19b   : > { %1716 = vmatmul.f32.gmra.mxu1 %v4864_v54  ;;  %2082 = vmatpush.msra.mxu2 %v1221_v16  ;;  %v1081_v32 = vld [vmem:[#allocation2 + $0x130] sm:$0xff] }
 0x19c   : > { %7640 = vst [vmem:[#allocation62_spill] sm:$0xff] %v5260_v59  ;;  %1793 = vmatmul.f32.gmra.mxu2 %v4866_v41  ;;  %1870 = vmatmul.f32.gmra.mxu3 %v4860_v46  ;;  %v1281_v16 = vld [vmem:[#allocation2 + $0x770] sm:$0xff] }
 0x19d   : > { %1666 = vmatmul.f32.gmra.mxu0 %v4868_v57  ;;  %2160 = vmatpush.msra.mxu3 %v1281_v16  ;;  %v1277_v16 = vld [vmem:[#allocation2 + $0x750] sm:$0xff] }
 0x19e   : > { %1931 = vmatpush.msrb.mxu0 %v1081_v32 }
 0x19f   : > { %v1498_v55 = vpop.f32.mrf.mxu2  ;;  %v1575_v0 = vpop.f32.mrf.mxu3  ;;  %2161 = vmatpush.msra.mxu3 %v1277_v16  ;;  %v7649_v16 = vld [vmem:[#allocation21_spill] sm:$0xff] }
 0x1a0   : > { %v1499_v52 = vadd.f32 %v1498_v55, %v1422_v21  ;;  %v1424_v20 = vpop.f32.mrf.mxu1 }
 0x1a1   : > { %v1425_v37 = vadd.f32 %v1424_v20, %v1348_v8  ;;  %v1145_v20 = vld [vmem:[#allocation2 + $0x330] sm:$0xff] }
 0x1a2   : > { %v5270_v44 = vadd.f32 %v1575_v0, %v1499_v52  ;;  %v5272_v12 = vpop.f32.mrf.mxu0  ;;  %v1351_v52 = vadd.f32 %v5143_v58, %v5161_v47  ;;  %v1217_v8 = vld [vmem:[#allocation2 + $0x570] sm:$0xff]  ;;  %2008 = vmatpush.msra.mxu1 %v1145_v20 }
 0x1a3   : > { %1719 = vmatmul.f32.gmra.mxu1 %v4884_v11  ;;  %2083 = vmatpush.msra.mxu2 %v1217_v8  ;;  %v1213_v20 = vld [vmem:[#allocation2 + $0x550] sm:$0xff]  ;;  %v7644_v8 = vld [vmem:[#allocation17_spill] sm:$0xff] }
 0x1a4   : > { %7641 = vst [vmem:[#allocation63_spill] sm:$0xff] %v5270_v44  ;;  %1796 = vmatmul.f32.gmra.mxu2 %v4886_v13  ;;  %1873 = vmatmul.f32.gmra.mxu3 %v4880_v9  ;;  %v1069_v44 = vld [vmem:[#allocation2 + $0xd0] sm:$0xff] }
 0x1a5   : > { %1669 = vmatmul.f32.gmra.mxu0 %v4888_v14  ;;  %2084 = vmatpush.msra.mxu2 %v1213_v20  ;;  %v1137_v20 = vld [vmem:[#allocation2 + $0x2f0] sm:$0xff] }
 0x1a7   : > { %v1501_v51 = vpop.f32.mrf.mxu2  ;;  %v1578_v53 = vpop.f32.mrf.mxu3 }
 0x1a8   : > { %v1502_v21 = vadd.f32 %v1501_v51, %v1425_v37  ;;  %v1427_v55 = vpop.f32.mrf.mxu1 }
 0x1a9   : > { %v1428_v48 = vadd.f32 %v1427_v55, %v1351_v52  ;;  %v1077_v55 = vld [vmem:[#allocation2 + $0x110] sm:$0xff] }
 0x1aa   : > { %v5280_v0 = vadd.f32 %v1578_v53, %v1502_v21  ;;  %v5282_v2 = vpop.f32.mrf.mxu0  ;;  %v1141_v52 = vld [vmem:[#allocation2 + $0x310] sm:$0xff]  ;;  %1932 = vmatpush.msrb.mxu0 %v1077_v55  ;;  %v7648_v55 = vld [vmem:[#allocation18_spill] sm:$0xff] }
 0x1ab   : > { %1722 = vmatmul.f32.gmra.mxu1 %v4906_v40 }
 0x1ac   : > { %7642 = vst [vmem:[#allocation64_spill] sm:$0xff] %v5280_v0  ;;  %1799 = vmatmul.f32.gmra.mxu2 %v4908_v1  ;;  %1876 = vmatmul.f32.gmra.mxu3 %v4902_v34  ;;  %v1354_v0 = vadd.f32 %v5171_v10, %v5161_v47 }
 0x1ad   : > { %1672 = vmatmul.f32.gmra.mxu0 %v4910_v19  ;;  %2009 = vmatpush.msra.mxu1 %v1141_v52  ;;  %v1065_v52 = vld [vmem:[#allocation2 + $0xb0] sm:$0xff] }
 0x1af   : > { %v1504_v32 = vpop.f32.mrf.mxu2  ;;  %v1581_v37 = vpop.f32.mrf.mxu3  ;;  %2010 = vmatpush.msra.mxu1 %v1137_v20  ;;  %v1360_v20 = vadd.f32 %v5213_v4, %v5161_v47 }
 0x1b0   : > { %v1505_v51 = vadd.f32 %v1504_v32, %v1428_v48  ;;  %v1430_v53 = vpop.f32.mrf.mxu1  ;;  %v1073_v32 = vld [vmem:[#allocation2 + $0xf0] sm:$0xff] }
 0x1b1   : > { %v1431_v48 = vadd.f32 %v1430_v53, %v1354_v0  ;;  %1933 = vmatpush.msrb.mxu0 %v1073_v32  ;;  %v1357_v0 = vadd.f32 %v5192_v17, %v5161_v47  ;;  %v7647_v53 = vld [vmem:[#allocation20_spill] sm:$0xff] }
 0x1b2   : > { %v5290_v21 = vadd.f32 %v1581_v37, %v1505_v51  ;;  %v5292_v58 = vpop.f32.mrf.mxu0 }
 0x1b3   : > { %1725 = vmatmul.f32.gmra.mxu1 %v4930_v15  ;;  %1934 = vmatpush.msrb.mxu0 %v1069_v44 }
 0x1b4   : > { %7643 = vst [vmem:[#allocation65_spill] sm:$0xff] %v5290_v21  ;;  %1802 = vmatmul.f32.gmra.mxu2 %v4932_v22  ;;  %1879 = vmatmul.f32.gmra.mxu3 %v4926_v49 }
 0x1b5   : > { %1675 = vmatmul.f32.gmra.mxu0 %v7644_v8 }
 0x1b6   : > { %1935 = vmatpush.msrb.mxu0 %v1065_v52  ;;  %v7653_v52 = vld [vmem:[#allocation22_spill] sm:$0xff] }
 0x1b7   : > { %v1507_v37 = vpop.f32.mrf.mxu2  ;;  %v1584_v51 = vpop.f32.mrf.mxu3 }
 0x1b8   : > { %v1508_v21 = vadd.f32 %v1507_v37, %v1431_v48  ;;  %v1433_v10 = vpop.f32.mrf.mxu1  ;;  %v1061_v48 = vld [vmem:[#allocation2 + $0x90] sm:$0xff] }
 0x1b9   : > { %v1434_v32 = vadd.f32 %v1433_v10, %v1357_v0  ;;  %1936 = vmatpush.msrb.mxu0 %v1061_v48  ;;  %v7652_v10 = vld [vmem:[#allocation24_spill] sm:$0xff]  ;;  %v1273_v0 = vld [vmem:[#allocation2 + $0x730] sm:$0xff] }
 0x1ba   : > { %v5300_v59 = vadd.f32 %v1584_v51, %v1508_v21  ;;  %v5302_v33 = vpop.f32.mrf.mxu0  ;;  %v1209_v21 = vld [vmem:[#allocation2 + $0x530] sm:$0xff]  ;;  %2162 = vmatpush.msra.mxu3 %v1273_v0  ;;  %v1363_v0 = vadd.f32 %v5234_v60, %v5161_v47 }
 0x1bb   : > { %1728 = vmatmul.f32.gmra.mxu1 %v7646_v56  ;;  %2085 = vmatpush.msra.mxu2 %v1209_v21  ;;  %v1057_v51 = vld [vmem:[#allocation2 + $0x70] sm:$0xff]  ;;  %v7654_v21 = vld [vmem:[#allocation25_spill] sm:$0xff] }
 0x1bc   : > { %7645 = vst [vmem:[#allocation17_spill] sm:$0xff] %v5300_v59  ;;  %1805 = vmatmul.f32.gmra.mxu2 %v7647_v53  ;;  %1882 = vmatmul.f32.gmra.mxu3 %v7648_v55  ;;  %v7651_v55 = vld [vmem:[#allocation23_spill] sm:$0xff] }
 0x1bd   : > { %1678 = vmatmul.f32.gmra.mxu0 %v7649_v16  ;;  %v1053_v16 = vld [vmem:[#allocation2 + $0x50] sm:$0xff] }
 0x1be   : > { %1937 = vmatpush.msrb.mxu0 %v1057_v51  ;;  %v1049_v48 = vld [vmem:[#allocation2 + $0x30] sm:$0xff] }
 0x1bf   : > { %v1510_v44 = vpop.f32.mrf.mxu2  ;;  %v1587_v37 = vpop.f32.mrf.mxu3  ;;  %v1045_v51 = vld [vmem:[#allocation2 + $0x10] sm:$0xff] }
 0x1c0   : > { %v1511_v59 = vadd.f32 %v1510_v44, %v1434_v32  ;;  %v1436_v50 = vpop.f32.mrf.mxu1  ;;  %1938 = vmatpush.msrb.mxu0 %v1053_v16  ;;  %v1205_v16 = vld [vmem:[#allocation2 + $0x510] sm:$0xff] }
 0x1c1   : > { %v1437_v32 = vadd.f32 %v1436_v50, %v1360_v20  ;;  %v7658_v50 = vld [vmem:[#allocation26_spill] sm:$0xff]  ;;  %v1269_v20 = vld [vmem:[#allocation2 + $0x710] sm:$0xff]  ;;  %2086 = vmatpush.msra.mxu2 %v1205_v16 }
 0x1c2   : > { %v5310_v17 = vadd.f32 %v1587_v37, %v1511_v59  ;;  %v5312_v61 = vpop.f32.mrf.mxu0  ;;  %v1133_v59 = vld [vmem:[#allocation2 + $0x2d0] sm:$0xff]  ;;  %1939 = vmatpush.msrb.mxu0 %v1049_v48  ;;  %2163 = vmatpush.msra.mxu3 %v1269_v20  ;;  %v7664_v20 = vld [vmem:[#allocation33_spill] sm:$0xff] }
 0x1c3   : > { %1731 = vmatmul.f32.gmra.mxu1 %v7651_v55  ;;  %v7661_v60 = vld [vmem:[#allocation31_spill] sm:$0xff] }
 0x1c4   : > { %7650 = vst [vmem:[#allocation19_spill] sm:$0xff] %v5310_v17  ;;  %1808 = vmatmul.f32.gmra.mxu2 %v7652_v10  ;;  %1885 = vmatmul.f32.gmra.mxu3 %v7653_v52  ;;  %v7656_v52 = vld [vmem:[#allocation27_spill] sm:$0xff] }
 0x1c5   : > { %1681 = vmatmul.f32.gmra.mxu0 %v7654_v21  ;;  %2011 = vmatpush.msra.mxu1 %v1133_v59  ;;  %v7657_v21 = vld [vmem:[#allocation28_spill] sm:$0xff]  ;;  %v7659_v59 = vld [vmem:[#allocation29_spill] sm:$0xff]  ;;  %v1129_v16 = vld [vmem:[#allocation2 + $0x2b0] sm:$0xff] }
 0x1c6   : > { %1940 = vmatpush.msrb.mxu0 %v1045_v51 }
 0x1c7   : > { %v1513_v44 = vpop.f32.mrf.mxu2  ;;  %v1590_v37 = vpop.f32.mrf.mxu3  ;;  %2012 = vmatpush.msra.mxu1 %v1129_v16  ;;  %v7669_v16 = vld [vmem:[#allocation37_spill] sm:$0xff] }
 0x1c8   : > { %v1514_v17 = vadd.f32 %v1513_v44, %v1437_v32  ;;  %v1439_v55 = vpop.f32.mrf.mxu1 }
 0x1c9   : > { %v1440_v48 = vadd.f32 %v1439_v55, %v1363_v0  ;;  %v1201_v55 = vld [vmem:[#allocation2 + $0x4f0] sm:$0xff] }
 0x1ca   : > { %v5320_v4 = vadd.f32 %v1590_v37, %v1514_v17  ;;  %v5322_v10 = vpop.f32.mrf.mxu0  ;;  %v1265_v0 = vld [vmem:[#allocation2 + $0x6f0] sm:$0xff]  ;;  %2087 = vmatpush.msra.mxu2 %v1201_v55 }
 0x1cb   : > { %1734 = vmatmul.f32.gmra.mxu1 %v7656_v52  ;;  %v7663_v52 = vld [vmem:[#allocation30_spill] sm:$0xff]  ;;  %2164 = vmatpush.msra.mxu3 %v1265_v0  ;;  %v1261_v55 = vld [vmem:[#allocation2 + $0x6d0] sm:$0xff] }
 0x1cc   : > { %7655 = vst [vmem:[#allocation66_spill] sm:$0xff] %v5320_v4  ;;  %1811 = vmatmul.f32.gmra.mxu2 %v7657_v21  ;;  %1888 = vmatmul.f32.gmra.mxu3 %v7658_v50  ;;  %v1366_v50 = vadd.f32 %v5244_v43, %v5161_v47  ;;  %v7662_v21 = vld [vmem:[#allocation32_spill] sm:$0xff] }
 0x1cd   : > { %1684 = vmatmul.f32.gmra.mxu0 %v7659_v59  ;;  %v7667_v59 = vld [vmem:[#allocation36_spill] sm:$0xff]  ;;  %2165 = vmatpush.msra.mxu3 %v1261_v55 }
 0x1cf   : > { %v1516_v17 = vpop.f32.mrf.mxu2  ;;  %v1593_v32 = vpop.f32.mrf.mxu3 }
 0x1d0   : > { %v1517_v44 = vadd.f32 %v1516_v17, %v1440_v48  ;;  %v1442_v37 = vpop.f32.mrf.mxu1 }
 0x1d1   : > { %v1443_v48 = vadd.f32 %v1442_v37, %v1366_v50  ;;  %v1125_v50 = vld [vmem:[#allocation2 + $0x290] sm:$0xff] }
 0x1d2   : > { %v5330_v51 = vadd.f32 %v1593_v32, %v1517_v44  ;;  %v5332_v4 = vpop.f32.mrf.mxu0  ;;  %v1197_v37 = vld [vmem:[#allocation2 + $0x4d0] sm:$0xff]  ;;  %2013 = vmatpush.msra.mxu1 %v1125_v50  ;;  %v7673_v50 = vld [vmem:[#allocation38_spill] sm:$0xff] }
 0x1d3   : > { %1737 = vmatmul.f32.gmra.mxu1 %v7661_v60  ;;  %2088 = vmatpush.msra.mxu2 %v1197_v37  ;;  %v1193_v37 = vld [vmem:[#allocation2 + $0x4b0] sm:$0xff] }
 0x1d4   : > { %7660 = vst [vmem:[#allocation67_spill] sm:$0xff] %v5330_v51  ;;  %1814 = vmatmul.f32.gmra.mxu2 %v7662_v21  ;;  %1891 = vmatmul.f32.gmra.mxu3 %v7663_v52  ;;  %v7666_v21 = vld [vmem:[#allocation35_spill] sm:$0xff]  ;;  %v1369_v52 = vadd.f32 %v5252_v24, %v5161_v47 }
 0x1d5   : > { %1687 = vmatmul.f32.gmra.mxu0 %v7664_v20  ;;  %v7668_v20 = vld [vmem:[#allocation34_spill] sm:$0xff]  ;;  %2089 = vmatpush.msra.mxu2 %v1193_v37 }
 0x1d7   : > { %v1519_v17 = vpop.f32.mrf.mxu2  ;;  %v1596_v32 = vpop.f32.mrf.mxu3 }
 0x1d8   : > { %v1520_v44 = vadd.f32 %v1519_v17, %v1443_v48  ;;  %v1445_v51 = vpop.f32.mrf.mxu1 }
 0x1d9   : > { %v1446_v0 = vadd.f32 %v1445_v51, %v1369_v52  ;;  %v1121_v52 = vld [vmem:[#allocation2 + $0x270] sm:$0xff]  ;;  %v7674_v51 = vld [vmem:[#allocation9_spill] sm:$0xff] }
 0x1da   : > { %v5340_v60 = vadd.f32 %v1596_v32, %v1520_v44  ;;  %v5342_v43 = vpop.f32.mrf.mxu0  ;;  %2014 = vmatpush.msra.mxu1 %v1121_v52  ;;  %v1257_v52 = vld [vmem:[#allocation2 + $0x6b0] sm:$0xff] }
 0x1db   : > { %1740 = vmatmul.f32.gmra.mxu1 %v7666_v21  ;;  %v7672_v21 = vld [vmem:[#allocation40_spill] sm:$0xff]  ;;  %2166 = vmatpush.msra.mxu3 %v1257_v52  ;;  %v1189_v52 = vld [vmem:[#allocation2 + $0x490] sm:$0xff] }
 0x1dc   : > { %7665 = vst [vmem:[#allocation68_spill] sm:$0xff] %v5340_v60  ;;  %1817 = vmatmul.f32.gmra.mxu2 %v7667_v59  ;;  %1894 = vmatmul.f32.gmra.mxu3 %v7668_v20  ;;  %v7671_v59 = vld [vmem:[#allocation39_spill] sm:$0xff]  ;;  %v1372_v20 = vadd.f32 %v5262_v6, %v5161_v47  ;;  %v7676_v6 = vld [vmem:[#allocation42_spill] sm:$0xff] }
 0x1dd   : > { %1690 = vmatmul.f32.gmra.mxu0 %v7669_v16  ;;  %2090 = vmatpush.msra.mxu2 %v1189_v52  ;;  %v7688_v16 = vld [vmem:[#allocation47_spill] sm:$0xff] }
 0x1de   : > { %v1113_v52 = vld [vmem:[#allocation2 + $0x230] sm:$0xff] }
 0x1df   : > { %v1522_v48 = vpop.f32.mrf.mxu2  ;;  %v1599_v17 = vpop.f32.mrf.mxu3 }
 0x1e0   : > { %v1523_v32 = vadd.f32 %v1522_v48, %v1446_v0  ;;  %v1448_v44 = vpop.f32.mrf.mxu1 }
 0x1e1   : > { %v1449_v55 = vadd.f32 %v1448_v44, %v1372_v20  ;;  %v7679_v20 = vld [vmem:[#allocation10_spill] sm:$0xff]  ;;  %v1117_v44 = vld [vmem:[#allocation2 + $0x250] sm:$0xff] }
 0x1e2   : > { %v5350_v60 = vadd.f32 %v1599_v17, %v1523_v32  ;;  %v5352_v24 = vpop.f32.mrf.mxu0  ;;  %2015 = vmatpush.msra.mxu1 %v1117_v44 }
 0x1e3   : > { %1743 = vmatmul.f32.gmra.mxu1 %v7671_v59 }
 0x1e4   : > { %7670 = vst [vmem:[#allocation69_spill] sm:$0xff] %v5350_v60  ;;  %1820 = vmatmul.f32.gmra.mxu2 %v7672_v21  ;;  %1897 = vmatmul.f32.gmra.mxu3 %v7673_v50  ;;  %v1375_v50 = vadd.f32 %v5272_v12, %v5161_v47  ;;  %v7677_v21 = vld [vmem:[#allocation43_spill] sm:$0xff]  ;;  %v7681_v12 = vld [vmem:[#allocation45_spill] sm:$0xff] }
 0x1e5   : > { %1941 = vmatmul.f32.vlgmr.msrb.gmra.mxu0 %v7674_v51  ;;  %v7678_v51 = vld [vmem:[#allocation41_spill] sm:$0xff]  ;;  %2016 = vmatpush.msra.mxu1 %v1113_v52 }
 0x1e6   : > { %v7694_v52 = vld [vmem:[#allocation13_spill] sm:$0xff] }
 0x1e7   : > { %v1525_v0 = vpop.f32.mrf.mxu2  ;;  %v1602_v48 = vpop.f32.mrf.mxu3 }
 0x1e8   : > { %v1526_v17 = vadd.f32 %v1525_v0, %v1449_v55  ;;  %v1451_v32 = vpop.f32.mrf.mxu1 }
 0x1e9   : > { %v1452_v37 = vadd.f32 %v1451_v32, %v1375_v50  ;;  %v1253_v50 = vld [vmem:[#allocation2 + $0x690] sm:$0xff] }
 0x1ea   : > { %v5360_v60 = vadd.f32 %v1602_v48, %v1526_v17  ;;  %v5362_v59 = vpop.f32.mrf.mxu0  ;;  %v7684_v32 = vld [vmem:[#allocation11_spill] sm:$0xff]  ;;  %2167 = vmatpush.msra.mxu3 %v1253_v50  ;;  %v7689_v50 = vld [vmem:[#allocation12_spill] sm:$0xff] }
 0x1eb   : > { %1746 = vmatmul.f32.gmra.mxu1 %v7676_v6 }
 0x1ec   : > { %7675 = vst [vmem:[#allocation70_spill] sm:$0xff] %v5360_v60  ;;  %1823 = vmatmul.f32.gmra.mxu2 %v7677_v21  ;;  %1900 = vmatmul.f32.gmra.mxu3 %v7678_v51  ;;  %v1378_v51 = vadd.f32 %v5282_v2, %v5161_v47  ;;  %v7682_v21 = vld [vmem:[#allocation46_spill] sm:$0xff]  ;;  %v7686_v2 = vld [vmem:[#allocation48_spill] sm:$0xff] }
 0x1ed   : > { %1944 = vmatmul.f32.gmra.mxu0 %v7679_v20  ;;  %v7683_v20 = vld [vmem:[#allocation44_spill] sm:$0xff] }
 0x1ef   : > { %v1528_v55 = vpop.f32.mrf.mxu2  ;;  %v1605_v0 = vpop.f32.mrf.mxu3 }
 0x1f0   : > { %v1529_v48 = vadd.f32 %v1528_v55, %v1452_v37  ;;  %v1454_v17 = vpop.f32.mrf.mxu1 }
 0x1f1   : > { %v1455_v44 = vadd.f32 %v1454_v17, %v1378_v51  ;;  %v1185_v51 = vld [vmem:[#allocation2 + $0x470] sm:$0xff] }
 0x1f2   : > { %v5370_v60 = vadd.f32 %v1605_v0, %v1529_v48  ;;  %v5372_v6 = vpop.f32.mrf.mxu0  ;;  %v1249_v17 = vld [vmem:[#allocation2 + $0x670] sm:$0xff]  ;;  %2091 = vmatpush.msra.mxu2 %v1185_v51 }
 0x1f3   : > { %1749 = vmatmul.f32.gmra.mxu1 %v7681_v12  ;;  %2168 = vmatpush.msra.mxu3 %v1249_v17  ;;  %v1245_v51 = vld [vmem:[#allocation2 + $0x650] sm:$0xff] }
 0x1f4   : > { %7680 = vst [vmem:[#allocation71_spill] sm:$0xff] %v5370_v60  ;;  %1826 = vmatmul.f32.gmra.mxu2 %v7682_v21  ;;  %1903 = vmatmul.f32.gmra.mxu3 %v7683_v20  ;;  %v1381_v20 = vadd.f32 %v5292_v58, %v5161_v47  ;;  %v7687_v21 = vld [vmem:[#allocation49_spill] sm:$0xff] }
 0x1f5   : > { %1947 = vmatmul.f32.gmra.mxu0 %v7684_v32  ;;  %v7692_v32 = vld [vmem:[#allocation52_spill] sm:$0xff]  ;;  %2169 = vmatpush.msra.mxu3 %v1245_v51  ;;  %v7699_v51 = vld [vmem:[#allocation54_spill] sm:$0xff] }
 0x1f7   : > { %v1531_v37 = vpop.f32.mrf.mxu2  ;;  %v1608_v55 = vpop.f32.mrf.mxu3 }
 0x1f8   : > { %v1532_v0 = vadd.f32 %v1531_v37, %v1455_v44  ;;  %v1457_v48 = vpop.f32.mrf.mxu1 }
 0x1f9   : > { %v1458_v44 = vadd.f32 %v1457_v48, %v1381_v20  ;;  %v1109_v20 = vld [vmem:[#allocation2 + $0x210] sm:$0xff] }
 0x1fa   : > { %v5380_v60 = vadd.f32 %v1608_v55, %v1532_v0  ;;  %v5382_v12 = vpop.f32.mrf.mxu0  ;;  %v1181_v48 = vld [vmem:[#allocation2 + $0x450] sm:$0xff]  ;;  %2017 = vmatpush.msra.mxu1 %v1109_v20 }
 0x1fb   : > { %1752 = vmatmul.f32.gmra.mxu1 %v7686_v2  ;;  %2092 = vmatpush.msra.mxu2 %v1181_v48  ;;  %v1173_v20 = vld [vmem:[#allocation2 + $0x410] sm:$0xff]  ;;  %v7698_v48 = vld [vmem:[#allocation56_spill] sm:$0xff] }
 0x1fc   : > { %7685 = vst [vmem:[#allocation72_spill] sm:$0xff] %v5380_v60  ;;  %1829 = vmatmul.f32.gmra.mxu2 %v7687_v21  ;;  %1906 = vmatmul.f32.gmra.mxu3 %v7688_v16  ;;  %v7691_v21 = vld [vmem:[#allocation51_spill] sm:$0xff]  ;;  %v1384_v16 = vadd.f32 %v5302_v33, %v5161_v47 }
 0x1fd   : > { %1950 = vmatmul.f32.gmra.mxu0 %v7689_v50  ;;  %v7693_v50 = vld [vmem:[#allocation50_spill] sm:$0xff]  ;;  %v1177_v33 = vld [vmem:[#allocation2 + $0x430] sm:$0xff] }
 0x1fe   : > { %2093 = vmatpush.msra.mxu2 %v1177_v33 }
 0x1ff   : > { %v1534_v37 = vpop.f32.mrf.mxu2  ;;  %v1611_v55 = vpop.f32.mrf.mxu3 }
 0x200   : > { %v1535_v0 = vadd.f32 %v1534_v37, %v1458_v44  ;;  %v1460_v60 = vpop.f32.mrf.mxu1  ;;  %2094 = vmatpush.msra.mxu2 %v1173_v20 }
 0x201   : > { %v1461_v17 = vadd.f32 %v1460_v60, %v1384_v16  ;;  %v7697_v60 = vld [vmem:[#allocation55_spill] sm:$0xff] }
 0x202   : > { %v5390_v2 = vadd.f32 %v1611_v55, %v1535_v0  ;;  %v5392_v58 = vpop.f32.mrf.mxu0  ;;  %v7695_v55 = vld [vmem:[#allocation53_spill] sm:$0xff] }
 0x203   : > { %1755 = vmatmul.f32.gmra.mxu1 %v7691_v21  ;;  %v5401_v0 = vperm.slane %v7695_v55, 1  ;;  %v7700_v55 = vld [vmem:[#allocation14_spill] sm:$0xff] }
 0x204   : > { %7690 = vst [vmem:[#allocation73_spill] sm:$0xff] %v5390_v2  ;;  %1832 = vmatmul.f32.gmra.mxu2 %v7692_v32  ;;  %1909 = vmatmul.f32.gmra.mxu3 %v7693_v50  ;;  %v1241_v32 = vld [vmem:[#allocation2 + $0x630] sm:$0xff] }
 0x205   : > { %1953 = vmatmul.f32.gmra.mxu0 %v7694_v52  ;;  %2170 = vmatpush.msra.mxu3 %v1241_v32  ;;  %v1237_v52 = vld [vmem:[#allocation2 + $0x610] sm:$0xff]  ;;  %v1635_v16 = vadd.f32 %v5312_v61, %v5401_v0  ;;  %v1638_v61 = vadd.f32 %v5322_v10, %v5401_v0  ;;  %v1641_v10 = vadd.f32 %v5332_v4, %v5401_v0 }
 0x206   : > { %v1644_v4 = vadd.f32 %v5342_v43, %v5401_v0 }
 0x207   : > { %v1537_v44 = vpop.f32.mrf.mxu2  ;;  %v1614_v37 = vpop.f32.mrf.mxu3  ;;  %2171 = vmatpush.msra.mxu3 %v1237_v52  ;;  %v1102_v52 = vld [vmem:[#allocation2 + $0x1d8] sm:$0xff] }
 0x208   : > { %v1538_v2 = vadd.f32 %v1537_v44, %v1461_v17  ;;  %v1711_v47 = vpop.f32.mrf.mxu1  ;;  %v1106_v17 = vld [vmem:[#allocation2 + $0x1f8] sm:$0xff] }
 0x209   : > { %v1170_v44 = vld [vmem:[#allocation2 + $0x3f8] sm:$0xff]  ;;  %v1712_v32 = vadd.f32 %v1711_v47, %v1635_v16  ;;  %2233 = vmatpush.msra.mxu0 %v1106_v17 }
 0x20a   : > { %v5403_v50 = vadd.f32 %v1614_v37, %v1538_v2  ;;  %v5405_v21 = vpop.f32.mrf.mxu0  ;;  %2310 = vmatpush.msrb.mxu1 %v1170_v44  ;;  %v1166_v47 = vld [vmem:[#allocation2 + $0x3d8] sm:$0xff] }
 0x20b   : > { %1758 = vmatmul.f32.gmra.mxu1 %v7697_v60  ;;  %2234 = vmatpush.msra.mxu0 %v1102_v52 }
 0x20c   : > { %7696 = vst [vmem:[#allocation53_spill] sm:$0xff] %v5403_v50  ;;  %1835 = vmatmul.f32.gmra.mxu2 %v7698_v48  ;;  %1912 = vmatmul.f32.gmra.mxu3 %v7699_v51 }
 0x20d   : > { %1956 = vmatmul.f32.gmra.mxu0 %v7700_v55  ;;  %2311 = vmatpush.msrb.mxu1 %v1166_v47 }
 0x20f   : > { %v1788_v2 = vpop.f32.mrf.mxu2  ;;  %v1865_v37 = vpop.f32.mrf.mxu3 }
 0x210   : > { %v1789_v33 = vadd.f32 %v1788_v2, %v1712_v32  ;;  %v1714_v50 = vpop.f32.mrf.mxu1 }
 0x211   : > { %v1715_v16 = vadd.f32 %v1714_v50, %v1638_v61  ;;  %v1098_v50 = vld [vmem:[#allocation2 + $0x1b8] sm:$0xff] }
 0x212   : > { %v5413_v20 = vadd.f32 %v1865_v37, %v1789_v33  ;;  %v5415_v60 = vpop.f32.mrf.mxu0  ;;  %2235 = vmatpush.msra.mxu0 %v1098_v50 }
 0x213   : > { %1761 = vmatmul.f32.gmra.mxu1 %v5184_v7 }
 0x214   : > { %7701 = vst [vmem:[#allocation56_spill] sm:$0xff] %v5413_v20  ;;  %1838 = vmatmul.f32.gmra.mxu2 %v5188_v29  ;;  %1915 = vmatmul.f32.gmra.mxu3 %v5182_v62  ;;  %v1647_v20 = vadd.f32 %v5352_v24, %v5401_v0 }
 0x215   : > { %1959 = vmatmul.f32.gmra.mxu0 %v4772_v30 }
 0x217   : > { %v1791_v17 = vpop.f32.mrf.mxu2  ;;  %v1868_v44 = vpop.f32.mrf.mxu3 }
 0x218   : > { %v1792_v32 = vadd.f32 %v1791_v17, %v1715_v16  ;;  %v1717_v2 = vpop.f32.mrf.mxu1 }
 0x219   : > { %v1718_v61 = vadd.f32 %v1717_v2, %v1641_v10  ;;  %v1234_v2 = vld [vmem:[#allocation2 + $0x5f8] sm:$0xff] }
 0x21a   : > { %v5423_v37 = vadd.f32 %v1868_v44, %v1792_v32  ;;  %v5425_v33 = vpop.f32.mrf.mxu0  ;;  %v1298_v10 = vld [vmem:[#allocation2 + $0x7f8] sm:$0xff]  ;;  %2387 = vmatpush.msrb.mxu2 %v1234_v2 }
 0x21b   : > { %1764 = vmatmul.f32.gmra.mxu1 %v5205_v38  ;;  %2464 = vmatpush.msrb.mxu3 %v1298_v10  ;;  %v1294_v2 = vld [vmem:[#allocation2 + $0x7d8] sm:$0xff] }
 0x21c   : > { %7702 = vst [vmem:[#allocation54_spill] sm:$0xff] %v5423_v37  ;;  %1841 = vmatmul.f32.gmra.mxu2 %v5209_v35  ;;  %1918 = vmatmul.f32.gmra.mxu3 %v5203_v28  ;;  %v1162_v37 = vld [vmem:[#allocation2 + $0x3b8] sm:$0xff] }
 0x21d   : > { %1962 = vmatmul.f32.gmra.mxu0 %v4785_v42  ;;  %2312 = vmatpush.msrb.mxu1 %v1162_v37  ;;  %v1094_v37 = vld [vmem:[#allocation2 + $0x198] sm:$0xff] }
 0x21e   : > { %2236 = vmatpush.msra.mxu0 %v1094_v37  ;;  %2465 = vmatpush.msrb.mxu3 %v1294_v2  ;;  %v1226_v37 = vld [vmem:[#allocation2 + $0x5b8] sm:$0xff] }
 0x21f   : > { %v1794_v52 = vpop.f32.mrf.mxu2  ;;  %v1871_v47 = vpop.f32.mrf.mxu3 }
 0x220   : > { %v1795_v16 = vadd.f32 %v1794_v52, %v1718_v61  ;;  %v1720_v17 = vpop.f32.mrf.mxu1 }
 0x221   : > { %v1721_v50 = vadd.f32 %v1720_v17, %v1644_v4  ;;  %v1158_v17 = vld [vmem:[#allocation2 + $0x398] sm:$0xff] }
 0x222   : > { %v5433_v44 = vadd.f32 %v1871_v47, %v1795_v16  ;;  %v5435_v32 = vpop.f32.mrf.mxu0  ;;  %v1230_v4 = vld [vmem:[#allocation2 + $0x5d8] sm:$0xff]  ;;  %2313 = vmatpush.msrb.mxu1 %v1158_v17 }
 0x223   : > { %1767 = vmatmul.f32.gmra.mxu1 %v5226_v45  ;;  %2388 = vmatpush.msrb.mxu2 %v1230_v4 }
 0x224   : > { %7703 = vst [vmem:[#allocation14_spill] sm:$0xff] %v5433_v44  ;;  %1844 = vmatmul.f32.gmra.mxu2 %v5230_v31  ;;  %1921 = vmatmul.f32.gmra.mxu3 %v5224_v36 }
 0x225   : > { %1965 = vmatmul.f32.gmra.mxu0 %v4807_v27  ;;  %2389 = vmatpush.msrb.mxu2 %v1226_v37 }
 0x227   : > { %v1797_v61 = vpop.f32.mrf.mxu2  ;;  %v1874_v52 = vpop.f32.mrf.mxu3 }
 0x228   : > { %v1798_v47 = vadd.f32 %v1797_v61, %v1721_v50  ;;  %v1723_v16 = vpop.f32.mrf.mxu1 }
 0x229   : > { %v1724_v10 = vadd.f32 %v1723_v16, %v1647_v20  ;;  %v1090_v20 = vld [vmem:[#allocation2 + $0x178] sm:$0xff] }
 0x22a   : > { %v5443_v44 = vadd.f32 %v1874_v52, %v1798_v47  ;;  %v5445_v43 = vpop.f32.mrf.mxu0  ;;  %v1154_v16 = vld [vmem:[#allocation2 + $0x378] sm:$0xff]  ;;  %2237 = vmatpush.msra.mxu0 %v1090_v20 }
 0x22b   : > { %2018 = vmatmul.f32.vlgmr.msra.gmra.mxu1 %v4825_v39  ;;  %v1150_v20 = vld [vmem:[#allocation2 + $0x358] sm:$0xff] }
 0x22c   : > { %7704 = vst [vmem:[#allocation74_spill] sm:$0xff] %v5443_v44  ;;  %2095 = vmatmul.f32.vlgmr.msra.gmra.mxu2 %v4827_v3  ;;  %2172 = vmatmul.f32.vlgmr.msra.gmra.mxu3 %v4821_v63  ;;  %v1650_v63 = vadd.f32 %v5362_v59, %v5401_v0 }
 0x22d   : > { %1968 = vmatmul.f32.gmra.mxu0 %v4829_v5  ;;  %2314 = vmatpush.msrb.mxu1 %v1154_v16 }
 0x22f   : > { %v1800_v50 = vpop.f32.mrf.mxu2  ;;  %v1877_v61 = vpop.f32.mrf.mxu3  ;;  %2315 = vmatpush.msrb.mxu1 %v1150_v20 }
 0x230   : > { %v1801_v52 = vadd.f32 %v1800_v50, %v1724_v10  ;;  %v1726_v47 = vpop.f32.mrf.mxu1 }
 0x231   : > { %v1727_v17 = vadd.f32 %v1726_v47, %v1650_v63  ;;  %v1290_v63 = vld [vmem:[#allocation2 + $0x7b8] sm:$0xff] }
 0x232   : > { %v5453_v24 = vadd.f32 %v1877_v61, %v1801_v52  ;;  %v5455_v44 = vpop.f32.mrf.mxu0  ;;  %v1653_v52 = vadd.f32 %v5372_v6, %v5401_v0  ;;  %v1086_v47 = vld [vmem:[#allocation2 + $0x158] sm:$0xff]  ;;  %2466 = vmatpush.msrb.mxu3 %v1290_v63 }
 0x233   : > { %2021 = vmatmul.f32.gmra.mxu1 %v4844_v23  ;;  %2238 = vmatpush.msra.mxu0 %v1086_v47  ;;  %v1082_v63 = vld [vmem:[#allocation2 + $0x138] sm:$0xff] }
 0x234   : > { %7705 = vst [vmem:[#allocation75_spill] sm:$0xff] %v5453_v24  ;;  %2098 = vmatmul.f32.gmra.mxu2 %v4846_v25  ;;  %2175 = vmatmul.f32.gmra.mxu3 %v4840_v18 }
 0x235   : > { %1971 = vmatmul.f32.gmra.mxu0 %v4848_v26 }
 0x236   : > { %2239 = vmatpush.msra.mxu0 %v1082_v63 }
 0x237   : > { %v1803_v4 = vpop.f32.mrf.mxu2  ;;  %v1880_v2 = vpop.f32.mrf.mxu3 }
 0x238   : > { %v1804_v10 = vadd.f32 %v1803_v4, %v1727_v17  ;;  %v1729_v50 = vpop.f32.mrf.mxu1 }
 0x239   : > { %v1730_v16 = vadd.f32 %v1729_v50, %v1653_v52  ;;  %v1222_v50 = vld [vmem:[#allocation2 + $0x598] sm:$0xff] }
 0x23a   : > { %v5463_v61 = vadd.f32 %v1880_v2, %v1804_v10  ;;  %v5465_v59 = vpop.f32.mrf.mxu0  ;;  %v1286_v52 = vld [vmem:[#allocation2 + $0x798] sm:$0xff]  ;;  %2390 = vmatpush.msrb.mxu2 %v1222_v50 }
 0x23b   : > { %2024 = vmatmul.f32.gmra.mxu1 %v4864_v54  ;;  %2467 = vmatpush.msrb.mxu3 %v1286_v52  ;;  %v1282_v50 = vld [vmem:[#allocation2 + $0x778] sm:$0xff] }
 0x23c   : > { %7706 = vst [vmem:[#allocation76_spill] sm:$0xff] %v5463_v61  ;;  %2101 = vmatmul.f32.gmra.mxu2 %v4866_v41  ;;  %2178 = vmatmul.f32.gmra.mxu3 %v4860_v46  ;;  %v1656_v61 = vadd.f32 %v5382_v12, %v5401_v0 }
 0x23d   : > { %1974 = vmatmul.f32.gmra.mxu0 %v4868_v57  ;;  %2468 = vmatpush.msrb.mxu3 %v1282_v50 }
 0x23f   : > { %v1806_v37 = vpop.f32.mrf.mxu2  ;;  %v1883_v17 = vpop.f32.mrf.mxu3 }
 0x240   : > { %v1807_v4 = vadd.f32 %v1806_v37, %v1730_v16  ;;  %v1732_v2 = vpop.f32.mrf.mxu1 }
 0x241   : > { %v1733_v47 = vadd.f32 %v1732_v2, %v1656_v61  ;;  %v1146_v61 = vld [vmem:[#allocation2 + $0x338] sm:$0xff] }
 0x242   : > { %v5473_v10 = vadd.f32 %v1883_v17, %v1807_v4  ;;  %v5475_v6 = vpop.f32.mrf.mxu0  ;;  %v1218_v2 = vld [vmem:[#allocation2 + $0x578] sm:$0xff]  ;;  %2316 = vmatpush.msrb.mxu1 %v1146_v61 }
 0x243   : > { %2027 = vmatmul.f32.gmra.mxu1 %v4884_v11  ;;  %2391 = vmatpush.msrb.mxu2 %v1218_v2  ;;  %v1214_v61 = vld [vmem:[#allocation2 + $0x558] sm:$0xff] }
 0x244   : > { %7707 = vst [vmem:[#allocation77_spill] sm:$0xff] %v5473_v10  ;;  %2104 = vmatmul.f32.gmra.mxu2 %v4886_v13  ;;  %2181 = vmatmul.f32.gmra.mxu3 %v4880_v9  ;;  %v1659_v10 = vadd.f32 %v5392_v58, %v5401_v0  ;;  %v1278_v2 = vld [vmem:[#allocation2 + $0x758] sm:$0xff] }
 0x245   : > { %1977 = vmatmul.f32.gmra.mxu0 %v4888_v14  ;;  %2392 = vmatpush.msrb.mxu2 %v1214_v61  ;;  %v7712_v61 = vld [vmem:[#allocation21_spill] sm:$0xff] }
 0x246   : > { %2469 = vmatpush.msrb.mxu3 %v1278_v2  ;;  %v1062_v2 = vld [vmem:[#allocation2 + $0x98] sm:$0xff] }
 0x247   : > { %v1809_v20 = vpop.f32.mrf.mxu2  ;;  %v1886_v16 = vpop.f32.mrf.mxu3 }
 0x248   : > { %v1810_v37 = vadd.f32 %v1809_v20, %v1733_v47  ;;  %v1735_v17 = vpop.f32.mrf.mxu1 }
 0x249   : > { %v1736_v52 = vadd.f32 %v1735_v17, %v1659_v10  ;;  %v1078_v10 = vld [vmem:[#allocation2 + $0x118] sm:$0xff] }
 0x24a   : > { %v5483_v4 = vadd.f32 %v1886_v16, %v1810_v37  ;;  %v5485_v12 = vpop.f32.mrf.mxu0  ;;  %v1142_v17 = vld [vmem:[#allocation2 + $0x318] sm:$0xff]  ;;  %2240 = vmatpush.msra.mxu0 %v1078_v10 }
 0x24b   : > { %2030 = vmatmul.f32.gmra.mxu1 %v4906_v40  ;;  %v1138_v10 = vld [vmem:[#allocation2 + $0x2f8] sm:$0xff] }
 0x24c   : > { %7708 = vst [vmem:[#allocation78_spill] sm:$0xff] %v5483_v4  ;;  %2107 = vmatmul.f32.gmra.mxu2 %v4908_v1  ;;  %2184 = vmatmul.f32.gmra.mxu3 %v4902_v34  ;;  %v1662_v4 = vadd.f32 %v5405_v21, %v5401_v0 }
 0x24d   : > { %1980 = vmatmul.f32.gmra.mxu0 %v4910_v19  ;;  %2317 = vmatpush.msrb.mxu1 %v1142_v17  ;;  %v1066_v17 = vld [vmem:[#allocation2 + $0xb8] sm:$0xff] }
 0x24f   : > { %v1812_v63 = vpop.f32.mrf.mxu2  ;;  %v1889_v47 = vpop.f32.mrf.mxu3  ;;  %2318 = vmatpush.msrb.mxu1 %v1138_v10  ;;  %v1668_v10 = vadd.f32 %v5425_v33, %v5401_v0 }
 0x250   : > { %v1813_v20 = vadd.f32 %v1812_v63, %v1736_v52  ;;  %v1738_v16 = vpop.f32.mrf.mxu1  ;;  %v1074_v52 = vld [vmem:[#allocation2 + $0xf8] sm:$0xff] }
 0x251   : > { %v1739_v50 = vadd.f32 %v1738_v16, %v1662_v4  ;;  %2241 = vmatpush.msra.mxu0 %v1074_v52  ;;  %v1665_v4 = vadd.f32 %v5415_v60, %v5401_v0  ;;  %v7711_v16 = vld [vmem:[#allocation18_spill] sm:$0xff] }
 0x252   : > { %v5493_v37 = vadd.f32 %v1889_v47, %v1813_v20  ;;  %v5495_v58 = vpop.f32.mrf.mxu0 }
 0x253   : > { %2033 = vmatmul.f32.gmra.mxu1 %v4930_v15 }
 0x254   : > { %7709 = vst [vmem:[#allocation79_spill] sm:$0xff] %v5493_v37  ;;  %2110 = vmatmul.f32.gmra.mxu2 %v4932_v22  ;;  %2187 = vmatmul.f32.gmra.mxu3 %v4926_v49  ;;  %v1070_v37 = vld [vmem:[#allocation2 + $0xd8] sm:$0xff] }
 0x255   : > { %1983 = vmatmul.f32.gmra.mxu0 %v7644_v8 }
 0x256   : > { %2242 = vmatpush.msra.mxu0 %v1070_v37 }
 0x257   : > { %v1815_v63 = vpop.f32.mrf.mxu2  ;;  %v1892_v47 = vpop.f32.mrf.mxu3 }
 0x258   : > { %v1816_v20 = vadd.f32 %v1815_v63, %v1739_v50  ;;  %v1741_v21 = vpop.f32.mrf.mxu1  ;;  %v1210_v50 = vld [vmem:[#allocation2 + $0x538] sm:$0xff]  ;;  %2243 = vmatpush.msra.mxu0 %v1066_v17  ;;  %v7716_v17 = vld [vmem:[#allocation22_spill] sm:$0xff] }
 0x259   : > { %v1742_v52 = vadd.f32 %v1741_v21, %v1665_v4  ;;  %2393 = vmatpush.msrb.mxu2 %v1210_v50  ;;  %v7715_v21 = vld [vmem:[#allocation24_spill] sm:$0xff]  ;;  %v7717_v50 = vld [vmem:[#allocation25_spill] sm:$0xff] }
 0x25a   : > { %v5503_v24 = vadd.f32 %v1892_v47, %v1816_v20  ;;  %v5505_v49 = vpop.f32.mrf.mxu0  ;;  %v1058_v47 = vld [vmem:[#allocation2 + $0x78] sm:$0xff]  ;;  %2244 = vmatpush.msra.mxu0 %v1062_v2 }
 0x25b   : > { %2036 = vmatmul.f32.gmra.mxu1 %v7646_v56  ;;  %v1274_v4 = vld [vmem:[#allocation2 + $0x738] sm:$0xff] }
 0x25c   : > { %7710 = vst [vmem:[#allocation80_spill] sm:$0xff] %v5503_v24  ;;  %2113 = vmatmul.f32.gmra.mxu2 %v7647_v53  ;;  %2190 = vmatmul.f32.gmra.mxu3 %v7711_v16  ;;  %v7714_v16 = vld [vmem:[#allocation23_spill] sm:$0xff]  ;;  %v1050_v2 = vld [vmem:[#allocation2 + $0x38] sm:$0xff] }
 0x25d   : > { %1986 = vmatmul.f32.gmra.mxu0 %v7712_v61  ;;  %v1054_v61 = vld [vmem:[#allocation2 + $0x58] sm:$0xff]  ;;  %2470 = vmatpush.msrb.mxu3 %v1274_v4  ;;  %v1671_v4 = vadd.f32 %v5435_v32, %v5401_v0  ;;  %v7724_v32 = vld [vmem:[#allocation31_spill] sm:$0xff] }
 0x25e   : > { %2245 = vmatpush.msra.mxu0 %v1058_v47 }
 0x25f   : > { %v1818_v37 = vpop.f32.mrf.mxu2  ;;  %v1895_v63 = vpop.f32.mrf.mxu3 }
 0x260   : > { %v1819_v20 = vadd.f32 %v1818_v37, %v1742_v52  ;;  %v1744_v24 = vpop.f32.mrf.mxu1  ;;  %v1134_v52 = vld [vmem:[#allocation2 + $0x2d8] sm:$0xff]  ;;  %2246 = vmatpush.msra.mxu0 %v1054_v61 }
 0x261   : > { %v1745_v37 = vadd.f32 %v1744_v24, %v1668_v10  ;;  %2319 = vmatpush.msrb.mxu1 %v1134_v52  ;;  %v7721_v24 = vld [vmem:[#allocation26_spill] sm:$0xff]  ;;  %v1206_v61 = vld [vmem:[#allocation2 + $0x518] sm:$0xff]  ;;  %v7722_v52 = vld [vmem:[#allocation29_spill] sm:$0xff] }
 0x262   : > { %v5513_v60 = vadd.f32 %v1895_v63, %v1819_v20  ;;  %v5515_v53 = vpop.f32.mrf.mxu0  ;;  %v1046_v20 = vld [vmem:[#allocation2 + $0x18] sm:$0xff]  ;;  %2247 = vmatpush.msra.mxu0 %v1050_v2  ;;  %2394 = vmatpush.msrb.mxu2 %v1206_v61 }
 0x263   : > { %2039 = vmatmul.f32.gmra.mxu1 %v7714_v16  ;;  %v1270_v10 = vld [vmem:[#allocation2 + $0x718] sm:$0xff] }
 0x264   : > { %7713 = vst [vmem:[#allocation81_spill] sm:$0xff] %v5513_v60  ;;  %2116 = vmatmul.f32.gmra.mxu2 %v7715_v21  ;;  %2193 = vmatmul.f32.gmra.mxu3 %v7716_v17  ;;  %v7719_v17 = vld [vmem:[#allocation27_spill] sm:$0xff]  ;;  %v1130_v61 = vld [vmem:[#allocation2 + $0x2b8] sm:$0xff] }
 0x265   : > { %1989 = vmatmul.f32.gmra.mxu0 %v7717_v50  ;;  %v7720_v50 = vld [vmem:[#allocation28_spill] sm:$0xff]  ;;  %2471 = vmatpush.msrb.mxu3 %v1270_v10  ;;  %v7727_v10 = vld [vmem:[#allocation33_spill] sm:$0xff] }
 0x266   : > { %2248 = vmatpush.msra.mxu0 %v1046_v20  ;;  %2320 = vmatpush.msrb.mxu1 %v1130_v61  ;;  %v7732_v61 = vld [vmem:[#allocation37_spill] sm:$0xff] }
 0x267   : > { %v1821_v63 = vpop.f32.mrf.mxu2  ;;  %v1898_v47 = vpop.f32.mrf.mxu3 }
 0x268   : > { %v1822_v60 = vadd.f32 %v1821_v63, %v1745_v37  ;;  %v1747_v16 = vpop.f32.mrf.mxu1 }
 0x269   : > { %v1748_v2 = vadd.f32 %v1747_v16, %v1671_v4  ;;  %v1202_v16 = vld [vmem:[#allocation2 + $0x4f8] sm:$0xff] }
 0x26a   : > { %v5523_v33 = vadd.f32 %v1898_v47, %v1822_v60  ;;  %v5525_v21 = vpop.f32.mrf.mxu0  ;;  %v1266_v4 = vld [vmem:[#allocation2 + $0x6f8] sm:$0xff]  ;;  %2395 = vmatpush.msrb.mxu2 %v1202_v16 }
 0x26b   : > { %2042 = vmatmul.f32.gmra.mxu1 %v7719_v17  ;;  %v7726_v17 = vld [vmem:[#allocation30_spill] sm:$0xff]  ;;  %2472 = vmatpush.msrb.mxu3 %v1266_v4  ;;  %v1262_v16 = vld [vmem:[#allocation2 + $0x6d8] sm:$0xff] }
 0x26c   : > { %7718 = vst [vmem:[#allocation82_spill] sm:$0xff] %v5523_v33  ;;  %2119 = vmatmul.f32.gmra.mxu2 %v7720_v50  ;;  %2196 = vmatmul.f32.gmra.mxu3 %v7721_v24  ;;  %v1674_v24 = vadd.f32 %v5445_v43, %v5401_v0  ;;  %v7725_v50 = vld [vmem:[#allocation32_spill] sm:$0xff] }
 0x26d   : > { %1992 = vmatmul.f32.gmra.mxu0 %v7722_v52  ;;  %v7730_v52 = vld [vmem:[#allocation36_spill] sm:$0xff]  ;;  %2473 = vmatpush.msrb.mxu3 %v1262_v16 }
 0x26f   : > { %v1824_v60 = vpop.f32.mrf.mxu2  ;;  %v1901_v37 = vpop.f32.mrf.mxu3 }
 0x270   : > { %v1825_v63 = vadd.f32 %v1824_v60, %v1748_v2  ;;  %v1750_v47 = vpop.f32.mrf.mxu1 }
 0x271   : > { %v1751_v2 = vadd.f32 %v1750_v47, %v1674_v24  ;;  %v1126_v24 = vld [vmem:[#allocation2 + $0x298] sm:$0xff] }
 0x272   : > { %v5533_v20 = vadd.f32 %v1901_v37, %v1825_v63  ;;  %v5535_v33 = vpop.f32.mrf.mxu0  ;;  %v1198_v47 = vld [vmem:[#allocation2 + $0x4d8] sm:$0xff]  ;;  %2321 = vmatpush.msrb.mxu1 %v1126_v24  ;;  %v7736_v24 = vld [vmem:[#allocation38_spill] sm:$0xff] }
 0x273   : > { %2045 = vmatmul.f32.gmra.mxu1 %v7724_v32  ;;  %2396 = vmatpush.msrb.mxu2 %v1198_v47  ;;  %v1194_v47 = vld [vmem:[#allocation2 + $0x4b8] sm:$0xff] }
 0x274   : > { %7723 = vst [vmem:[#allocation83_spill] sm:$0xff] %v5533_v20  ;;  %2122 = vmatmul.f32.gmra.mxu2 %v7725_v50  ;;  %2199 = vmatmul.f32.gmra.mxu3 %v7726_v17  ;;  %v7729_v50 = vld [vmem:[#allocation35_spill] sm:$0xff]  ;;  %v1677_v17 = vadd.f32 %v5455_v44, %v5401_v0 }
 0x275   : > { %1995 = vmatmul.f32.gmra.mxu0 %v7727_v10  ;;  %v7731_v10 = vld [vmem:[#allocation34_spill] sm:$0xff]  ;;  %2397 = vmatpush.msrb.mxu2 %v1194_v47 }
 0x277   : > { %v1827_v60 = vpop.f32.mrf.mxu2  ;;  %v1904_v37 = vpop.f32.mrf.mxu3 }
 0x278   : > { %v1828_v63 = vadd.f32 %v1827_v60, %v1751_v2  ;;  %v1753_v20 = vpop.f32.mrf.mxu1 }
 0x279   : > { %v1754_v4 = vadd.f32 %v1753_v20, %v1677_v17  ;;  %v1122_v17 = vld [vmem:[#allocation2 + $0x278] sm:$0xff]  ;;  %v7737_v20 = vld [vmem:[#allocation9_spill] sm:$0xff] }
 0x27a   : > { %v5543_v32 = vadd.f32 %v1904_v37, %v1828_v63  ;;  %v5545_v43 = vpop.f32.mrf.mxu0  ;;  %2322 = vmatpush.msrb.mxu1 %v1122_v17  ;;  %v1258_v17 = vld [vmem:[#allocation2 + $0x6b8] sm:$0xff] }
 0x27b   : > { %2048 = vmatmul.f32.gmra.mxu1 %v7729_v50  ;;  %v7735_v50 = vld [vmem:[#allocation40_spill] sm:$0xff]  ;;  %2474 = vmatpush.msrb.mxu3 %v1258_v17 }
 0x27c   : > { %7728 = vst [vmem:[#allocation84_spill] sm:$0xff] %v5543_v32  ;;  %2125 = vmatmul.f32.gmra.mxu2 %v7730_v52  ;;  %2202 = vmatmul.f32.gmra.mxu3 %v7731_v10  ;;  %v7734_v52 = vld [vmem:[#allocation39_spill] sm:$0xff]  ;;  %v1680_v10 = vadd.f32 %v5465_v59, %v5401_v0  ;;  %v7739_v59 = vld [vmem:[#allocation42_spill] sm:$0xff]  ;;  %v1190_v17 = vld [vmem:[#allocation2 + $0x498] sm:$0xff] }
 0x27d   : > { %1998 = vmatmul.f32.gmra.mxu0 %v7732_v61  ;;  %2398 = vmatpush.msrb.mxu2 %v1190_v17  ;;  %v7751_v61 = vld [vmem:[#allocation47_spill] sm:$0xff]  ;;  %v1114_v17 = vld [vmem:[#allocation2 + $0x238] sm:$0xff] }
 0x27f   : > { %v1830_v2 = vpop.f32.mrf.mxu2  ;;  %v1907_v60 = vpop.f32.mrf.mxu3 }
 0x280   : > { %v1831_v37 = vadd.f32 %v1830_v2, %v1754_v4  ;;  %v1756_v63 = vpop.f32.mrf.mxu1 }
 0x281   : > { %v1757_v16 = vadd.f32 %v1756_v63, %v1680_v10  ;;  %v7742_v10 = vld [vmem:[#allocation10_spill] sm:$0xff]  ;;  %v1118_v63 = vld [vmem:[#allocation2 + $0x258] sm:$0xff] }
 0x282   : > { %v5553_v32 = vadd.f32 %v1907_v60, %v1831_v37  ;;  %v5555_v44 = vpop.f32.mrf.mxu0  ;;  %2323 = vmatpush.msrb.mxu1 %v1118_v63 }
 0x283   : > { %2051 = vmatmul.f32.gmra.mxu1 %v7734_v52 }
 0x284   : > { %7733 = vst [vmem:[#allocation85_spill] sm:$0xff] %v5553_v32  ;;  %2128 = vmatmul.f32.gmra.mxu2 %v7735_v50  ;;  %2205 = vmatmul.f32.gmra.mxu3 %v7736_v24  ;;  %v1683_v24 = vadd.f32 %v5475_v6, %v5401_v0  ;;  %v7740_v50 = vld [vmem:[#allocation43_spill] sm:$0xff]  ;;  %v7744_v6 = vld [vmem:[#allocation45_spill] sm:$0xff] }
 0x285   : > { %2249 = vmatmul.f32.vlgmr.msra.gmra.mxu0 %v7737_v20  ;;  %v7741_v20 = vld [vmem:[#allocation41_spill] sm:$0xff]  ;;  %2324 = vmatpush.msrb.mxu1 %v1114_v17 }
 0x286   : > { %v7757_v17 = vld [vmem:[#allocation13_spill] sm:$0xff] }
 0x287   : > { %v1833_v4 = vpop.f32.mrf.mxu2  ;;  %v1910_v2 = vpop.f32.mrf.mxu3 }
 0x288   : > { %v1834_v60 = vadd.f32 %v1833_v4, %v1757_v16  ;;  %v1759_v37 = vpop.f32.mrf.mxu1 }
 0x289   : > { %v1760_v47 = vadd.f32 %v1759_v37, %v1683_v24  ;;  %v1254_v24 = vld [vmem:[#allocation2 + $0x698] sm:$0xff]  ;;  %v7747_v37 = vld [vmem:[#allocation11_spill] sm:$0xff] }
 0x28a   : > { %v5563_v32 = vadd.f32 %v1910_v2, %v1834_v60  ;;  %v5565_v52 = vpop.f32.mrf.mxu0  ;;  %2475 = vmatpush.msrb.mxu3 %v1254_v24  ;;  %v7752_v24 = vld [vmem:[#allocation12_spill] sm:$0xff] }
 0x28b   : > { %2054 = vmatmul.f32.gmra.mxu1 %v7739_v59 }
 0x28c   : > { %7738 = vst [vmem:[#allocation9_spill] sm:$0xff] %v5563_v32  ;;  %2131 = vmatmul.f32.gmra.mxu2 %v7740_v50  ;;  %2208 = vmatmul.f32.gmra.mxu3 %v7741_v20  ;;  %v1686_v20 = vadd.f32 %v5485_v12, %v5401_v0  ;;  %v7745_v50 = vld [vmem:[#allocation46_spill] sm:$0xff]  ;;  %v7749_v12 = vld [vmem:[#allocation48_spill] sm:$0xff] }
 0x28d   : > { %2252 = vmatmul.f32.gmra.mxu0 %v7742_v10  ;;  %v7746_v10 = vld [vmem:[#allocation44_spill] sm:$0xff] }
 0x28f   : > { %v1836_v16 = vpop.f32.mrf.mxu2  ;;  %v1913_v4 = vpop.f32.mrf.mxu3 }
 0x290   : > { %v1837_v2 = vadd.f32 %v1836_v16, %v1760_v47  ;;  %v1762_v60 = vpop.f32.mrf.mxu1 }
 0x291   : > { %v1763_v63 = vadd.f32 %v1762_v60, %v1686_v20  ;;  %v1186_v20 = vld [vmem:[#allocation2 + $0x478] sm:$0xff] }
 0x292   : > { %v5573_v32 = vadd.f32 %v1913_v4, %v1837_v2  ;;  %v5575_v59 = vpop.f32.mrf.mxu0  ;;  %v1250_v60 = vld [vmem:[#allocation2 + $0x678] sm:$0xff]  ;;  %2399 = vmatpush.msrb.mxu2 %v1186_v20 }
 0x293   : > { %2057 = vmatmul.f32.gmra.mxu1 %v7744_v6  ;;  %2476 = vmatpush.msrb.mxu3 %v1250_v60  ;;  %v1246_v20 = vld [vmem:[#allocation2 + $0x658] sm:$0xff] }
 0x294   : > { %7743 = vst [vmem:[#allocation10_spill] sm:$0xff] %v5573_v32  ;;  %2134 = vmatmul.f32.gmra.mxu2 %v7745_v50  ;;  %2211 = vmatmul.f32.gmra.mxu3 %v7746_v10  ;;  %v1689_v10 = vadd.f32 %v5495_v58, %v5401_v0  ;;  %v7750_v50 = vld [vmem:[#allocation49_spill] sm:$0xff] }
 0x295   : > { %2255 = vmatmul.f32.gmra.mxu0 %v7747_v37  ;;  %2477 = vmatpush.msrb.mxu3 %v1246_v20 }
 0x297   : > { %v1839_v47 = vpop.f32.mrf.mxu2  ;;  %v1916_v16 = vpop.f32.mrf.mxu3 }
 0x298   : > { %v1840_v4 = vadd.f32 %v1839_v47, %v1763_v63  ;;  %v1765_v2 = vpop.f32.mrf.mxu1 }
 0x299   : > { %v1766_v37 = vadd.f32 %v1765_v2, %v1689_v10  ;;  %v1110_v10 = vld [vmem:[#allocation2 + $0x218] sm:$0xff] }
 0x29a   : > { %v5583_v32 = vadd.f32 %v1916_v16, %v1840_v4  ;;  %v5585_v6 = vpop.f32.mrf.mxu0  ;;  %v1182_v2 = vld [vmem:[#allocation2 + $0x458] sm:$0xff]  ;;  %2325 = vmatpush.msrb.mxu1 %v1110_v10 }
 0x29b   : > { %2060 = vmatmul.f32.gmra.mxu1 %v7749_v12  ;;  %v7755_v12 = vld [vmem:[#allocation52_spill] sm:$0xff]  ;;  %2400 = vmatpush.msrb.mxu2 %v1182_v2 }
 0x29c   : > { %7748 = vst [vmem:[#allocation11_spill] sm:$0xff] %v5583_v32  ;;  %2137 = vmatmul.f32.gmra.mxu2 %v7750_v50  ;;  %2214 = vmatmul.f32.gmra.mxu3 %v7751_v61  ;;  %v7754_v50 = vld [vmem:[#allocation51_spill] sm:$0xff]  ;;  %v1692_v61 = vadd.f32 %v5505_v49, %v5401_v0  ;;  %v1238_v2 = vld [vmem:[#allocation2 + $0x618] sm:$0xff] }
 0x29d   : > { %2258 = vmatmul.f32.gmra.mxu0 %v7752_v24  ;;  %v7756_v24 = vld [vmem:[#allocation50_spill] sm:$0xff] }
 0x29f   : > { %v1842_v63 = vpop.f32.mrf.mxu2  ;;  %v1919_v47 = vpop.f32.mrf.mxu3 }
 0x2a0   : > { %v1843_v16 = vadd.f32 %v1842_v63, %v1766_v37  ;;  %v1768_v4 = vpop.f32.mrf.mxu1 }
 0x2a1   : > { %v1769_v60 = vadd.f32 %v1768_v4, %v1692_v61  ;;  %v1174_v4 = vld [vmem:[#allocation2 + $0x418] sm:$0xff] }
 0x2a2   : > { %v5593_v32 = vadd.f32 %v1919_v47, %v1843_v16  ;;  %v5595_v58 = vpop.f32.mrf.mxu0  ;;  %v5606_v47 = vld [vmem:[%s7311_s4] sm:$0xf] }
 0x2a3   : > { %2063 = vmatmul.f32.gmra.mxu1 %v7754_v50  ;;  %7758 = vst [vmem:[#allocation51_spill] sm:$0xff] %v5606_v47  ;;  %v5609_v49 = vperm.slane %v5606_v47, 2 }
 0x2a4   : > { %7753 = vst [vmem:[#allocation12_spill] sm:$0xff] %v5593_v32  ;;  %2140 = vmatmul.f32.gmra.mxu2 %v7755_v12  ;;  %2217 = vmatmul.f32.gmra.mxu3 %v7756_v24  ;;  %v1178_v32 = vld [vmem:[#allocation2 + $0x438] sm:$0xff] }
 0x2a5   : > { %2261 = vmatmul.f32.gmra.mxu0 %v7757_v17  ;;  %v1242_v24 = vld [vmem:[#allocation2 + $0x638] sm:$0xff]  ;;  %2401 = vmatpush.msrb.mxu2 %v1178_v32  ;;  %v7760_v17 = vld [vmem:[#allocation55_spill] sm:$0xff]  ;;  %v1943_v20 = vadd.f32 %v5515_v53, %v5609_v49  ;;  %v1946_v47 = vadd.f32 %v5525_v21, %v5609_v49 }
 0x2a6   : > { %2478 = vmatpush.msrb.mxu3 %v1242_v24  ;;  %v2651_v32 = vld [vmem:[%s7312_s5 + $0xf0] sm:$0xff] }
 0x2a7   : > { %v1845_v37 = vpop.f32.mrf.mxu2  ;;  %v1922_v63 = vpop.f32.mrf.mxu3  ;;  %2402 = vmatpush.msrb.mxu2 %v1174_v4  ;;  %v2683_v24 = vld [vmem:[%s7312_s5 + $0x1f0] sm:$0xff]  ;;  %2755 = vmatpush.msrb.mxu0 %v2651_v32 }
 0x2a8   : > { %v1846_v0 = vadd.f32 %v1845_v37, %v1769_v60  ;;  %v2019_v16 = vpop.f32.mrf.mxu1  ;;  %2479 = vmatpush.msrb.mxu3 %v1238_v2  ;;  %2832 = vmatpush.msra.mxu1 %v2683_v24 }
 0x2a9   : > { %v2020_v60 = vadd.f32 %v2019_v16, %v1943_v20  ;;  %v2681_v16 = vld [vmem:[%s7312_s5 + $0x1e0] sm:$0xff] }
 0x2aa   : > { %v5611_v10 = vadd.f32 %v1922_v63, %v1846_v0  ;;  %v5613_v61 = vpop.f32.mrf.mxu0  ;;  %2833 = vmatpush.msra.mxu1 %v2681_v16 }
 0x2ab   : > { %2066 = vmatmul.f32.gmra.mxu1 %v7760_v17 }
 0x2ac   : > { %7759 = vst [vmem:[#allocation52_spill] sm:$0xff] %v5611_v10  ;;  %2143 = vmatmul.f32.gmra.mxu2 %v7698_v48  ;;  %2220 = vmatmul.f32.gmra.mxu3 %v7699_v51 }
 0x2ad   : > { %2264 = vmatmul.f32.gmra.mxu0 %v7700_v55  ;;  %v2649_v55 = vld [vmem:[%s7312_s5 + $0xe0] sm:$0xff] }
 0x2ae   : > { %2756 = vmatpush.msrb.mxu0 %v2649_v55 }
 0x2af   : > { %v2096_v37 = vpop.f32.mrf.mxu2  ;;  %v2173_v53 = vpop.f32.mrf.mxu3 }
 0x2b0   : > { %v2097_v63 = vadd.f32 %v2096_v37, %v2020_v60  ;;  %v2022_v0 = vpop.f32.mrf.mxu1 }
 0x2b1   : > { %v2023_v2 = vadd.f32 %v2022_v0, %v1946_v47  ;;  %v2647_v47 = vld [vmem:[%s7312_s5 + $0xd0] sm:$0xff] }
 0x2b2   : > { %v5627_v4 = vadd.f32 %v2173_v53, %v2097_v63  ;;  %v5629_v10 = vpop.f32.mrf.mxu0  ;;  %2757 = vmatpush.msrb.mxu0 %v2647_v47 }
 0x2b3   : > { %2069 = vmatmul.f32.gmra.mxu1 %v5184_v7 }
 0x2b4   : > { %7761 = vst [vmem:[#allocation13_spill] sm:$0xff] %v5627_v4  ;;  %2146 = vmatmul.f32.gmra.mxu2 %v5188_v29  ;;  %2223 = vmatmul.f32.gmra.mxu3 %v5182_v62 }
 0x2b5   : > { %2267 = vmatmul.f32.gmra.mxu0 %v4772_v30  ;;  %v1949_v30 = vadd.f32 %v5535_v33, %v5609_v49  ;;  %v1952_v33 = vadd.f32 %v5545_v43, %v5609_v49 }
 0x2b7   : > { %v2099_v20 = vpop.f32.mrf.mxu2  ;;  %v2176_v32 = vpop.f32.mrf.mxu3 }
 0x2b8   : > { %v2100_v21 = vadd.f32 %v2099_v20, %v2023_v2  ;;  %v2025_v24 = vpop.f32.mrf.mxu1 }
 0x2b9   : > { %v2026_v53 = vadd.f32 %v2025_v24, %v1949_v30 }
 0x2ba   : > { %v5643_v60 = vadd.f32 %v2176_v32, %v2100_v21  ;;  %v5645_v37 = vpop.f32.mrf.mxu0  ;;  %v2715_v32 = vld [vmem:[%s7312_s5 + $0x2f0] sm:$0xff] }
 0x2bb   : > { %2072 = vmatmul.f32.gmra.mxu1 %v5205_v38  ;;  %v2747_v21 = vld [vmem:[%s7312_s5 + $0x3f0] sm:$0xff]  ;;  %2909 = vmatpush.msra.mxu2 %v2715_v32 }
 0x2bc   : > { %2149 = vmatmul.f32.gmra.mxu2 %v5209_v35  ;;  %2226 = vmatmul.f32.gmra.mxu3 %v5203_v28 }
 0x2bd   : > { %2270 = vmatmul.f32.gmra.mxu0 %v4785_v42  ;;  %v2679_v42 = vld [vmem:[%s7312_s5 + $0x1d0] sm:$0xff]  ;;  %2986 = vmatpush.msra.mxu3 %v2747_v21 }
 0x2be   : > { %2834 = vmatpush.msra.mxu1 %v2679_v42  ;;  %v2713_v42 = vld [vmem:[%s7312_s5 + $0x2e0] sm:$0xff] }
 0x2bf   : > { %v2102_v63 = vpop.f32.mrf.mxu2  ;;  %v2179_v0 = vpop.f32.mrf.mxu3  ;;  %2910 = vmatpush.msra.mxu2 %v2713_v42  ;;  %v2743_v42 = vld [vmem:[%s7312_s5 + $0x3d0] sm:$0xff] }
 0x2c0   : > { %v2103_v55 = vadd.f32 %v2102_v63, %v2026_v53  ;;  %v2028_v16 = vpop.f32.mrf.mxu1 }
 0x2c1   : > { %v2029_v43 = vadd.f32 %v2028_v16, %v1952_v33  ;;  %v2645_v16 = vld [vmem:[%s7312_s5 + $0xc0] sm:$0xff] }
 0x2c2   : > { %v5656_v2 = vadd.f32 %v2179_v0, %v2103_v55  ;;  %v5658_v20 = vpop.f32.mrf.mxu0  ;;  %v1955_v55 = vadd.f32 %v5555_v44, %v5609_v49  ;;  %v2677_v33 = vld [vmem:[%s7312_s5 + $0x1c0] sm:$0xff]  ;;  %2758 = vmatpush.msrb.mxu0 %v2645_v16 }
 0x2c3   : > { %2075 = vmatmul.f32.gmra.mxu1 %v5226_v45 }
 0x2c4   : > { %2152 = vmatmul.f32.gmra.mxu2 %v5230_v31  ;;  %2229 = vmatmul.f32.gmra.mxu3 %v5224_v36 }
 0x2c5   : > { %2273 = vmatmul.f32.gmra.mxu0 %v4807_v27  ;;  %v7763_v27 = vld [vmem:[#allocation15_spill] sm:$0xff]  ;;  %2835 = vmatpush.msra.mxu1 %v2677_v33 }
 0x2c7   : > { %v2105_v24 = vpop.f32.mrf.mxu2  ;;  %v2182_v30 = vpop.f32.mrf.mxu3 }
 0x2c8   : > { %v2106_v47 = vadd.f32 %v2105_v24, %v2029_v43  ;;  %v2031_v53 = vpop.f32.mrf.mxu1 }
 0x2ca   : > { %v5675_v63 = vadd.f32 %v2182_v30, %v2106_v47  ;;  %v5677_v0 = vpop.f32.mrf.mxu0  ;;  %v2643_v47 = vld [vmem:[%s7312_s5 + $0xb0] sm:$0xff] }
 0x2cb   : > { %2326 = vmatmul.f32.vlgmr.msrb.gmra.mxu1 %v4825_v39  ;;  %v2745_v39 = vld [vmem:[%s7312_s5 + $0x3e0] sm:$0xff]  ;;  %2759 = vmatpush.msrb.mxu0 %v2643_v47 }
 0x2cc   : > { %7762 = vst [vmem:[#allocation55_spill] sm:$0xff] %v5675_v63  ;;  %2403 = vmatmul.f32.vlgmr.msrb.gmra.mxu2 %v4827_v3  ;;  %2480 = vmatmul.f32.vlgmr.msrb.gmra.mxu3 %v7763_v27  ;;  %v2032_v3 = vadd.f32 %v2031_v53, %v1955_v55  ;;  %v2675_v53 = vld [vmem:[%s7312_s5 + $0x1b0] sm:$0xff] }
 0x2cd   : > { %2276 = vmatmul.f32.gmra.mxu0 %v4829_v5  ;;  %2987 = vmatpush.msra.mxu3 %v2745_v39  ;;  %v1958_v5 = vadd.f32 %v5565_v52, %v5609_v49  ;;  %v2641_v39 = vld [vmem:[%s7312_s5 + $0xa0] sm:$0xff] }
 0x2ce   : > { %2836 = vmatpush.msra.mxu1 %v2675_v53  ;;  %2760 = vmatpush.msrb.mxu0 %v2641_v39  ;;  %v1970_v39 = vadd.f32 %v5613_v61, %v5609_v49  ;;  %v2635_v61 = vld [vmem:[%s7312_s5 + $0x70] sm:$0xff] }
 0x2cf   : > { %v2108_v44 = vpop.f32.mrf.mxu2  ;;  %v2185_v32 = vpop.f32.mrf.mxu3  ;;  %2988 = vmatpush.msra.mxu3 %v2743_v42 }
 0x2d0   : > { %v2109_v21 = vadd.f32 %v2108_v44, %v2032_v3  ;;  %v2034_v43 = vpop.f32.mrf.mxu1 }
 0x2d1   : > { %v2035_v52 = vadd.f32 %v2034_v43, %v1958_v5  ;;  %v2709_v43 = vld [vmem:[%s7312_s5 + $0x2c0] sm:$0xff] }
 0x2d2   : > { %v5697_v24 = vadd.f32 %v2185_v32, %v2109_v21  ;;  %v5699_v30 = vpop.f32.mrf.mxu0  ;;  %v2741_v5 = vld [vmem:[%s7312_s5 + $0x3c0] sm:$0xff] }
 0x2d3   : > { %2329 = vmatmul.f32.gmra.mxu1 %v4844_v23  ;;  %v2711_v23 = vld [vmem:[%s7312_s5 + $0x2d0] sm:$0xff]  ;;  %2989 = vmatpush.msra.mxu3 %v2741_v5 }
 0x2d4   : > { %7764 = vst [vmem:[#allocation15_spill] sm:$0xff] %v5697_v24  ;;  %2406 = vmatmul.f32.gmra.mxu2 %v4846_v25  ;;  %2483 = vmatmul.f32.gmra.mxu3 %v4840_v18 }
 0x2d5   : > { %2279 = vmatmul.f32.gmra.mxu0 %v4848_v26  ;;  %2911 = vmatpush.msra.mxu2 %v2711_v23  ;;  %v1961_v26 = vadd.f32 %v5575_v59, %v5609_v49 }
 0x2d7   : > { %v2111_v25 = vpop.f32.mrf.mxu2  ;;  %v2188_v18 = vpop.f32.mrf.mxu3  ;;  %2912 = vmatpush.msra.mxu2 %v2709_v43 }
 0x2d8   : > { %v2112_v55 = vadd.f32 %v2111_v25, %v2035_v52  ;;  %v2037_v27 = vpop.f32.mrf.mxu1  ;;  %v2671_v25 = vld [vmem:[%s7312_s5 + $0x190] sm:$0xff] }
 0x2d9   : > { %v2038_v59 = vadd.f32 %v2037_v27, %v1961_v26 }
 0x2da   : > { %v5716_v16 = vadd.f32 %v2188_v18, %v2112_v55  ;;  %v5718_v33 = vpop.f32.mrf.mxu0  ;;  %v2707_v18 = vld [vmem:[%s7312_s5 + $0x2b0] sm:$0xff] }
 0x2db   : > { %2332 = vmatmul.f32.gmra.mxu1 %v4864_v54  ;;  %v2673_v54 = vld [vmem:[%s7312_s5 + $0x1a0] sm:$0xff]  ;;  %v2739_v55 = vld [vmem:[%s7312_s5 + $0x3b0] sm:$0xff]  ;;  %2913 = vmatpush.msra.mxu2 %v2707_v18 }
 0x2dc   : > { %2409 = vmatmul.f32.gmra.mxu2 %v4866_v41  ;;  %2486 = vmatmul.f32.gmra.mxu3 %v4860_v46 }
 0x2dd   : > { %2282 = vmatmul.f32.gmra.mxu0 %v4868_v57  ;;  %2837 = vmatpush.msra.mxu1 %v2673_v54  ;;  %v1964_v57 = vadd.f32 %v5585_v6, %v5609_v49  ;;  %v2637_v54 = vld [vmem:[%s7312_s5 + $0x80] sm:$0xff] }
 0x2de   : > { %2990 = vmatpush.msra.mxu3 %v2739_v55  ;;  %v2627_v55 = vld [vmem:[%s7312_s5 + $0x30] sm:$0xff] }
 0x2df   : > { %v2114_v41 = vpop.f32.mrf.mxu2  ;;  %v2191_v46 = vpop.f32.mrf.mxu3  ;;  %2838 = vmatpush.msra.mxu1 %v2671_v25 }
 0x2e0   : > { %v2115_v3 = vadd.f32 %v2114_v41, %v2038_v59  ;;  %v2040_v44 = vpop.f32.mrf.mxu1  ;;  %v2669_v59 = vld [vmem:[%s7312_s5 + $0x180] sm:$0xff] }
 0x2e1   : > { %v2041_v6 = vadd.f32 %v2040_v44, %v1964_v57  ;;  %v2705_v41 = vld [vmem:[%s7312_s5 + $0x2a0] sm:$0xff]  ;;  %2839 = vmatpush.msra.mxu1 %v2669_v59  ;;  %v7775_v59 = vld [vmem:[#allocation22_spill] sm:$0xff] }
 0x2e2   : > { %v5735_v32 = vadd.f32 %v2191_v46, %v2115_v3  ;;  %v5737_v21 = vpop.f32.mrf.mxu0  ;;  %2914 = vmatpush.msra.mxu2 %v2705_v41  ;;  %v2735_v41 = vld [vmem:[%s7312_s5 + $0x390] sm:$0xff] }
 0x2e3   : > { %2335 = vmatmul.f32.gmra.mxu1 %v4884_v11  ;;  %v2639_v11 = vld [vmem:[%s7312_s5 + $0x90] sm:$0xff] }
 0x2e4   : > { %7765 = vst [vmem:[#allocation86_spill] sm:$0xff] %v5735_v32  ;;  %2412 = vmatmul.f32.gmra.mxu2 %v4886_v13  ;;  %2489 = vmatmul.f32.gmra.mxu3 %v4880_v9 }
 0x2e5   : > { %2285 = vmatmul.f32.gmra.mxu0 %v4888_v14  ;;  %v1967_v14 = vadd.f32 %v5595_v58, %v5609_v49 }
 0x2e6   : > { %2761 = vmatpush.msrb.mxu0 %v2639_v11  ;;  %v2631_v11 = vld [vmem:[%s7312_s5 + $0x50] sm:$0xff] }
 0x2e7   : > { %v2117_v13 = vpop.f32.mrf.mxu2  ;;  %v2194_v9 = vpop.f32.mrf.mxu3 }
 0x2e8   : > { %v2118_v47 = vadd.f32 %v2117_v13, %v2041_v6  ;;  %v2043_v53 = vpop.f32.mrf.mxu1  ;;  %2762 = vmatpush.msrb.mxu0 %v2637_v54  ;;  %v1973_v6 = vadd.f32 %v5629_v10, %v5609_v49  ;;  %v7770_v13 = vld [vmem:[#allocation20_spill] sm:$0xff] }
 0x2e9   : > { %v7774_v54 = vld [vmem:[#allocation24_spill] sm:$0xff] }
 0x2ea   : > { %v5754_v23 = vadd.f32 %v2194_v9, %v2118_v47  ;;  %v5756_v52 = vpop.f32.mrf.mxu0  ;;  %2763 = vmatpush.msrb.mxu0 %v2635_v61  ;;  %v7771_v9 = vld [vmem:[#allocation18_spill] sm:$0xff]  ;;  %v2667_v47 = vld [vmem:[%s7312_s5 + $0x170] sm:$0xff]  ;;  %v2665_v61 = vld [vmem:[%s7312_s5 + $0x160] sm:$0xff] }
 0x2eb   : > { %2338 = vmatmul.f32.gmra.mxu1 %v4906_v40  ;;  %v2044_v40 = vadd.f32 %v2043_v53, %v1967_v14  ;;  %v7772_v53 = vld [vmem:[#allocation21_spill] sm:$0xff]  ;;  %v2703_v14 = vld [vmem:[%s7312_s5 + $0x290] sm:$0xff] }
 0x2ec   : > { %7766 = vst [vmem:[#allocation87_spill] sm:$0xff] %v5754_v23  ;;  %2415 = vmatmul.f32.gmra.mxu2 %v4908_v1  ;;  %2492 = vmatmul.f32.gmra.mxu3 %v4902_v34 }
 0x2ed   : > { %2288 = vmatmul.f32.gmra.mxu0 %v4910_v19  ;;  %v7768_v19 = vld [vmem:[#allocation16_spill] sm:$0xff]  ;;  %2840 = vmatpush.msra.mxu1 %v2667_v47 }
 0x2ee   : > { %2915 = vmatpush.msra.mxu2 %v2703_v14  ;;  %v7778_v47 = vld [vmem:[#allocation28_spill] sm:$0xff]  ;;  %v2733_v14 = vld [vmem:[%s7312_s5 + $0x380] sm:$0xff] }
 0x2ef   : > { %v2120_v1 = vpop.f32.mrf.mxu2  ;;  %v2197_v34 = vpop.f32.mrf.mxu3  ;;  %2841 = vmatpush.msra.mxu1 %v2665_v61  ;;  %v7784_v61 = vld [vmem:[#allocation33_spill] sm:$0xff] }
 0x2f0   : > { %v2121_v58 = vadd.f32 %v2120_v1, %v2044_v40  ;;  %v2046_v27 = vpop.f32.mrf.mxu1 }
 0x2f2   : > { %v5773_v26 = vadd.f32 %v2197_v34, %v2121_v58  ;;  %v5775_v42 = vpop.f32.mrf.mxu0 }
 0x2f3   : > { %2341 = vmatmul.f32.gmra.mxu1 %v4930_v15  ;;  %v2737_v15 = vld [vmem:[%s7312_s5 + $0x3a0] sm:$0xff] }
 0x2f4   : > { %7767 = vst [vmem:[#allocation88_spill] sm:$0xff] %v5773_v26  ;;  %2418 = vmatmul.f32.gmra.mxu2 %v4932_v22  ;;  %2495 = vmatmul.f32.gmra.mxu3 %v7768_v19  ;;  %v2047_v22 = vadd.f32 %v2046_v27, %v1970_v39  ;;  %v7773_v27 = vld [vmem:[#allocation23_spill] sm:$0xff]  ;;  %v2625_v39 = vld [vmem:[%s7312_s5 + $0x20] sm:$0xff]  ;;  %v1976_v19 = vadd.f32 %v5645_v37, %v5609_v49 }
 0x2f5   : > { %2291 = vmatmul.f32.gmra.mxu0 %v7644_v8  ;;  %2991 = vmatpush.msra.mxu3 %v2737_v15  ;;  %v2633_v8 = vld [vmem:[%s7312_s5 + $0x60] sm:$0xff] }
 0x2f6   : > { %2764 = vmatpush.msrb.mxu0 %v2633_v8  ;;  %v7776_v15 = vld [vmem:[#allocation25_spill] sm:$0xff] }
 0x2f7   : > { %v2123_v46 = vpop.f32.mrf.mxu2  ;;  %v2200_v3 = vpop.f32.mrf.mxu3  ;;  %2992 = vmatpush.msra.mxu3 %v2735_v41  ;;  %v2663_v41 = vld [vmem:[%s7312_s5 + $0x150] sm:$0xff] }
 0x2f8   : > { %v2124_v44 = vadd.f32 %v2123_v46, %v2047_v22  ;;  %v2049_v57 = vpop.f32.mrf.mxu1  ;;  %2765 = vmatpush.msrb.mxu0 %v2631_v11  ;;  %v2623_v22 = vld [vmem:[%s7312_s5 + $0x10] sm:$0xff]  ;;  %2842 = vmatpush.msra.mxu1 %v2663_v41 }
 0x2f9   : > { %v2050_v10 = vadd.f32 %v2049_v57, %v1973_v6  ;;  %2993 = vmatpush.msra.mxu3 %v2733_v14  ;;  %v2697_v14 = vld [vmem:[%s7312_s5 + $0x260] sm:$0xff]  ;;  %v7791_v41 = vld [vmem:[#allocation39_spill] sm:$0xff] }
 0x2fa   : > { %v5801_v43 = vadd.f32 %v2200_v3, %v2124_v44  ;;  %v5803_v5 = vpop.f32.mrf.mxu0  ;;  %v2621_v44 = vld [vmem:[%s7312_s5] sm:$0xff] }
 0x2fb   : > { %2344 = vmatmul.f32.gmra.mxu1 %v7646_v56  ;;  %v2629_v56 = vld [vmem:[%s7312_s5 + $0x40] sm:$0xff] }
 0x2fc   : > { %7769 = vst [vmem:[#allocation16_spill] sm:$0xff] %v5801_v43  ;;  %2421 = vmatmul.f32.gmra.mxu2 %v7770_v13  ;;  %2498 = vmatmul.f32.gmra.mxu3 %v7771_v9  ;;  %v7777_v13 = vld [vmem:[#allocation27_spill] sm:$0xff]  ;;  %v1979_v9 = vadd.f32 %v5658_v20, %v5609_v49 }
 0x2fd   : > { %2294 = vmatmul.f32.gmra.mxu0 %v7772_v53  ;;  %v7779_v53 = vld [vmem:[#allocation26_spill] sm:$0xff] }
 0x2fe   : > { %2766 = vmatpush.msrb.mxu0 %v2629_v56  ;;  %v2701_v56 = vld [vmem:[%s7312_s5 + $0x280] sm:$0xff] }
 0x2ff   : > { %v2126_v25 = vpop.f32.mrf.mxu2  ;;  %v2203_v18 = vpop.f32.mrf.mxu3  ;;  %2916 = vmatpush.msra.mxu2 %v2701_v56  ;;  %v2661_v56 = vld [vmem:[%s7312_s5 + $0x140] sm:$0xff] }
 0x300   : > { %v2127_v40 = vadd.f32 %v2126_v25, %v2050_v10  ;;  %v2052_v1 = vpop.f32.mrf.mxu1  ;;  %2767 = vmatpush.msrb.mxu0 %v2627_v55  ;;  %v7780_v10 = vld [vmem:[#allocation29_spill] sm:$0xff]  ;;  %2843 = vmatpush.msra.mxu1 %v2661_v56 }
 0x301   : > { %v2053_v37 = vadd.f32 %v2052_v1, %v1976_v19  ;;  %v1982_v19 = vadd.f32 %v5677_v0, %v5609_v49 }
 0x302   : > { %v5826_v34 = vadd.f32 %v2203_v18, %v2127_v40  ;;  %v5828_v58 = vpop.f32.mrf.mxu0  ;;  %2768 = vmatpush.msrb.mxu0 %v2625_v39  ;;  %v7781_v39 = vld [vmem:[#allocation31_spill] sm:$0xff] }
 0x303   : > { %2347 = vmatmul.f32.gmra.mxu1 %v7773_v27 }
 0x304   : > { %2424 = vmatmul.f32.gmra.mxu2 %v7774_v54  ;;  %2501 = vmatmul.f32.gmra.mxu3 %v7775_v59  ;;  %v7782_v54 = vld [vmem:[#allocation32_spill] sm:$0xff]  ;;  %v7783_v59 = vld [vmem:[#allocation30_spill] sm:$0xff] }
 0x305   : > { %2297 = vmatmul.f32.gmra.mxu0 %v7776_v15  ;;  %v2699_v15 = vld [vmem:[%s7312_s5 + $0x270] sm:$0xff] }
 0x306   : > { %2769 = vmatpush.msrb.mxu0 %v2623_v22  ;;  %v2731_v22 = vld [vmem:[%s7312_s5 + $0x370] sm:$0xff]  ;;  %2917 = vmatpush.msra.mxu2 %v2699_v15  ;;  %v1988_v15 = vadd.f32 %v5718_v33, %v5609_v49 }
 0x307   : > { %v2129_v46 = vpop.f32.mrf.mxu2  ;;  %v2206_v3 = vpop.f32.mrf.mxu3  ;;  %2994 = vmatpush.msra.mxu3 %v2731_v22  ;;  %v7792_v22 = vld [vmem:[#allocation40_spill] sm:$0xff] }
 0x308   : > { %v2130_v57 = vadd.f32 %v2129_v46, %v2053_v37  ;;  %v2055_v8 = vpop.f32.mrf.mxu1  ;;  %2770 = vmatpush.msrb.mxu0 %v2621_v44  ;;  %2918 = vmatpush.msra.mxu2 %v2697_v14  ;;  %v7795_v14 = vld [vmem:[#allocation42_spill] sm:$0xff] }
 0x309   : > { %v2056_v25 = vadd.f32 %v2055_v8, %v1979_v9  ;;  %v1985_v9 = vadd.f32 %v5699_v30, %v5609_v49 }
 0x30a   : > { %v5851_v11 = vadd.f32 %v2206_v3, %v2130_v57  ;;  %v5853_v6 = vpop.f32.mrf.mxu0 }
 0x30b   : > { %2350 = vmatmul.f32.gmra.mxu1 %v7777_v13  ;;  %v7785_v13 = vld [vmem:[#allocation35_spill] sm:$0xff] }
 0x30c   : > { %2427 = vmatmul.f32.gmra.mxu2 %v7778_v47  ;;  %2504 = vmatmul.f32.gmra.mxu3 %v7779_v53  ;;  %v7786_v47 = vld [vmem:[#allocation36_spill] sm:$0xff]  ;;  %v7787_v53 = vld [vmem:[#allocation34_spill] sm:$0xff] }
 0x30d   : > { %2300 = vmatmul.f32.gmra.mxu0 %v7780_v10  ;;  %v7788_v10 = vld [vmem:[#allocation37_spill] sm:$0xff] }
 0x30f   : > { %v2132_v18 = vpop.f32.mrf.mxu2  ;;  %v2209_v55 = vpop.f32.mrf.mxu3 }
 0x310   : > { %v2133_v20 = vadd.f32 %v2132_v18, %v2056_v25  ;;  %v2058_v40 = vpop.f32.mrf.mxu1  ;;  %v2729_v25 = vld [vmem:[%s7312_s5 + $0x360] sm:$0xff] }
 0x311   : > { %v2059_v0 = vadd.f32 %v2058_v40, %v1982_v19  ;;  %2995 = vmatpush.msra.mxu3 %v2729_v25  ;;  %v7796_v25 = vld [vmem:[#allocation43_spill] sm:$0xff] }
 0x312   : > { %v5867_v1 = vadd.f32 %v2209_v55, %v2133_v20  ;;  %v5869_v27 = vpop.f32.mrf.mxu0 }
 0x313   : > { %2353 = vmatmul.f32.gmra.mxu1 %v7781_v39 }
 0x314   : > { %2430 = vmatmul.f32.gmra.mxu2 %v7782_v54  ;;  %2507 = vmatmul.f32.gmra.mxu3 %v7783_v59  ;;  %v7790_v54 = vld [vmem:[#allocation57_spill] sm:$0xff] }
 0x315   : > { %2303 = vmatmul.f32.gmra.mxu0 %v7784_v61  ;;  %v7466_v59 = vmax.f32 %v7790_v54, 0.0  ;;  %v7793_v61 = vld [vmem:[#allocation38_spill] sm:$0xff] }
 0x317   : > { %v2135_v37 = vpop.f32.mrf.mxu2  ;;  %v2212_v46 = vpop.f32.mrf.mxu3 }
 0x318   : > { %v2136_v3 = vadd.f32 %v2135_v37, %v2059_v0  ;;  %v2061_v44 = vpop.f32.mrf.mxu1  ;;  %v2659_v0 = vld [vmem:[%s7312_s5 + $0x130] sm:$0xff] }
 0x319   : > { %v2062_v30 = vadd.f32 %v2061_v44, %v1985_v9  ;;  %2844 = vmatpush.msra.mxu1 %v2659_v0  ;;  %v2695_v37 = vld [vmem:[%s7312_s5 + $0x250] sm:$0xff] }
 0x31a   : > { %v5886_v57 = vadd.f32 %v2212_v46, %v2136_v3  ;;  %v5888_v8 = vpop.f32.mrf.mxu0  ;;  %2919 = vmatpush.msra.mxu2 %v2695_v37  ;;  %v7799_v0 = vld [vmem:[#allocation59_spill] sm:$0xff] }
 0x31b   : > { %2356 = vmatmul.f32.gmra.mxu1 %v7785_v13  ;;  %v7459_v37 = vmax.f32 %v7799_v0, 0.0 }
 0x31c   : > { %2433 = vmatmul.f32.gmra.mxu2 %v7786_v47  ;;  %2510 = vmatmul.f32.gmra.mxu3 %v7787_v53  ;;  %v7794_v53 = vld [vmem:[#allocation58_spill] sm:$0xff] }
 0x31d   : > { %2306 = vmatmul.f32.gmra.mxu0 %v7788_v10  ;;  %v7465_v56 = vmax.f32 %v7794_v53, 0.0  ;;  %v1991_v10 = vadd.f32 %v5737_v21, %v5609_v49 }
 0x31f   : > { %v2138_v18 = vpop.f32.mrf.mxu2  ;;  %v2215_v55 = vpop.f32.mrf.mxu3 }
 0x320   : > { %v2139_v20 = vadd.f32 %v2138_v18, %v2062_v30  ;;  %v2064_v40 = vpop.f32.mrf.mxu1  ;;  %v7797_v30 = vld [vmem:[#allocation41_spill] sm:$0xff]  ;;  %v2727_v18 = vld [vmem:[%s7312_s5 + $0x350] sm:$0xff] }
 0x321   : > { %v2065_v46 = vadd.f32 %v2064_v40, %v1988_v15  ;;  %2996 = vmatpush.msra.mxu3 %v2727_v18 }
 0x322   : > { %v5905_v39 = vadd.f32 %v2215_v55, %v2139_v20  ;;  %v5907_v19 = vpop.f32.mrf.mxu0  ;;  %v2657_v55 = vld [vmem:[%s7312_s5 + $0x120] sm:$0xff] }
 0x323   : > { %2359 = vmatmul.f32.gmra.mxu1 %v7791_v41 }
 0x324   : > { %7789 = vst [vmem:[#allocation20_spill] sm:$0xff] %v5905_v39  ;;  %2436 = vmatmul.f32.gmra.mxu2 %v7792_v22  ;;  %2513 = vmatmul.f32.gmra.mxu3 %v7793_v61 }
 0x325   : > { %2771 = vmatmul.f32.vlgmr.msrb.gmra.mxu0 %v7466_v59  ;;  %2845 = vmatpush.msra.mxu1 %v2657_v55  ;;  %v7470_v59 = vmax.f32 %v5627_v4, 0.0 }
 0x327   : > { %v2141_v3 = vpop.f32.mrf.mxu2  ;;  %v2218_v33 = vpop.f32.mrf.mxu3 }
 0x328   : > { %v2142_v44 = vadd.f32 %v2141_v3, %v2065_v46  ;;  %v2067_v13 = vpop.f32.mrf.mxu1  ;;  %v7800_v46 = vld [vmem:[#allocation45_spill] sm:$0xff]  ;;  %v1994_v3 = vadd.f32 %v5756_v52, %v5609_v49 }
 0x329   : > { %v2068_v20 = vadd.f32 %v2067_v13, %v1991_v10  ;;  %v2693_v13 = vld [vmem:[%s7312_s5 + $0x240] sm:$0xff] }
 0x32a   : > { %v5923_v9 = vadd.f32 %v2218_v33, %v2142_v44  ;;  %v5925_v47 = vpop.f32.mrf.mxu0  ;;  %v7801_v33 = vld [vmem:[#allocation46_spill] sm:$0xff]  ;;  %v7802_v44 = vld [vmem:[#allocation44_spill] sm:$0xff]  ;;  %2920 = vmatpush.msra.mxu2 %v2693_v13  ;;  %v2723_v13 = vld [vmem:[%s7312_s5 + $0x330] sm:$0xff] }
 0x32b   : > { %2362 = vmatmul.f32.gmra.mxu1 %v7795_v14  ;;  %v2725_v14 = vld [vmem:[%s7312_s5 + $0x340] sm:$0xff] }
 0x32c   : > { %2439 = vmatmul.f32.gmra.mxu2 %v7796_v25  ;;  %2516 = vmatmul.f32.gmra.mxu3 %v7797_v30 }
 0x32d   : > { %2774 = vmatmul.f32.gmra.mxu0 %v7465_v56  ;;  %2997 = vmatpush.msra.mxu3 %v2725_v14 }
 0x32f   : > { %v2144_v40 = vpop.f32.mrf.mxu2  ;;  %v2221_v21 = vpop.f32.mrf.mxu3  ;;  %2998 = vmatpush.msra.mxu3 %v2723_v13 }
 0x330   : > { %v2145_v41 = vadd.f32 %v2144_v40, %v2068_v20  ;;  %v2070_v15 = vpop.f32.mrf.mxu1  ;;  %v7803_v40 = vld [vmem:[#allocation60_spill] sm:$0xff] }
 0x331   : > { %v2071_v10 = vadd.f32 %v2070_v15, %v1994_v3  ;;  %v2655_v15 = vld [vmem:[%s7312_s5 + $0x110] sm:$0xff] }
 0x332   : > { %v5941_v22 = vadd.f32 %v2221_v21, %v2145_v41  ;;  %v5943_v61 = vpop.f32.mrf.mxu0  ;;  %v7463_v21 = vmax.f32 %v7803_v40, 0.0  ;;  %v7804_v41 = vld [vmem:[#allocation48_spill] sm:$0xff]  ;;  %v2691_v3 = vld [vmem:[%s7312_s5 + $0x230] sm:$0xff]  ;;  %2846 = vmatpush.msra.mxu1 %v2655_v15  ;;  %v2689_v15 = vld [vmem:[%s7312_s5 + $0x220] sm:$0xff] }
 0x333   : > { %2365 = vmatmul.f32.gmra.mxu1 %v7800_v46  ;;  %v1997_v46 = vadd.f32 %v5775_v42, %v5609_v49  ;;  %2921 = vmatpush.msra.mxu2 %v2691_v3 }
 0x334   : > { %7798 = vst [vmem:[#allocation18_spill] sm:$0xff] %v5941_v22  ;;  %2442 = vmatmul.f32.gmra.mxu2 %v7801_v33  ;;  %2519 = vmatmul.f32.gmra.mxu3 %v7802_v44  ;;  %v7805_v33 = vld [vmem:[#allocation49_spill] sm:$0xff]  ;;  %v7806_v44 = vld [vmem:[#allocation47_spill] sm:$0xff] }
 0x335   : > { %2777 = vmatmul.f32.gmra.mxu0 %v7459_v37  ;;  %v2000_v37 = vadd.f32 %v5803_v5, %v5609_v49  ;;  %2922 = vmatpush.msra.mxu2 %v2689_v15  ;;  %v2652_v15 = vld [vmem:[%s7312_s5 + $0xf8] sm:$0xff] }
 0x336   : > { %3063 = vmatpush.msra.mxu0 %v2652_v15  ;;  %v7812_v15 = vld [vmem:[#allocation64_spill] sm:$0xff] }
 0x337   : > { %v2147_v25 = vpop.f32.mrf.mxu2  ;;  %v2224_v52 = vpop.f32.mrf.mxu3 }
 0x338   : > { %v2148_v30 = vadd.f32 %v2147_v25, %v2071_v10  ;;  %v2073_v18 = vpop.f32.mrf.mxu1 }
 0x339   : > { %v2074_v42 = vadd.f32 %v2073_v18, %v1997_v46  ;;  %v7808_v18 = vld [vmem:[#allocation50_spill] sm:$0xff]  ;;  %v2653_v46 = vld [vmem:[%s7312_s5 + $0x100] sm:$0xff] }
 0x33a   : > { %v5959_v55 = vadd.f32 %v2224_v52, %v2148_v30  ;;  %v5961_v20 = vpop.f32.mrf.mxu0  ;;  %2847 = vmatpush.msra.mxu1 %v2653_v46 }
 0x33b   : > { %2368 = vmatmul.f32.gmra.mxu1 %v7804_v41 }
 0x33c   : > { %2445 = vmatmul.f32.gmra.mxu2 %v7805_v33  ;;  %2522 = vmatmul.f32.gmra.mxu3 %v7806_v44  ;;  %v7807_v33 = vld [vmem:[#allocation61_spill] sm:$0xff] }
 0x33d   : > { %2780 = vmatmul.f32.gmra.mxu0 %v7463_v21  ;;  %v7462_v44 = vmax.f32 %v7807_v33, 0.0 }
 0x33f   : > { %v2150_v14 = vpop.f32.mrf.mxu2  ;;  %v2227_v10 = vpop.f32.mrf.mxu3 }
 0x340   : > { %v2151_v25 = vadd.f32 %v2150_v14, %v2074_v42  ;;  %v2076_v52 = vpop.f32.mrf.mxu1  ;;  %v2687_v42 = vld [vmem:[%s7312_s5 + $0x210] sm:$0xff] }
 0x341   : > { %v2077_v49 = vadd.f32 %v2076_v52, %v2000_v37  ;;  %v2719_v14 = vld [vmem:[%s7312_s5 + $0x310] sm:$0xff]  ;;  %2923 = vmatpush.msra.mxu2 %v2687_v42  ;;  %v2685_v37 = vld [vmem:[%s7312_s5 + $0x200] sm:$0xff]  ;;  %v2682_v42 = vld [vmem:[%s7312_s5 + $0x1e8] sm:$0xff] }
 0x342   : > { %v5980_v30 = vadd.f32 %v2227_v10, %v2151_v25  ;;  %v5982_v41 = vpop.f32.mrf.mxu0  ;;  %v2717_v52 = vld [vmem:[%s7312_s5 + $0x300] sm:$0xff] }
 0x343   : > { %2371 = vmatmul.f32.gmra.mxu1 %v7754_v50  ;;  %v2721_v50 = vld [vmem:[%s7312_s5 + $0x320] sm:$0xff]  ;;  %2924 = vmatpush.msra.mxu2 %v2685_v37 }
 0x344   : > { %2448 = vmatmul.f32.gmra.mxu2 %v7755_v12  ;;  %2525 = vmatmul.f32.gmra.mxu3 %v7808_v18  ;;  %v7809_v18 = vld [vmem:[#allocation62_spill] sm:$0xff] }
 0x345   : > { %2783 = vmatmul.f32.gmra.mxu0 %v7462_v44  ;;  %2999 = vmatpush.msra.mxu3 %v2721_v50  ;;  %v7461_v46 = vmax.f32 %v7809_v18, 0.0  ;;  %v2684_v50 = vld [vmem:[%s7312_s5 + $0x1f8] sm:$0xff] }
 0x346   : > { %3140 = vmatpush.msrb.mxu1 %v2684_v50  ;;  %v7464_v50 = vmax.f32 %v7812_v15, 0.0 }
 0x347   : > { %v2153_v12 = vpop.f32.mrf.mxu2  ;;  %v2230_v5 = vpop.f32.mrf.mxu3  ;;  %3000 = vmatpush.msra.mxu3 %v2719_v14 }
 0x348   : > { %v2154_v3 = vadd.f32 %v2153_v12, %v2077_v49  ;;  %v2327_v13 = vpop.f32.mrf.mxu1  ;;  %3141 = vmatpush.msrb.mxu1 %v2682_v42 }
 0x349   : > { %3001 = vmatpush.msra.mxu3 %v2717_v52  ;;  %v7811_v52 = vld [vmem:[#allocation51_spill] sm:$0xff] }
 0x34a   : > { %v6007_v10 = vadd.f32 %v2230_v5, %v2154_v3  ;;  %v6009_v25 = vpop.f32.mrf.mxu0  ;;  %v2650_v3 = vld [vmem:[%s7312_s5 + $0xe8] sm:$0xff] }
 0x34b   : > { %2374 = vmatmul.f32.gmra.mxu1 %v7760_v17  ;;  %3064 = vmatpush.msra.mxu0 %v2650_v3  ;;  %v2648_v3 = vld [vmem:[%s7312_s5 + $0xd8] sm:$0xff] }
 0x34c   : > { %2451 = vmatmul.f32.gmra.mxu2 %v7698_v48  ;;  %2528 = vmatmul.f32.gmra.mxu3 %v7699_v51  ;;  %v7810_v51 = vld [vmem:[#allocation63_spill] sm:$0xff] }
 0x34d   : > { %2786 = vmatmul.f32.gmra.mxu0 %v7461_v46  ;;  %v7460_v5 = vmax.f32 %v7810_v51, 0.0 }
 0x34e   : > { %3065 = vmatpush.msra.mxu0 %v2648_v3 }
 0x34f   : > { %v2404_v17 = vpop.f32.mrf.mxu2  ;;  %v2481_v49 = vpop.f32.mrf.mxu3 }
 0x350   : > { %v2330_v12 = vpop.f32.mrf.mxu1 }
 0x352   : > { %v6029_v48 = vpop.f32.mrf.mxu0 }
 0x353   : > { %2377 = vmatmul.f32.gmra.mxu1 %v5184_v7 }
 0x354   : > { %2454 = vmatmul.f32.gmra.mxu2 %v5188_v29  ;;  %2531 = vmatmul.f32.gmra.mxu3 %v5182_v62  ;;  %v6044_v29 = vperm.slane %v7811_v52, 3 }
 0x355   : > { %2789 = vmatmul.f32.gmra.mxu0 %v7460_v5 }
 0x356   : > { %v2251_v42 = vadd.f32 %v5828_v58, %v6044_v29  ;;  %v2680_v58 = vld [vmem:[%s7312_s5 + $0x1d8] sm:$0xff] }
 0x357   : > { %v2407_v14 = vpop.f32.mrf.mxu2  ;;  %v2484_v37 = vpop.f32.mrf.mxu3  ;;  %3142 = vmatpush.msrb.mxu1 %v2680_v58 }
 0x358   : > { %v2333_v7 = vpop.f32.mrf.mxu1  ;;  %v2328_v46 = vadd.f32 %v2327_v13, %v2251_v42  ;;  %v2716_v13 = vld [vmem:[%s7312_s5 + $0x2f8] sm:$0xff] }
 0x359   : > { %3217 = vmatpush.msrb.mxu2 %v2716_v13  ;;  %v2746_v13 = vld [vmem:[%s7312_s5 + $0x3e8] sm:$0xff] }
 0x35a   : > { %v6046_v62 = vpop.f32.mrf.mxu0 }
 0x35b   : > { %2380 = vmatmul.f32.gmra.mxu1 %v5205_v38  ;;  %v2405_v38 = vadd.f32 %v2404_v17, %v2328_v46  ;;  %v2748_v46 = vld [vmem:[%s7312_s5 + $0x3f8] sm:$0xff] }
 0x35c   : > { %2457 = vmatmul.f32.gmra.mxu2 %v5209_v35  ;;  %2534 = vmatmul.f32.gmra.mxu3 %v5203_v28  ;;  %v7813_v28 = vld [vmem:[#allocation65_spill] sm:$0xff] }
 0x35d   : > { %2792 = vmatmul.f32.gmra.mxu0 %v7464_v50  ;;  %v7467_v21 = vmax.f32 %v7813_v28, 0.0  ;;  %3294 = vmatpush.msrb.mxu3 %v2748_v46  ;;  %v7815_v50 = vld [vmem:[#allocation56_spill] sm:$0xff]  ;;  %v2257_v46 = vadd.f32 %v5869_v27, %v6044_v29  ;;  %v7819_v27 = vld [vmem:[#allocation19_spill] sm:$0xff] }
 0x35e   : > { %v7471_v56 = vmax.f32 %v7815_v50, 0.0 }
 0x35f   : > { %v2410_v52 = vpop.f32.mrf.mxu2  ;;  %v2487_v5 = vpop.f32.mrf.mxu3  ;;  %3295 = vmatpush.msrb.mxu3 %v2746_v13 }
 0x360   : > { %v6059_v44 = vpop.f32.mrf.mxu1 }
 0x362   : > { %v6061_v35 = vpop.f32.mrf.mxu0 }
 0x363   : > { %2383 = vmatmul.f32.gmra.mxu1 %v5226_v45  ;;  %v2254_v45 = vadd.f32 %v5853_v6, %v6044_v29  ;;  %v7816_v6 = vld [vmem:[#allocation17_spill] sm:$0xff] }
 0x364   : > { %2460 = vmatmul.f32.gmra.mxu2 %v5230_v31  ;;  %2537 = vmatmul.f32.gmra.mxu3 %v5224_v36  ;;  %v6080_v36 = vadd.f32 %v2481_v49, %v2405_v38  ;;  %v7472_v49 = vmax.f32 %v7816_v6, 0.0  ;;  %v2714_v38 = vld [vmem:[%s7312_s5 + $0x2e8] sm:$0xff]  ;;  %v7478_v6 = vmax.f32 %v5643_v60, 0.0 }
 0x365   : > { %2795 = vmatmul.f32.gmra.mxu0 %v7467_v21  ;;  %v2331_v3 = vadd.f32 %v2330_v12, %v2254_v45  ;;  %v2646_v12 = vld [vmem:[%s7312_s5 + $0xc8] sm:$0xff]  ;;  %3218 = vmatpush.msrb.mxu2 %v2714_v38 }
 0x366   : > { %7814 = vst [vmem:[#allocation21_spill] sm:$0xff] %v6080_v36  ;;  %v7469_v21 = vmax.f32 %v6080_v36, 0.0  ;;  %3066 = vmatpush.msra.mxu0 %v2646_v12 }
 0x367   : > { %v2413_v31 = vpop.f32.mrf.mxu2  ;;  %v6082_v17 = vpop.f32.mrf.mxu3  ;;  %v2408_v58 = vadd.f32 %v2407_v14, %v2331_v3  ;;  %v2678_v14 = vld [vmem:[%s7312_s5 + $0x1c8] sm:$0xff] }
 0x368   : > { %v6084_v42 = vpop.f32.mrf.mxu1  ;;  %3143 = vmatpush.msrb.mxu1 %v2678_v14 }
 0x369   : > { %v6114_v45 = vadd.f32 %v2484_v37, %v2408_v58  ;;  %v7479_v37 = vmax.f32 %v7819_v27, 0.0  ;;  %v2260_v58 = vadd.f32 %v5888_v8, %v6044_v29  ;;  %v7822_v8 = vld [vmem:[#allocation66_spill] sm:$0xff] }
 0x36a   : > { %v6089_v28 = vpop.f32.mrf.mxu0 }
 0x36b   : > { %2848 = vmatmul.f32.vlgmr.msra.gmra.mxu1 %v7471_v56  ;;  %7817 = vst [vmem:[#allocation23_spill] sm:$0xff] %v6114_v45  ;;  %v7477_v36 = vmax.f32 %v6114_v45, 0.0 }
 0x36c   : > { %2925 = vmatmul.f32.vlgmr.msra.gmra.mxu2 %v7470_v59  ;;  %3002 = vmatmul.f32.vlgmr.msra.gmra.mxu3 %v7469_v21  ;;  %v2334_v59 = vadd.f32 %v2333_v7, %v2257_v46  ;;  %v2644_v7 = vld [vmem:[%s7312_s5 + $0xb8] sm:$0xff]  ;;  %v2337_v46 = vadd.f32 %v6059_v44, %v2260_v58 }
 0x36d   : > { %2798 = vmatmul.f32.gmra.mxu0 %v7472_v49  ;;  %v7818_v49 = vld [vmem:[#allocation54_spill] sm:$0xff]  ;;  %v2744_v44 = vld [vmem:[%s7312_s5 + $0x3d8] sm:$0xff] }
 0x36e   : > { %v7480_v14 = vmax.f32 %v7818_v49, 0.0  ;;  %v2411_v4 = vadd.f32 %v2410_v52, %v2334_v59  ;;  %v2676_v59 = vld [vmem:[%s7312_s5 + $0x1b8] sm:$0xff]  ;;  %3067 = vmatpush.msra.mxu0 %v2644_v7  ;;  %v2414_v27 = vadd.f32 %v2413_v31, %v2337_v46  ;;  %3296 = vmatpush.msrb.mxu3 %v2744_v44  ;;  %v2674_v31 = vld [vmem:[%s7312_s5 + $0x1a8] sm:$0xff]  ;;  %v2263_v7 = vadd.f32 %v5907_v19, %v6044_v29 }
 0x36f   : > { %v2416_v3 = vpop.f32.mrf.mxu2  ;;  %v6116_v21 = vpop.f32.mrf.mxu3  ;;  %3144 = vmatpush.msrb.mxu1 %v2676_v59  ;;  %v2712_v52 = vld [vmem:[%s7312_s5 + $0x2d8] sm:$0xff]  ;;  %v7484_v59 = vmax.f32 %v5656_v2, 0.0  ;;  %v7824_v44 = vld [vmem:[#allocation74_spill] sm:$0xff] }
 0x370   : > { %v6118_v56 = vpop.f32.mrf.mxu1  ;;  %v6145_v12 = vadd.f32 %v2487_v5, %v2411_v4  ;;  %3219 = vmatpush.msrb.mxu2 %v2712_v52  ;;  %v7485_v4 = vmax.f32 %v7822_v8, 0.0  ;;  %v2642_v5 = vld [vmem:[%s7312_s5 + $0xa8] sm:$0xff]  ;;  %v6176_v52 = vadd.f32 %v6082_v17, %v2414_v27  ;;  %v7825_v17 = vld [vmem:[#allocation67_spill] sm:$0xff] }
 0x371   : > { %3068 = vmatpush.msra.mxu0 %v2642_v5  ;;  %3145 = vmatpush.msrb.mxu1 %v2674_v31  ;;  %v7492_v27 = vmax.f32 %v7825_v17, 0.0  ;;  %v2266_v5 = vadd.f32 %v5925_v47, %v6044_v29  ;;  %v7497_v17 = vmax.f32 %v5697_v24, 0.0 }
 0x372   : > { %v6123_v50 = vpop.f32.mrf.mxu0  ;;  %7820 = vst [vmem:[#allocation24_spill] sm:$0xff] %v6145_v12  ;;  %v7489_v8 = vmax.f32 %v6176_v52, 0.0 }
 0x373   : > { %2851 = vmatmul.f32.gmra.mxu1 %v7480_v14  ;;  %v7483_v14 = vmax.f32 %v6145_v12, 0.0  ;;  %7823 = vst [vmem:[#allocation22_spill] sm:$0xff] %v6176_v52 }
 0x374   : > { %2928 = vmatmul.f32.gmra.mxu2 %v7478_v6  ;;  %3005 = vmatmul.f32.gmra.mxu3 %v7477_v36  ;;  %v7821_v6 = vld [vmem:[#allocation14_spill] sm:$0xff] }
 0x375   : > { %2801 = vmatmul.f32.gmra.mxu0 %v7479_v37  ;;  %v7486_v37 = vmax.f32 %v7821_v6, 0.0 }
 0x377   : > { %v2419_v38 = vpop.f32.mrf.mxu2  ;;  %v2496_v13 = vpop.f32.mrf.mxu3 }
 0x378   : > { %v6148_v36 = vpop.f32.mrf.mxu1 }
 0x37a   : > { %v6153_v45 = vpop.f32.mrf.mxu0 }
 0x37b   : > { %2854 = vmatmul.f32.gmra.mxu1 %v7486_v37  ;;  %v7490_v37 = vmax.f32 %v5675_v63, 0.0 }
 0x37c   : > { %2931 = vmatmul.f32.gmra.mxu2 %v7484_v59  ;;  %3008 = vmatmul.f32.gmra.mxu3 %v7483_v14  ;;  %v2340_v14 = vadd.f32 %v6084_v42, %v2263_v7  ;;  %v2710_v42 = vld [vmem:[%s7312_s5 + $0x2c8] sm:$0xff] }
 0x37d   : > { %2804 = vmatmul.f32.gmra.mxu0 %v7485_v4  ;;  %v7491_v4 = vmax.f32 %v7824_v44, 0.0  ;;  %3220 = vmatpush.msrb.mxu2 %v2710_v42  ;;  %v7827_v42 = vld [vmem:[#allocation75_spill] sm:$0xff] }
 0x37e   : > { %v2417_v12 = vadd.f32 %v2416_v3, %v2340_v14  ;;  %v2742_v3 = vld [vmem:[%s7312_s5 + $0x3c8] sm:$0xff]  ;;  %v2640_v14 = vld [vmem:[%s7312_s5 + $0x98] sm:$0xff] }
 0x37f   : > { %v2422_v58 = vpop.f32.mrf.mxu2  ;;  %v6178_v46 = vpop.f32.mrf.mxu3  ;;  %3297 = vmatpush.msrb.mxu3 %v2742_v3  ;;  %3069 = vmatpush.msra.mxu0 %v2640_v14  ;;  %v2269_v3 = vadd.f32 %v5943_v61, %v6044_v29 }
 0x380   : > { %v6181_v59 = vpop.f32.mrf.mxu1  ;;  %v6209_v31 = vadd.f32 %v6116_v21, %v2417_v12  ;;  %v7828_v21 = vld [vmem:[#allocation68_spill] sm:$0xff] }
 0x381   : > { %v7502_v12 = vmax.f32 %v7828_v21, 0.0  ;;  %v7505_v21 = vmax.f32 %v5716_v16, 0.0 }
 0x382   : > { %v6186_v19 = vpop.f32.mrf.mxu0  ;;  %7826 = vst [vmem:[#allocation25_spill] sm:$0xff] %v6209_v31  ;;  %v7496_v52 = vmax.f32 %v6209_v31, 0.0  ;;  %v7830_v31 = vld [vmem:[#allocation76_spill] sm:$0xff] }
 0x383   : > { %2857 = vmatmul.f32.gmra.mxu1 %v7491_v4  ;;  %v7507_v24 = vmax.f32 %v7830_v31, 0.0 }
 0x384   : > { %2934 = vmatmul.f32.gmra.mxu2 %v7490_v37  ;;  %3011 = vmatmul.f32.gmra.mxu3 %v7489_v8  ;;  %v2343_v37 = vadd.f32 %v6118_v56, %v2266_v5  ;;  %v2672_v56 = vld [vmem:[%s7312_s5 + $0x198] sm:$0xff] }
 0x385   : > { %2807 = vmatmul.f32.gmra.mxu0 %v7492_v27  ;;  %v7498_v27 = vmax.f32 %v7827_v42, 0.0  ;;  %3146 = vmatpush.msrb.mxu1 %v2672_v56 }
 0x386   : > { %v2420_v63 = vadd.f32 %v2419_v38, %v2343_v37  ;;  %v2708_v37 = vld [vmem:[%s7312_s5 + $0x2b8] sm:$0xff] }
 0x387   : > { %v2425_v7 = vpop.f32.mrf.mxu2  ;;  %v6211_v8 = vpop.f32.mrf.mxu3  ;;  %v2740_v38 = vld [vmem:[%s7312_s5 + $0x3b8] sm:$0xff]  ;;  %3221 = vmatpush.msrb.mxu2 %v2708_v37  ;;  %v2272_v37 = vadd.f32 %v5961_v20, %v6044_v29  ;;  %v2634_v20 = vld [vmem:[%s7312_s5 + $0x68] sm:$0xff] }
 0x388   : > { %v6214_v4 = vpop.f32.mrf.mxu1  ;;  %v6241_v14 = vadd.f32 %v2496_v13, %v2420_v63  ;;  %3298 = vmatpush.msrb.mxu3 %v2740_v38  ;;  %v7831_v63 = vld [vmem:[#allocation69_spill] sm:$0xff]  ;;  %v2670_v13 = vld [vmem:[%s7312_s5 + $0x188] sm:$0xff] }
 0x389   : > { %v7506_v61 = vmax.f32 %v7831_v63, 0.0  ;;  %3147 = vmatpush.msrb.mxu1 %v2670_v13  ;;  %v2349_v13 = vadd.f32 %v6181_v59, %v2272_v37  ;;  %v2632_v59 = vld [vmem:[%s7312_s5 + $0x58] sm:$0xff]  ;;  %v2630_v37 = vld [vmem:[%s7312_s5 + $0x48] sm:$0xff] }
 0x38a   : > { %v6219_v47 = vpop.f32.mrf.mxu0  ;;  %7829 = vst [vmem:[#allocation27_spill] sm:$0xff] %v6241_v14  ;;  %v7504_v56 = vmax.f32 %v6241_v14, 0.0 }
 0x38b   : > { %2860 = vmatmul.f32.gmra.mxu1 %v7498_v27 }
 0x38c   : > { %2937 = vmatmul.f32.gmra.mxu2 %v7497_v17  ;;  %3014 = vmatmul.f32.gmra.mxu3 %v7496_v52  ;;  %v2346_v17 = vadd.f32 %v6148_v36, %v2269_v3  ;;  %v2638_v36 = vld [vmem:[%s7312_s5 + $0x88] sm:$0xff]  ;;  %v2636_v3 = vld [vmem:[%s7312_s5 + $0x78] sm:$0xff] }
 0x38d   : > { %2810 = vmatmul.f32.gmra.mxu0 %v7502_v12 }
 0x38e   : > { %v2423_v12 = vadd.f32 %v2422_v58, %v2346_v17  ;;  %v2706_v58 = vld [vmem:[%s7312_s5 + $0x2a8] sm:$0xff]  ;;  %3070 = vmatpush.msra.mxu0 %v2638_v36  ;;  %v7511_v36 = vmax.f32 %v5735_v32, 0.0 }
 0x38f   : > { %v2428_v5 = vpop.f32.mrf.mxu2  ;;  %v6243_v52 = vpop.f32.mrf.mxu3  ;;  %v2738_v17 = vld [vmem:[%s7312_s5 + $0x3a8] sm:$0xff]  ;;  %3222 = vmatpush.msrb.mxu2 %v2706_v58 }
 0x390   : > { %v6246_v27 = vpop.f32.mrf.mxu1  ;;  %v6277_v38 = vadd.f32 %v6178_v46, %v2423_v12  ;;  %3299 = vmatpush.msrb.mxu3 %v2738_v17  ;;  %3071 = vmatpush.msra.mxu0 %v2636_v3  ;;  %v7833_v46 = vld [vmem:[#allocation77_spill] sm:$0xff]  ;;  %v7834_v17 = vld [vmem:[#allocation70_spill] sm:$0xff]  ;;  %v2704_v3 = vld [vmem:[%s7312_s5 + $0x298] sm:$0xff] }
 0x391   : > { %v7513_v12 = vmax.f32 %v7833_v46, 0.0  ;;  %v7512_v14 = vmax.f32 %v7834_v17, 0.0  ;;  %3223 = vmatpush.msrb.mxu2 %v2704_v3  ;;  %v7836_v17 = vld [vmem:[#allocation78_spill] sm:$0xff]  ;;  %v7837_v3 = vld [vmem:[#allocation71_spill] sm:$0xff] }
 0x392   : > { %v6251_v42 = vpop.f32.mrf.mxu0  ;;  %7832 = vst [vmem:[#allocation28_spill] sm:$0xff] %v6277_v38  ;;  %v7510_v58 = vmax.f32 %v6277_v38, 0.0  ;;  %3072 = vmatpush.msra.mxu0 %v2634_v20  ;;  %v7520_v38 = vmax.f32 %v7836_v17, 0.0  ;;  %v7519_v32 = vmax.f32 %v7837_v3, 0.0  ;;  %v7839_v3 = vld [vmem:[#allocation79_spill] sm:$0xff] }
 0x393   : > { %2863 = vmatmul.f32.gmra.mxu1 %v7507_v24  ;;  %v2426_v24 = vadd.f32 %v2425_v7, %v2349_v13  ;;  %v2668_v7 = vld [vmem:[%s7312_s5 + $0x178] sm:$0xff]  ;;  %v2275_v13 = vadd.f32 %v5982_v41, %v6044_v29  ;;  %v7518_v41 = vmax.f32 %v5754_v23, 0.0 }
 0x394   : > { %2940 = vmatmul.f32.gmra.mxu2 %v7505_v21  ;;  %3017 = vmatmul.f32.gmra.mxu3 %v7504_v56 }
 0x395   : > { %2813 = vmatmul.f32.gmra.mxu0 %v7506_v61  ;;  %3148 = vmatpush.msrb.mxu1 %v2668_v7  ;;  %v6319_v20 = vadd.f32 %v6211_v8, %v2426_v24  ;;  %v2628_v7 = vld [vmem:[%s7312_s5 + $0x38] sm:$0xff] }
 0x396   : > { %3073 = vmatpush.msra.mxu0 %v2632_v59 }
 0x397   : > { %v2431_v56 = vpop.f32.mrf.mxu2  ;;  %v6282_v21 = vpop.f32.mrf.mxu3  ;;  %7835 = vst [vmem:[#allocation26_spill] sm:$0xff] %v6319_v20  ;;  %v7517_v24 = vmax.f32 %v6319_v20, 0.0  ;;  %v7526_v20 = vmax.f32 %v7839_v3, 0.0  ;;  %v7843_v3 = vld [vmem:[#allocation73_spill] sm:$0xff] }
 0x398   : > { %v6285_v61 = vpop.f32.mrf.mxu1  ;;  %3074 = vmatpush.msra.mxu0 %v2630_v37  ;;  %v2666_v37 = vld [vmem:[%s7312_s5 + $0x168] sm:$0xff] }
 0x399   : > { %3149 = vmatpush.msrb.mxu1 %v2666_v37  ;;  %v7840_v37 = vld [vmem:[#allocation72_spill] sm:$0xff] }
 0x39a   : > { %v6293_v63 = vpop.f32.mrf.mxu0  ;;  %3075 = vmatpush.msra.mxu0 %v2628_v7  ;;  %v7530_v23 = vmax.f32 %v7840_v37, 0.0 }
 0x39b   : > { %2866 = vmatmul.f32.gmra.mxu1 %v7513_v12 }
 0x39c   : > { %2943 = vmatmul.f32.gmra.mxu2 %v7511_v36  ;;  %3020 = vmatmul.f32.gmra.mxu3 %v7510_v58 }
 0x39d   : > { %2816 = vmatmul.f32.gmra.mxu0 %v7512_v14  ;;  %v2352_v14 = vadd.f32 %v6214_v4, %v2275_v13  ;;  %v2626_v4 = vld [vmem:[%s7312_s5 + $0x28] sm:$0xff]  ;;  %v2278_v13 = vadd.f32 %v6009_v25, %v6044_v29  ;;  %v7525_v25 = vmax.f32 %v5773_v26, 0.0  ;;  %v7533_v26 = vmax.f32 %v5801_v43, 0.0 }
 0x39e   : > { %3076 = vmatpush.msra.mxu0 %v2626_v4  ;;  %v7541_v43 = vmax.f32 %v5826_v34, 0.0 }
 0x39f   : > { %v2434_v58 = vpop.f32.mrf.mxu2  ;;  %v6321_v36 = vpop.f32.mrf.mxu3  ;;  %v2429_v8 = vadd.f32 %v2428_v5, %v2352_v14  ;;  %v2736_v14 = vld [vmem:[%s7312_s5 + $0x398] sm:$0xff] }
 0x3a0   : > { %v6327_v12 = vpop.f32.mrf.mxu1  ;;  %3300 = vmatpush.msrb.mxu3 %v2736_v14  ;;  %v2624_v5 = vld [vmem:[%s7312_s5 + $0x18] sm:$0xff]  ;;  %v2622_v14 = vld [vmem:[%s7312_s5 + $0x8] sm:$0xff] }
 0x3a1   : > { %v6358_v7 = vadd.f32 %v6243_v52, %v2429_v8  ;;  %3077 = vmatpush.msra.mxu0 %v2624_v5 }
 0x3a2   : > { %v6332_v59 = vpop.f32.mrf.mxu0 }
 0x3a3   : > { %2869 = vmatmul.f32.gmra.mxu1 %v7520_v38  ;;  %7838 = vst [vmem:[#allocation29_spill] sm:$0xff] %v6358_v7  ;;  %v7524_v52 = vmax.f32 %v6358_v7, 0.0  ;;  %3078 = vmatpush.msra.mxu0 %v2622_v14 }
 0x3a4   : > { %2946 = vmatmul.f32.gmra.mxu2 %v7518_v41  ;;  %3023 = vmatmul.f32.gmra.mxu3 %v7517_v24 }
 0x3a5   : > { %2819 = vmatmul.f32.gmra.mxu0 %v7519_v32  ;;  %v2355_v32 = vadd.f32 %v6246_v27, %v2278_v13  ;;  %v2702_v27 = vld [vmem:[%s7312_s5 + $0x288] sm:$0xff] }
 0x3a6   : > { %3224 = vmatpush.msrb.mxu2 %v2702_v27 }
 0x3a7   : > { %v2437_v24 = vpop.f32.mrf.mxu2  ;;  %v6360_v41 = vpop.f32.mrf.mxu3  ;;  %v2432_v8 = vadd.f32 %v2431_v56, %v2355_v32  ;;  %v2734_v32 = vld [vmem:[%s7312_s5 + $0x388] sm:$0xff]  ;;  %v2281_v56 = vadd.f32 %v6029_v48, %v6044_v29  ;;  %v7537_v48 = vmax.f32 %v7843_v3, 0.0 }
 0x3a8   : > { %v6366_v38 = vpop.f32.mrf.mxu1  ;;  %3301 = vmatpush.msrb.mxu3 %v2734_v32 }
 0x3a9   : > { %v6391_v5 = vadd.f32 %v6282_v21, %v2432_v8  ;;  %v2664_v21 = vld [vmem:[%s7312_s5 + $0x158] sm:$0xff] }
 0x3aa   : > { %v6371_v4 = vpop.f32.mrf.mxu0  ;;  %3150 = vmatpush.msrb.mxu1 %v2664_v21 }
 0x3ab   : > { %2872 = vmatmul.f32.gmra.mxu1 %v7526_v20  ;;  %7841 = vst [vmem:[#allocation31_spill] sm:$0xff] %v6391_v5  ;;  %v7842_v20 = vld [vmem:[#allocation80_spill] sm:$0xff]  ;;  %v7532_v37 = vmax.f32 %v6391_v5, 0.0 }
 0x3ac   : > { %2949 = vmatmul.f32.gmra.mxu2 %v7525_v25  ;;  %3026 = vmatmul.f32.gmra.mxu3 %v7524_v52  ;;  %v2358_v52 = vadd.f32 %v6285_v61, %v2281_v56  ;;  %v7534_v7 = vmax.f32 %v7842_v20, 0.0  ;;  %v2700_v61 = vld [vmem:[%s7312_s5 + $0x278] sm:$0xff] }
 0x3ad   : > { %2822 = vmatmul.f32.gmra.mxu0 %v7530_v23  ;;  %3225 = vmatpush.msrb.mxu2 %v2700_v61 }
 0x3ae   : > { %v2435_v23 = vadd.f32 %v2434_v58, %v2358_v52  ;;  %v2732_v58 = vld [vmem:[%s7312_s5 + $0x378] sm:$0xff]  ;;  %v2284_v52 = vadd.f32 %v6046_v62, %v6044_v29  ;;  %v7846_v62 = vld [vmem:[#allocation53_spill] sm:$0xff] }
 0x3af   : > { %v2440_v13 = vpop.f32.mrf.mxu2  ;;  %v2517_v14 = vpop.f32.mrf.mxu3  ;;  %3302 = vmatpush.msrb.mxu3 %v2732_v58  ;;  %v7542_v20 = vmax.f32 %v7846_v62, 0.0 }
 0x3b0   : > { %v2366_v25 = vpop.f32.mrf.mxu1  ;;  %v6420_v8 = vadd.f32 %v6321_v36, %v2435_v23  ;;  %v2662_v23 = vld [vmem:[%s7312_s5 + $0x148] sm:$0xff] }
 0x3b1   : > { %3151 = vmatpush.msrb.mxu1 %v2662_v23  ;;  %v2730_v36 = vld [vmem:[%s7312_s5 + $0x368] sm:$0xff]  ;;  %v7547_v23 = vmax.f32 %v5851_v11, 0.0 }
 0x3b2   : > { %v6397_v27 = vpop.f32.mrf.mxu0  ;;  %7844 = vst [vmem:[#allocation32_spill] sm:$0xff] %v6420_v8  ;;  %3303 = vmatpush.msrb.mxu3 %v2730_v36 }
 0x3b3   : > { %2875 = vmatmul.f32.gmra.mxu1 %v7534_v7  ;;  %v7845_v7 = vld [vmem:[#allocation81_spill] sm:$0xff] }
 0x3b4   : > { %2952 = vmatmul.f32.gmra.mxu2 %v7533_v26  ;;  %3029 = vmatmul.f32.gmra.mxu3 %v7532_v37  ;;  %v2361_v37 = vadd.f32 %v6327_v12, %v2284_v52  ;;  %v7543_v5 = vmax.f32 %v7845_v7, 0.0  ;;  %v2698_v12 = vld [vmem:[%s7312_s5 + $0x268] sm:$0xff] }
 0x3b5   : > { %2825 = vmatmul.f32.gmra.mxu0 %v7537_v48  ;;  %v7540_v48 = vmax.f32 %v6420_v8, 0.0  ;;  %3226 = vmatpush.msrb.mxu2 %v2698_v12 }
 0x3b6   : > { %v2438_v21 = vadd.f32 %v2437_v24, %v2361_v37  ;;  %v2287_v24 = vadd.f32 %v6061_v35, %v6044_v29  ;;  %v2660_v35 = vld [vmem:[%s7312_s5 + $0x138] sm:$0xff] }
 0x3b7   : > { %v2443_v32 = vpop.f32.mrf.mxu2  ;;  %v2520_v56 = vpop.f32.mrf.mxu3  ;;  %3152 = vmatpush.msrb.mxu1 %v2660_v35 }
 0x3b8   : > { %v2369_v26 = vpop.f32.mrf.mxu1  ;;  %v6449_v37 = vadd.f32 %v6360_v41, %v2438_v21  ;;  %v2364_v52 = vadd.f32 %v6366_v38, %v2287_v24  ;;  %v7848_v38 = vmax.f32 %v7790_v54, 0.0  ;;  %v2696_v41 = vld [vmem:[%s7312_s5 + $0x258] sm:$0xff]  ;;  %v7550_v54 = vmax.f32 %v5867_v1, 0.0 }
 0x3b9   : > { %3227 = vmatpush.msrb.mxu2 %v2696_v41 }
 0x3ba   : > { %v6426_v3 = vpop.f32.mrf.mxu0  ;;  %v2441_v62 = vadd.f32 %v2440_v13, %v2364_v52  ;;  %v2290_v13 = vadd.f32 %v6089_v28, %v6044_v29  ;;  %v2728_v28 = vld [vmem:[%s7312_s5 + $0x358] sm:$0xff] }
 0x3bb   : > { %2878 = vmatmul.f32.gmra.mxu1 %v7543_v5  ;;  %v7546_v5 = vmax.f32 %v6449_v37, 0.0  ;;  %3304 = vmatpush.msrb.mxu3 %v2728_v28 }
 0x3bc   : > { %2955 = vmatmul.f32.gmra.mxu2 %v7541_v43  ;;  %3032 = vmatmul.f32.gmra.mxu3 %v7540_v48  ;;  %v7847_v43 = vld [vmem:[#allocation82_spill] sm:$0xff]  ;;  %v6473_v21 = vadd.f32 %v2517_v14, %v2441_v62  ;;  %v2367_v24 = vadd.f32 %v2366_v25, %v2290_v13  ;;  %v7851_v25 = vmax.f32 %v7794_v53, 0.0  ;;  %v7554_v53 = vmax.f32 %v5886_v57, 0.0 }
 0x3bd   : > { %2828 = vmatmul.f32.gmra.mxu0 %v7542_v20  ;;  %v7548_v20 = vmax.f32 %v7847_v43, 0.0  ;;  %v2658_v14 = vld [vmem:[%s7312_s5 + $0x128] sm:$0xff] }
 0x3be   : > { %7849 = vst [vmem:[#allocation30_spill] sm:$0xff] %v6473_v21  ;;  %v7549_v35 = vmax.f32 %v6473_v21, 0.0  ;;  %3153 = vmatpush.msrb.mxu1 %v2658_v14 }
 0x3bf   : > { %v2446_v61 = vpop.f32.mrf.mxu2  ;;  %v2523_v58 = vpop.f32.mrf.mxu3 }
 0x3c0   : > { %v2372_v48 = vpop.f32.mrf.mxu1 }
 0x3c2   : > { %v6455_v8 = vpop.f32.mrf.mxu0 }
 0x3c3   : > { %2881 = vmatmul.f32.gmra.mxu1 %v7548_v20 }
 0x3c4   : > { %2958 = vmatmul.f32.gmra.mxu2 %v7547_v23  ;;  %3035 = vmatmul.f32.gmra.mxu3 %v7546_v5  ;;  %v7850_v5 = vld [vmem:[#allocation83_spill] sm:$0xff] }
 0x3c5   : > { %3079 = vmatmul.f32.vlgmr.msra.gmra.mxu0 %v7848_v38  ;;  %v7551_v23 = vmax.f32 %v7850_v5, 0.0  ;;  %v2444_v38 = vadd.f32 %v2443_v32, %v2367_v24  ;;  %v2293_v32 = vadd.f32 %v6123_v50, %v6044_v29  ;;  %v2726_v50 = vld [vmem:[%s7312_s5 + $0x348] sm:$0xff] }
 0x3c6   : > { %3305 = vmatpush.msrb.mxu3 %v2726_v50 }
 0x3c7   : > { %v2449_v12 = vpop.f32.mrf.mxu2  ;;  %v2526_v36 = vpop.f32.mrf.mxu3  ;;  %v6496_v62 = vadd.f32 %v2520_v56, %v2444_v38  ;;  %v2370_v24 = vadd.f32 %v2369_v26, %v2293_v32  ;;  %v2694_v26 = vld [vmem:[%s7312_s5 + $0x248] sm:$0xff]  ;;  %v7854_v56 = vmax.f32 %v7799_v0, 0.0 }
 0x3c8   : > { %v2375_v52 = vpop.f32.mrf.mxu1  ;;  %3228 = vmatpush.msrb.mxu2 %v2694_v26 }
 0x3c9   : > { %7852 = vst [vmem:[#allocation33_spill] sm:$0xff] %v6496_v62  ;;  %v7553_v28 = vmax.f32 %v6496_v62, 0.0  ;;  %v7558_v62 = vmax.f32 %v5905_v39, 0.0  ;;  %v7563_v39 = vmax.f32 %v5923_v9, 0.0 }
 0x3ca   : > { %v6478_v20 = vpop.f32.mrf.mxu0 }
 0x3cb   : > { %2884 = vmatmul.f32.gmra.mxu1 %v7551_v23 }
 0x3cc   : > { %2961 = vmatmul.f32.gmra.mxu2 %v7550_v54  ;;  %3038 = vmatmul.f32.gmra.mxu3 %v7549_v35  ;;  %v7853_v54 = vld [vmem:[#allocation84_spill] sm:$0xff] }
 0x3cd   : > { %3082 = vmatmul.f32.gmra.mxu0 %v7851_v25  ;;  %v7555_v23 = vmax.f32 %v7853_v54, 0.0  ;;  %v2447_v25 = vadd.f32 %v2446_v61, %v2370_v24  ;;  %v2296_v61 = vadd.f32 %v6153_v45, %v6044_v29  ;;  %v2656_v45 = vld [vmem:[%s7312_s5 + $0x118] sm:$0xff] }
 0x3ce   : > { %3154 = vmatpush.msrb.mxu1 %v2656_v45 }
 0x3cf   : > { %v2452_v41 = vpop.f32.mrf.mxu2  ;;  %v2529_v13 = vpop.f32.mrf.mxu3  ;;  %v6519_v38 = vadd.f32 %v2523_v58, %v2447_v25  ;;  %v2373_v24 = vadd.f32 %v2372_v48, %v2296_v61  ;;  %v2692_v48 = vld [vmem:[%s7312_s5 + $0x238] sm:$0xff]  ;;  %v2299_v25 = vadd.f32 %v6186_v19, %v6044_v29  ;;  %v2654_v19 = vld [vmem:[%s7312_s5 + $0x108] sm:$0xff] }
 0x3d0   : > { %v2378_v35 = vpop.f32.mrf.mxu1  ;;  %v2724_v58 = vld [vmem:[%s7312_s5 + $0x338] sm:$0xff]  ;;  %3229 = vmatpush.msrb.mxu2 %v2692_v48  ;;  %3155 = vmatpush.msrb.mxu1 %v2654_v19 }
 0x3d1   : > { %7855 = vst [vmem:[#allocation35_spill] sm:$0xff] %v6519_v38  ;;  %v7557_v0 = vmax.f32 %v6519_v38, 0.0  ;;  %3306 = vmatpush.msrb.mxu3 %v2724_v58  ;;  %v2688_v19 = vld [vmem:[%s7312_s5 + $0x218] sm:$0xff] }
 0x3d2   : > { %v6501_v21 = vpop.f32.mrf.mxu0 }
 0x3d3   : > { %2887 = vmatmul.f32.gmra.mxu1 %v7555_v23 }
 0x3d4   : > { %2964 = vmatmul.f32.gmra.mxu2 %v7554_v53  ;;  %3041 = vmatmul.f32.gmra.mxu3 %v7553_v28  ;;  %v7856_v53 = vld [vmem:[#allocation85_spill] sm:$0xff] }
 0x3d5   : > { %3085 = vmatmul.f32.gmra.mxu0 %v7854_v56  ;;  %v7559_v23 = vmax.f32 %v7856_v53, 0.0  ;;  %v2450_v56 = vadd.f32 %v2449_v12, %v2373_v24  ;;  %v7857_v12 = vmax.f32 %v7803_v40, 0.0 }
 0x3d7   : > { %v2455_v14 = vpop.f32.mrf.mxu2  ;;  %v6521_v32 = vpop.f32.mrf.mxu3  ;;  %v6549_v50 = vadd.f32 %v2526_v36, %v2450_v56  ;;  %v2690_v36 = vld [vmem:[%s7312_s5 + $0x228] sm:$0xff]  ;;  %v2302_v56 = vadd.f32 %v6219_v47, %v6044_v29  ;;  %v2720_v47 = vld [vmem:[%s7312_s5 + $0x318] sm:$0xff] }
 0x3d8   : > { %v6523_v28 = vpop.f32.mrf.mxu1  ;;  %3230 = vmatpush.msrb.mxu2 %v2690_v36  ;;  %v7565_v36 = vmax.f32 %v5941_v22, 0.0 }
 0x3d9   : > { %7858 = vst [vmem:[#allocation36_spill] sm:$0xff] %v6549_v50  ;;  %v7562_v40 = vmax.f32 %v6549_v50, 0.0 }
 0x3da   : > { %v6528_v26 = vpop.f32.mrf.mxu0  ;;  %3231 = vmatpush.msrb.mxu2 %v2688_v19 }
 0x3db   : > { %2890 = vmatmul.f32.gmra.mxu1 %v7559_v23  ;;  %v7859_v23 = vld [vmem:[#allocation9_spill] sm:$0xff] }
 0x3dc   : > { %2967 = vmatmul.f32.gmra.mxu2 %v7558_v62  ;;  %3044 = vmatmul.f32.gmra.mxu3 %v7557_v0  ;;  %v2376_v0 = vadd.f32 %v2375_v52, %v2299_v25  ;;  %v7564_v38 = vmax.f32 %v7859_v23, 0.0  ;;  %v6575_v52 = vld [vmem:[%s7313_s6] sm:$0x3] }
 0x3dd   : > { %3088 = vmatmul.f32.gmra.mxu0 %v7857_v12  ;;  %7860 = vst [vmem:[#allocation34_spill] sm:$0xff] %v6575_v52 }
 0x3de   : > { %v2453_v45 = vadd.f32 %v2452_v41, %v2376_v0  ;;  %v7861_v41 = vmax.f32 %v7807_v33, 0.0  ;;  %v2722_v0 = vld [vmem:[%s7312_s5 + $0x328] sm:$0xff]  ;;  %v2379_v33 = vadd.f32 %v2378_v35, %v2302_v56 }
 0x3df   : > { %v2458_v61 = vpop.f32.mrf.mxu2  ;;  %v6551_v24 = vpop.f32.mrf.mxu3  ;;  %3307 = vmatpush.msrb.mxu3 %v2722_v0  ;;  %v2686_v35 = vld [vmem:[%s7312_s5 + $0x208] sm:$0xff] }
 0x3e0   : > { %v6553_v62 = vpop.f32.mrf.mxu1  ;;  %v6584_v48 = vadd.f32 %v2529_v13, %v2453_v45  ;;  %v7863_v13 = vld [vmem:[#allocation10_spill] sm:$0xff]  ;;  %3232 = vmatpush.msrb.mxu2 %v2686_v35 }
 0x3e1   : > { %v7567_v45 = vmax.f32 %v7863_v13, 0.0  ;;  %3308 = vmatpush.msrb.mxu3 %v2720_v47  ;;  %v2718_v56 = vld [vmem:[%s7312_s5 + $0x308] sm:$0xff]  ;;  %v7864_v47 = vmax.f32 %v7809_v18, 0.0  ;;  %v7865_v13 = vld [vmem:[#allocation11_spill] sm:$0xff]  ;;  %v2611_v18 = vmax.f32 %v5959_v55, 0.0 }
 0x3e2   : > { %v6558_v12 = vpop.f32.mrf.mxu0  ;;  %7862 = vst [vmem:[#allocation37_spill] sm:$0xff] %v6584_v48  ;;  %v7566_v0 = vmax.f32 %v6584_v48, 0.0  ;;  %v2610_v50 = vmax.f32 %v7865_v13, 0.0 }
 0x3e3   : > { %2893 = vmatmul.f32.gmra.mxu1 %v7564_v38  ;;  %3309 = vmatpush.msrb.mxu3 %v2718_v56 }
 0x3e4   : > { %2970 = vmatmul.f32.gmra.mxu2 %v7563_v39  ;;  %3047 = vmatmul.f32.gmra.mxu3 %v7562_v40  ;;  %v6589_v40 = vperm.slane %v6575_v52, 0  ;;  %v2456_v39 = vadd.f32 %v2455_v14, %v2379_v33  ;;  %v3426_v14 = vld [vmem:[%s7314_s7 + $0x78] sm:$0xff] }
 0x3e5   : > { %3091 = vmatmul.f32.gmra.mxu0 %v7861_v41  ;;  %v3442_v33 = vld [vmem:[%s7314_s7 + $0xf8] sm:$0xff] }
 0x3e6   : > { %v2773_v19 = vadd.f32 %v6332_v59, %v6589_v40  ;;  %v2305_v59 = vadd.f32 %v6251_v42, %v6044_v29  ;;  %v6627_v35 = vadd.f32 %v6521_v32, %v2456_v39  ;;  %3447 = vmatpush.msrb.mxu0 %v3426_v14  ;;  %3524 = vmatpush.msra.mxu1 %v3442_v33  ;;  %v7867_v14 = vld [vmem:[#allocation12_spill] sm:$0xff] }
 0x3e7   : > { %v2461_v58 = vpop.f32.mrf.mxu2  ;;  %v6586_v25 = vpop.f32.mrf.mxu3  ;;  %v2776_v32 = vadd.f32 %v6371_v4, %v6589_v40  ;;  %v2308_v4 = vadd.f32 %v6293_v63, %v6044_v29  ;;  %v2614_v33 = vmax.f32 %v7867_v14, 0.0 }
 0x3e8   : > { %v2849_v41 = vpop.f32.mrf.mxu1  ;;  %v2382_v52 = vadd.f32 %v6523_v28, %v2305_v59  ;;  %v7573_v56 = vmax.f32 %v6627_v35, 0.0  ;;  %v3425_v28 = vld [vmem:[%s7314_s7 + $0x70] sm:$0xff]  ;;  %v2615_v59 = vmax.f32 %v5980_v30, 0.0  ;;  %v7979_v30 = vmax.f32 %v6007_v10, 0.0 }
 0x3e9   : > { %3448 = vmatpush.msrb.mxu0 %v3425_v28 }
 0x3ea   : > { %v6600_v38 = vpop.f32.mrf.mxu0 }
 0x3eb   : > { %2896 = vmatmul.f32.gmra.mxu1 %v7567_v45 }
 0x3ec   : > { %2973 = vmatmul.f32.gmra.mxu2 %v7565_v36  ;;  %3050 = vmatmul.f32.gmra.mxu3 %v7566_v0  ;;  %v2850_v36 = vadd.f32 %v2849_v41, %v2773_v19 }
 0x3ed   : > { %3094 = vmatmul.f32.gmra.mxu0 %v7864_v47  ;;  %v2459_v47 = vadd.f32 %v2458_v61, %v2382_v52  ;;  %v7866_v61 = vmax.f32 %v7810_v51, 0.0  ;;  %v3441_v52 = vld [vmem:[%s7314_s7 + $0xf0] sm:$0xff] }
 0x3ee   : > { %3525 = vmatpush.msra.mxu1 %v3441_v52 }
 0x3ef   : > { %v2926_v0 = vpop.f32.mrf.mxu2  ;;  %v3003_v45 = vpop.f32.mrf.mxu3 }
 0x3f0   : > { %v2927_v48 = vadd.f32 %v2926_v0, %v2850_v36  ;;  %v2852_v22 = vpop.f32.mrf.mxu1  ;;  %v2385_v0 = vadd.f32 %v6553_v62, %v2308_v4  ;;  %v7868_v62 = vmax.f32 %v7812_v15, 0.0  ;;  %v7869_v4 = vld [vmem:[#allocation52_spill] sm:$0xff] }
 0x3f1   : > { %v2853_v41 = vadd.f32 %v2852_v22, %v2776_v32  ;;  %v2779_v22 = vadd.f32 %v6397_v27, %v6589_v40  ;;  %v7978_v14 = vmax.f32 %v7869_v4, 0.0 }
 0x3f2   : > { %v6633_v42 = vadd.f32 %v3003_v45, %v2927_v48  ;;  %v6635_v39 = vpop.f32.mrf.mxu0  ;;  %v6656_v48 = vadd.f32 %v6551_v24, %v2459_v47  ;;  %v3424_v24 = vld [vmem:[%s7314_s7 + $0x68] sm:$0xff] }
 0x3f3   : > { %2899 = vmatmul.f32.gmra.mxu1 %v2610_v50  ;;  %3449 = vmatpush.msrb.mxu0 %v3424_v24 }
 0x3f4   : > { %2976 = vmatmul.f32.gmra.mxu2 %v2611_v18  ;;  %3053 = vmatmul.f32.gmra.mxu3 %v7573_v56  ;;  %v2462_v56 = vadd.f32 %v2461_v58, %v2385_v0 }
 0x3f5   : > { %3097 = vmatmul.f32.gmra.mxu0 %v7866_v61  ;;  %v7577_v61 = vmax.f32 %v6656_v48, 0.0 }
 0x3f6   : > { %v6680_v58 = vadd.f32 %v6586_v25, %v2462_v56  ;;  %v2782_v25 = vadd.f32 %v6426_v3, %v6589_v40  ;;  %v3440_v56 = vld [vmem:[%s7314_s7 + $0xe8] sm:$0xff] }
 0x3f7   : > { %v2929_v45 = vpop.f32.mrf.mxu2  ;;  %v3006_v36 = vpop.f32.mrf.mxu3  ;;  %3526 = vmatpush.msra.mxu1 %v3440_v56 }
 0x3f8   : > { %v2930_v19 = vadd.f32 %v2929_v45, %v2853_v41  ;;  %v2855_v51 = vpop.f32.mrf.mxu1  ;;  %v7576_v41 = vmax.f32 %v7869_v4, 0.0  ;;  %v7574_v45 = vmax.f32 %v6007_v10, 0.0  ;;  %v7575_v15 = vmax.f32 %v6680_v58, 0.0 }
 0x3f9   : > { %v2856_v47 = vadd.f32 %v2855_v51, %v2779_v22 }
 0x3fa   : > { %v6662_v29 = vadd.f32 %v3006_v36, %v2930_v19  ;;  %v6664_v63 = vpop.f32.mrf.mxu0  ;;  %v7870_v19 = vld [vmem:[#allocation65_spill] sm:$0xff] }
 0x3fb   : > { %2902 = vmatmul.f32.gmra.mxu1 %v2614_v33  ;;  %v7871_v51 = vmax.f32 %v7870_v19, 0.0  ;;  %v7876_v19 = vld [vmem:[#allocation21_spill] sm:$0xff] }
 0x3fc   : > { %2979 = vmatmul.f32.gmra.mxu2 %v2615_v59  ;;  %3056 = vmatmul.f32.gmra.mxu3 %v7577_v61  ;;  %v7877_v56 = vmax.f32 %v7876_v19, 0.0  ;;  %v2788_v19 = vadd.f32 %v6478_v20, %v6589_v40 }
 0x3fd   : > { %3100 = vmatmul.f32.gmra.mxu0 %v7868_v62 }
 0x3ff   : > { %v2932_v32 = vpop.f32.mrf.mxu2  ;;  %v3009_v27 = vpop.f32.mrf.mxu3 }
 0x400   : > { %v2933_v28 = vadd.f32 %v2932_v32, %v2856_v47  ;;  %v2858_v52 = vpop.f32.mrf.mxu1 }
 0x401   : > { %v2859_v22 = vadd.f32 %v2858_v52, %v2782_v25  ;;  %v3423_v52 = vld [vmem:[%s7314_s7 + $0x60] sm:$0xff] }
 0x402   : > { %v6685_v36 = vadd.f32 %v3009_v27, %v2933_v28  ;;  %v6687_v0 = vpop.f32.mrf.mxu0  ;;  %v7872_v28 = vld [vmem:[#allocation56_spill] sm:$0xff]  ;;  %v3439_v25 = vld [vmem:[%s7314_s7 + $0xe0] sm:$0xff]  ;;  %3450 = vmatpush.msrb.mxu0 %v3423_v52 }
 0x403   : > { %2905 = vmatmul.f32.gmra.mxu1 %v7576_v41  ;;  %v7874_v41 = vld [vmem:[#allocation13_spill] sm:$0xff]  ;;  %v3438_v52 = vld [vmem:[%s7314_s7 + $0xd8] sm:$0xff] }
 0x404   : > { %2982 = vmatmul.f32.gmra.mxu2 %v7574_v45  ;;  %3059 = vmatmul.f32.gmra.mxu3 %v7575_v15  ;;  %v7873_v45 = vmax.f32 %v7872_v28, 0.0  ;;  %v2785_v15 = vadd.f32 %v6455_v8, %v6589_v40  ;;  %v7875_v61 = vmax.f32 %v7874_v41, 0.0  ;;  %v7880_v28 = vmax.f32 %v7818_v49, 0.0 }
 0x405   : > { %3103 = vmatmul.f32.gmra.mxu0 %v7871_v51  ;;  %v7878_v51 = vld [vmem:[#allocation17_spill] sm:$0xff]  ;;  %3527 = vmatpush.msra.mxu1 %v3439_v25  ;;  %v7882_v25 = vld [vmem:[#allocation23_spill] sm:$0xff] }
 0x407   : > { %v2935_v62 = vpop.f32.mrf.mxu2  ;;  %v3012_v24 = vpop.f32.mrf.mxu3  ;;  %3528 = vmatpush.msra.mxu1 %v3438_v52 }
 0x408   : > { %v2936_v47 = vadd.f32 %v2935_v62, %v2859_v22  ;;  %v2861_v32 = vpop.f32.mrf.mxu1  ;;  %v7879_v22 = vmax.f32 %v7878_v51, 0.0  ;;  %v7884_v51 = vld [vmem:[#allocation19_spill] sm:$0xff] }
 0x409   : > { %v7885_v49 = vmax.f32 %v7884_v51, 0.0 }
 0x40a   : > { %v6702_v3 = vadd.f32 %v3012_v24, %v2936_v47  ;;  %v6704_v27 = vpop.f32.mrf.mxu0 }
 0x40b   : > { %3156 = vmatmul.f32.vlgmr.msrb.gmra.mxu1 %v7873_v45  ;;  %v2862_v45 = vadd.f32 %v2861_v32, %v2785_v15  ;;  %v7883_v15 = vmax.f32 %v7882_v25, 0.0  ;;  %v3422_v32 = vld [vmem:[%s7314_s7 + $0x58] sm:$0xff]  ;;  %v7887_v25 = vmax.f32 %v5656_v2, 0.0 }
 0x40c   : > { %3233 = vmatmul.f32.vlgmr.msrb.gmra.mxu2 %v7875_v61  ;;  %3310 = vmatmul.f32.vlgmr.msrb.gmra.mxu3 %v7877_v56  ;;  %v7881_v56 = vmax.f32 %v5643_v60, 0.0 }
 0x40d   : > { %3106 = vmatmul.f32.gmra.mxu0 %v7879_v22 }
 0x40e   : > { %3451 = vmatpush.msrb.mxu0 %v3422_v32  ;;  %v7890_v32 = vld [vmem:[#allocation66_spill] sm:$0xff] }
 0x40f   : > { %v2938_v8 = vpop.f32.mrf.mxu2  ;;  %v3015_v41 = vpop.f32.mrf.mxu3  ;;  %v7891_v52 = vmax.f32 %v7890_v32, 0.0  ;;  %v3420_v32 = vld [vmem:[%s7314_s7 + $0x48] sm:$0xff] }
 0x410   : > { %v2939_v61 = vadd.f32 %v2938_v8, %v2862_v45  ;;  %v2864_v62 = vpop.f32.mrf.mxu1 }
 0x411   : > { %v2865_v22 = vadd.f32 %v2864_v62, %v2788_v19  ;;  %v3421_v19 = vld [vmem:[%s7314_s7 + $0x50] sm:$0xff] }
 0x412   : > { %v6722_v24 = vadd.f32 %v3015_v41, %v2939_v61  ;;  %v6724_v47 = vpop.f32.mrf.mxu0  ;;  %3452 = vmatpush.msrb.mxu0 %v3421_v19 }
 0x413   : > { %3159 = vmatmul.f32.gmra.mxu1 %v7880_v28  ;;  %v7886_v28 = vmax.f32 %v7821_v6, 0.0  ;;  %v3437_v6 = vld [vmem:[%s7314_s7 + $0xd0] sm:$0xff] }
 0x414   : > { %3236 = vmatmul.f32.gmra.mxu2 %v7881_v56  ;;  %3313 = vmatmul.f32.gmra.mxu3 %v7883_v15  ;;  %v2791_v56 = vadd.f32 %v6501_v21, %v6589_v40  ;;  %v7888_v15 = vld [vmem:[#allocation24_spill] sm:$0xff] }
 0x415   : > { %3109 = vmatmul.f32.gmra.mxu0 %v7885_v49  ;;  %v7889_v62 = vmax.f32 %v7888_v15, 0.0  ;;  %3529 = vmatpush.msra.mxu1 %v3437_v6 }
 0x416   : > { %3453 = vmatpush.msrb.mxu0 %v3420_v32 }
 0x417   : > { %v2941_v20 = vpop.f32.mrf.mxu2  ;;  %v3018_v60 = vpop.f32.mrf.mxu3 }
 0x418   : > { %v2942_v45 = vadd.f32 %v2941_v20, %v2865_v22  ;;  %v2867_v8 = vpop.f32.mrf.mxu1 }
 0x419   : > { %v2868_v51 = vadd.f32 %v2867_v8, %v2791_v56  ;;  %v7895_v8 = vld [vmem:[#allocation22_spill] sm:$0xff] }
 0x41a   : > { %v6742_v41 = vadd.f32 %v3018_v60, %v2942_v45  ;;  %v6744_v61 = vpop.f32.mrf.mxu0  ;;  %v7892_v45 = vmax.f32 %v7824_v44, 0.0  ;;  %v7896_v56 = vmax.f32 %v7895_v8, 0.0 }
 0x41b   : > { %3162 = vmatmul.f32.gmra.mxu1 %v7886_v28  ;;  %v2794_v28 = vadd.f32 %v6528_v26, %v6589_v40 }
 0x41c   : > { %3239 = vmatmul.f32.gmra.mxu2 %v7887_v25  ;;  %3316 = vmatmul.f32.gmra.mxu3 %v7889_v62  ;;  %v7893_v25 = vld [vmem:[#allocation55_spill] sm:$0xff] }
 0x41d   : > { %3112 = vmatmul.f32.gmra.mxu0 %v7891_v52  ;;  %v7894_v15 = vmax.f32 %v7893_v25, 0.0  ;;  %v7897_v62 = vld [vmem:[#allocation67_spill] sm:$0xff]  ;;  %v2797_v25 = vadd.f32 %v6558_v12, %v6589_v40 }
 0x41e   : > { %v7898_v19 = vmax.f32 %v7897_v62, 0.0  ;;  %v7905_v62 = vld [vmem:[#allocation68_spill] sm:$0xff] }
 0x41f   : > { %v2944_v21 = vpop.f32.mrf.mxu2  ;;  %v3021_v2 = vpop.f32.mrf.mxu3 }
 0x420   : > { %v2945_v49 = vadd.f32 %v2944_v21, %v2868_v51  ;;  %v2870_v22 = vpop.f32.mrf.mxu1 }
 0x421   : > { %v2871_v52 = vadd.f32 %v2870_v22, %v2794_v28  ;;  %v3436_v28 = vld [vmem:[%s7314_s7 + $0xc8] sm:$0xff] }
 0x422   : > { %v6762_v20 = vadd.f32 %v3021_v2, %v2945_v49  ;;  %v6764_v60 = vpop.f32.mrf.mxu0  ;;  %v7899_v49 = vld [vmem:[#allocation75_spill] sm:$0xff]  ;;  %3530 = vmatpush.msra.mxu1 %v3436_v28  ;;  %v7911_v28 = vld [vmem:[#allocation69_spill] sm:$0xff] }
 0x423   : > { %3165 = vmatmul.f32.gmra.mxu1 %v7892_v45  ;;  %v7900_v45 = vmax.f32 %v7899_v49, 0.0 }
 0x424   : > { %3242 = vmatmul.f32.gmra.mxu2 %v7894_v15  ;;  %3319 = vmatmul.f32.gmra.mxu3 %v7896_v56  ;;  %v7901_v15 = vld [vmem:[#allocation15_spill] sm:$0xff]  ;;  %v7903_v56 = vld [vmem:[#allocation25_spill] sm:$0xff] }
 0x425   : > { %3115 = vmatmul.f32.gmra.mxu0 %v7898_v19  ;;  %v7902_v8 = vmax.f32 %v7901_v15, 0.0  ;;  %v7904_v22 = vmax.f32 %v7903_v56, 0.0  ;;  %v7906_v19 = vmax.f32 %v7905_v62, 0.0  ;;  %v2800_v15 = vadd.f32 %v6600_v38, %v6589_v40  ;;  %v7909_v56 = vld [vmem:[#allocation27_spill] sm:$0xff] }
 0x427   : > { %v2947_v44 = vpop.f32.mrf.mxu2  ;;  %v3024_v6 = vpop.f32.mrf.mxu3 }
 0x428   : > { %v2948_v51 = vadd.f32 %v2947_v44, %v2871_v52  ;;  %v2873_v21 = vpop.f32.mrf.mxu1 }
 0x429   : > { %v2874_v32 = vadd.f32 %v2873_v21, %v2797_v25  ;;  %v3419_v21 = vld [vmem:[%s7314_s7 + $0x40] sm:$0xff] }
 0x42a   : > { %v6779_v26 = vadd.f32 %v3024_v6, %v2948_v51  ;;  %v6781_v2 = vpop.f32.mrf.mxu0  ;;  %v3435_v25 = vld [vmem:[%s7314_s7 + $0xc0] sm:$0xff]  ;;  %3454 = vmatpush.msrb.mxu0 %v3419_v21  ;;  %v7916_v21 = vld [vmem:[#allocation28_spill] sm:$0xff] }
 0x42b   : > { %3168 = vmatmul.f32.gmra.mxu1 %v7900_v45  ;;  %v7907_v45 = vmax.f32 %v7830_v31, 0.0  ;;  %v7912_v31 = vmax.f32 %v7911_v28, 0.0  ;;  %v3434_v28 = vld [vmem:[%s7314_s7 + $0xb8] sm:$0xff] }
 0x42c   : > { %3245 = vmatmul.f32.gmra.mxu2 %v7902_v8  ;;  %3322 = vmatmul.f32.gmra.mxu3 %v7904_v22  ;;  %v7908_v8 = vmax.f32 %v5716_v16, 0.0  ;;  %v7910_v22 = vmax.f32 %v7909_v56, 0.0  ;;  %v3418_v16 = vld [vmem:[%s7314_s7 + $0x38] sm:$0xff]  ;;  %v7914_v56 = vld [vmem:[#allocation86_spill] sm:$0xff]  ;;  %v3385_v55 = vmax.f32 %v6779_v26, 0.0 }
 0x42d   : > { %3118 = vmatmul.f32.gmra.mxu0 %v7906_v19  ;;  %3531 = vmatpush.msra.mxu1 %v3435_v25  ;;  %v7917_v25 = vmax.f32 %v7916_v21, 0.0 }
 0x42e   : > { %3455 = vmatpush.msrb.mxu0 %v3418_v16 }
 0x42f   : > { %v2950_v52 = vpop.f32.mrf.mxu2  ;;  %v3027_v44 = vpop.f32.mrf.mxu3  ;;  %3532 = vmatpush.msra.mxu1 %v3434_v28 }
 0x430   : > { %v2951_v6 = vadd.f32 %v2950_v52, %v2874_v32  ;;  %v2876_v51 = vpop.f32.mrf.mxu1 }
 0x431   : > { %v2877_v62 = vadd.f32 %v2876_v51, %v2800_v15  ;;  %v7913_v51 = vmax.f32 %v7833_v46, 0.0  ;;  %v3416_v15 = vld [vmem:[%s7314_s7 + $0x28] sm:$0xff] }
 0x432   : > { %v6796_v12 = vadd.f32 %v3027_v44, %v2951_v6  ;;  %v6798_v49 = vpop.f32.mrf.mxu0  ;;  %v3417_v44 = vld [vmem:[%s7314_s7 + $0x30] sm:$0xff] }
 0x433   : > { %3171 = vmatmul.f32.gmra.mxu1 %v7907_v45  ;;  %3456 = vmatpush.msrb.mxu0 %v3417_v44 }
 0x434   : > { %3248 = vmatmul.f32.gmra.mxu2 %v7908_v8  ;;  %3325 = vmatmul.f32.gmra.mxu3 %v7910_v22  ;;  %v2803_v8 = vadd.f32 %v6635_v39, %v6589_v40  ;;  %v7915_v22 = vmax.f32 %v7914_v56, 0.0  ;;  %v3387_v26 = vmax.f32 %v6796_v12, 0.0 }
 0x435   : > { %3121 = vmatmul.f32.gmra.mxu0 %v7912_v31  ;;  %v7918_v31 = vld [vmem:[#allocation70_spill] sm:$0xff] }
 0x436   : > { %v7919_v46 = vmax.f32 %v7918_v31, 0.0  ;;  %3457 = vmatpush.msrb.mxu0 %v3416_v15  ;;  %v2806_v15 = vadd.f32 %v6664_v63, %v6589_v40  ;;  %v7925_v31 = vld [vmem:[#allocation71_spill] sm:$0xff] }
 0x437   : > { %v2953_v38 = vpop.f32.mrf.mxu2  ;;  %v3030_v19 = vpop.f32.mrf.mxu3 }
 0x438   : > { %v2954_v32 = vadd.f32 %v2953_v38, %v2877_v62  ;;  %v2879_v52 = vpop.f32.mrf.mxu1  ;;  %v3415_v62 = vld [vmem:[%s7314_s7 + $0x20] sm:$0xff] }
 0x439   : > { %v2880_v16 = vadd.f32 %v2879_v52, %v2803_v8  ;;  %3458 = vmatpush.msrb.mxu0 %v3415_v62  ;;  %v3413_v52 = vld [vmem:[%s7314_s7 + $0x10] sm:$0xff] }
 0x43a   : > { %v6822_v6 = vadd.f32 %v3030_v19, %v2954_v32  ;;  %v6824_v45 = vpop.f32.mrf.mxu0  ;;  %v3414_v19 = vld [vmem:[%s7314_s7 + $0x18] sm:$0xff]  ;;  %v7921_v8 = vld [vmem:[#allocation87_spill] sm:$0xff] }
 0x43b   : > { %3174 = vmatmul.f32.gmra.mxu1 %v7913_v51  ;;  %3459 = vmatpush.msrb.mxu0 %v3414_v19  ;;  %v7922_v21 = vmax.f32 %v7921_v8, 0.0  ;;  %v3433_v62 = vld [vmem:[%s7314_s7 + $0xb0] sm:$0xff] }
 0x43c   : > { %3251 = vmatmul.f32.gmra.mxu2 %v7915_v22  ;;  %3328 = vmatmul.f32.gmra.mxu3 %v7917_v25  ;;  %v7920_v22 = vmax.f32 %v7836_v17, 0.0  ;;  %v7923_v25 = vld [vmem:[#allocation26_spill] sm:$0xff] }
 0x43d   : > { %3124 = vmatmul.f32.gmra.mxu0 %v7919_v46  ;;  %v7924_v28 = vmax.f32 %v7923_v25, 0.0  ;;  %v7926_v46 = vmax.f32 %v7925_v31, 0.0  ;;  %v3412_v17 = vld [vmem:[%s7314_s7 + $0x8] sm:$0xff]  ;;  %3533 = vmatpush.msra.mxu1 %v3433_v62 }
 0x43e   : > { %3460 = vmatpush.msrb.mxu0 %v3413_v52  ;;  %v7929_v52 = vld [vmem:[#allocation88_spill] sm:$0xff] }
 0x43f   : > { %v2956_v39 = vpop.f32.mrf.mxu2  ;;  %v3033_v38 = vpop.f32.mrf.mxu3 }
 0x440   : > { %v2957_v32 = vadd.f32 %v2956_v39, %v2880_v16  ;;  %v2882_v44 = vpop.f32.mrf.mxu1  ;;  %3461 = vmatpush.msrb.mxu0 %v3412_v17 }
 0x441   : > { %v2883_v16 = vadd.f32 %v2882_v44, %v2806_v15  ;;  %v2809_v44 = vadd.f32 %v6687_v0, %v6589_v40  ;;  %v7930_v15 = vmax.f32 %v7929_v52, 0.0  ;;  %v2812_v52 = vadd.f32 %v6704_v27, %v6589_v40 }
 0x442   : > { %v6848_v51 = vadd.f32 %v3033_v38, %v2957_v32  ;;  %v6850_v56 = vpop.f32.mrf.mxu0  ;;  %v3411_v38 = vld [vmem:[%s7314_s7] sm:$0xff] }
 0x443   : > { %3177 = vmatmul.f32.gmra.mxu1 %v7920_v22  ;;  %3462 = vmatpush.msrb.mxu0 %v3411_v38 }
 0x444   : > { %3254 = vmatmul.f32.gmra.mxu2 %v7922_v21  ;;  %3331 = vmatmul.f32.gmra.mxu3 %v7924_v28  ;;  %v7927_v21 = vld [vmem:[#allocation79_spill] sm:$0xff]  ;;  %v7931_v28 = vld [vmem:[#allocation29_spill] sm:$0xff] }
 0x445   : > { %3127 = vmatmul.f32.gmra.mxu0 %v7926_v46  ;;  %v7928_v25 = vmax.f32 %v7927_v21, 0.0  ;;  %v7932_v31 = vmax.f32 %v7931_v28, 0.0  ;;  %v7933_v46 = vld [vmem:[#allocation72_spill] sm:$0xff] }
 0x446   : > { %v7934_v62 = vmax.f32 %v7933_v46, 0.0 }
 0x447   : > { %v2959_v63 = vpop.f32.mrf.mxu2  ;;  %v3036_v39 = vpop.f32.mrf.mxu3 }
 0x448   : > { %v2960_v19 = vadd.f32 %v2959_v63, %v2883_v16  ;;  %v2885_v32 = vpop.f32.mrf.mxu1 }
 0x449   : > { %v2886_v17 = vadd.f32 %v2885_v32, %v2809_v44  ;;  %v3432_v32 = vld [vmem:[%s7314_s7 + $0xa8] sm:$0xff]  ;;  %v7941_v44 = vld [vmem:[#allocation73_spill] sm:$0xff] }
 0x44a   : > { %v6874_v22 = vadd.f32 %v3036_v39, %v2960_v19  ;;  %v6876_v8 = vpop.f32.mrf.mxu0  ;;  %3534 = vmatpush.msra.mxu1 %v3432_v32 }
 0x44b   : > { %3180 = vmatmul.f32.gmra.mxu1 %v7928_v25  ;;  %v7935_v25 = vld [vmem:[#allocation80_spill] sm:$0xff] }
 0x44c   : > { %3257 = vmatmul.f32.gmra.mxu2 %v7930_v15  ;;  %3334 = vmatmul.f32.gmra.mxu3 %v7932_v31  ;;  %v7936_v0 = vmax.f32 %v7935_v25, 0.0  ;;  %v7937_v15 = vld [vmem:[#allocation16_spill] sm:$0xff]  ;;  %v7939_v31 = vld [vmem:[#allocation31_spill] sm:$0xff] }
 0x44d   : > { %3130 = vmatmul.f32.gmra.mxu0 %v7934_v62  ;;  %v7938_v28 = vmax.f32 %v7937_v15, 0.0  ;;  %v7940_v46 = vmax.f32 %v7939_v31, 0.0  ;;  %v7942_v62 = vmax.f32 %v7941_v44, 0.0  ;;  %v7943_v15 = vmax.f32 %v7845_v7, 0.0 }
 0x44e   : > { %v7944_v31 = vmax.f32 %v5826_v34, 0.0 }
 0x44f   : > { %v2962_v16 = vpop.f32.mrf.mxu2  ;;  %v3039_v63 = vpop.f32.mrf.mxu3 }
 0x450   : > { %v2963_v39 = vadd.f32 %v2962_v16, %v2886_v17  ;;  %v2888_v38 = vpop.f32.mrf.mxu1 }
 0x451   : > { %v2889_v17 = vadd.f32 %v2888_v38, %v2812_v52  ;;  %v3431_v38 = vld [vmem:[%s7314_s7 + $0xa0] sm:$0xff] }
 0x452   : > { %v6888_v19 = vadd.f32 %v3039_v63, %v2963_v39  ;;  %v6890_v21 = vpop.f32.mrf.mxu0  ;;  %v7947_v52 = vld [vmem:[#allocation53_spill] sm:$0xff]  ;;  %3535 = vmatpush.msra.mxu1 %v3431_v38 }
 0x453   : > { %3183 = vmatmul.f32.gmra.mxu1 %v7936_v0  ;;  %v7948_v44 = vmax.f32 %v7947_v52, 0.0 }
 0x454   : > { %3260 = vmatmul.f32.gmra.mxu2 %v7938_v28  ;;  %3337 = vmatmul.f32.gmra.mxu3 %v7940_v46  ;;  %v2815_v28 = vadd.f32 %v6724_v47, %v6589_v40  ;;  %v7945_v46 = vld [vmem:[#allocation32_spill] sm:$0xff] }
 0x455   : > { %3133 = vmatmul.f32.gmra.mxu0 %v7942_v62  ;;  %v7946_v32 = vmax.f32 %v7945_v46, 0.0  ;;  %v7950_v46 = vmax.f32 %v5851_v11, 0.0  ;;  %v3373_v11 = vmax.f32 %v6662_v29, 0.0 }
 0x457   : > { %v2965_v16 = vpop.f32.mrf.mxu2  ;;  %v3042_v63 = vpop.f32.mrf.mxu3 }
 0x458   : > { %v2966_v39 = vadd.f32 %v2965_v16, %v2889_v17  ;;  %v2891_v25 = vpop.f32.mrf.mxu1 }
 0x459   : > { %v2892_v62 = vadd.f32 %v2891_v25, %v2815_v28  ;;  %v7951_v25 = vmax.f32 %v6449_v37, 0.0  ;;  %v3430_v28 = vld [vmem:[%s7314_s7 + $0x98] sm:$0xff]  ;;  %v7952_v37 = vmax.f32 %v7850_v5, 0.0 }
 0x45a   : > { %v6905_v27 = vadd.f32 %v3042_v63, %v2966_v39  ;;  %v6907_v0 = vpop.f32.mrf.mxu0  ;;  %v3371_v39 = vmax.f32 %v6633_v42, 0.0  ;;  %3536 = vmatpush.msra.mxu1 %v3430_v28 }
 0x45b   : > { %3186 = vmatmul.f32.gmra.mxu1 %v7943_v15  ;;  %v7949_v15 = vmax.f32 %v7847_v43, 0.0 }
 0x45c   : > { %3263 = vmatmul.f32.gmra.mxu2 %v7944_v31  ;;  %3340 = vmatmul.f32.gmra.mxu3 %v7946_v32  ;;  %v2818_v31 = vadd.f32 %v6744_v61, %v6589_v40 }
 0x45d   : > { %3136 = vmatmul.f32.gmra.mxu0 %v7948_v44 }
 0x45f   : > { %v2968_v7 = vpop.f32.mrf.mxu2  ;;  %v3045_v17 = vpop.f32.mrf.mxu3 }
 0x460   : > { %v2969_v16 = vadd.f32 %v2968_v7, %v2892_v62  ;;  %v2894_v63 = vpop.f32.mrf.mxu1  ;;  %v7953_v62 = vmax.f32 %v5867_v1, 0.0  ;;  %v7954_v7 = vld [vmem:[#allocation30_spill] sm:$0xff] }
 0x461   : > { %v2895_v32 = vadd.f32 %v2894_v63, %v2818_v31  ;;  %v3636_v63 = vld [vmem:[%s7316_s9 + $0x78] sm:$0xff]  ;;  %v7956_v31 = vmax.f32 %v7853_v54, 0.0 }
 0x462   : > { %v6922_v47 = vadd.f32 %v3045_v17, %v2969_v16  ;;  %v6924_v34 = vpop.f32.mrf.mxu0  ;;  %v7955_v17 = vmax.f32 %v7954_v7, 0.0  ;;  %v3429_v16 = vld [vmem:[%s7314_s7 + $0x90] sm:$0xff]  ;;  %3641 = vmatpush.msra.mxu2 %v3636_v63  ;;  %v3428_v7 = vld [vmem:[%s7314_s7 + $0x88] sm:$0xff]  ;;  %v3379_v63 = vmax.f32 %v6722_v24, 0.0 }
 0x463   : > { %3189 = vmatmul.f32.gmra.mxu1 %v7949_v15  ;;  %v3375_v15 = vmax.f32 %v6685_v36, 0.0  ;;  %v7960_v36 = vmax.f32 %v7856_v53, 0.0 }
 0x464   : > { %3266 = vmatmul.f32.gmra.mxu2 %v7950_v46  ;;  %3343 = vmatmul.f32.gmra.mxu3 %v7951_v25  ;;  %v7957_v46 = vmax.f32 %v5886_v57, 0.0  ;;  %v7958_v25 = vld [vmem:[#allocation33_spill] sm:$0xff] }
 0x465   : > { %3463 = vmatmul.f32.vlgmr.msrb.gmra.mxu0 %v3371_v39  ;;  %3537 = vmatpush.msra.mxu1 %v3429_v16  ;;  %v7959_v28 = vmax.f32 %v7958_v25, 0.0 }
 0x467   : > { %v2971_v42 = vpop.f32.mrf.mxu2  ;;  %v3048_v38 = vpop.f32.mrf.mxu3  ;;  %3538 = vmatpush.msra.mxu1 %v3428_v7 }
 0x468   : > { %v2972_v43 = vadd.f32 %v2971_v42, %v2895_v32  ;;  %v6938_v52 = vpop.f32.mrf.mxu1 }
 0x46a   : > { %v6940_v44 = vadd.f32 %v3048_v38, %v2972_v43  ;;  %v6942_v61 = vpop.f32.mrf.mxu0  ;;  %v3377_v43 = vmax.f32 %v6702_v3, 0.0 }
 0x46b   : > { %3192 = vmatmul.f32.gmra.mxu1 %v7952_v37  ;;  %v7963_v37 = vld [vmem:[#allocation35_spill] sm:$0xff] }
 0x46c   : > { %3269 = vmatmul.f32.gmra.mxu2 %v7953_v62  ;;  %3346 = vmatmul.f32.gmra.mxu3 %v7955_v17  ;;  %v7964_v62 = vmax.f32 %v7963_v37, 0.0  ;;  %v3635_v17 = vld [vmem:[%s7316_s9 + $0x70] sm:$0xff] }
 0x46d   : > { %3466 = vmatmul.f32.gmra.mxu0 %v3373_v11  ;;  %v7961_v11 = vld [vmem:[#allocation20_spill] sm:$0xff]  ;;  %3642 = vmatpush.msra.mxu2 %v3635_v17  ;;  %v7973_v17 = vld [vmem:[#allocation37_spill] sm:$0xff] }
 0x46e   : > { %v7962_v57 = vmax.f32 %v7961_v11, 0.0  ;;  %v3381_v11 = vmax.f32 %v6742_v41, 0.0 }
 0x46f   : > { %v6957_v29 = vpop.f32.mrf.mxu2  ;;  %v6959_v5 = vpop.f32.mrf.mxu3 }
 0x470   : > { %v6961_v1 = vpop.f32.mrf.mxu1 }
 0x472   : > { %v6963_v39 = vpop.f32.mrf.mxu0 }
 0x473   : > { %3195 = vmatmul.f32.gmra.mxu1 %v7956_v31  ;;  %v7966_v31 = vmax.f32 %v5923_v9, 0.0 }
 0x474   : > { %3272 = vmatmul.f32.gmra.mxu2 %v7957_v46  ;;  %3349 = vmatmul.f32.gmra.mxu3 %v7959_v28  ;;  %v7967_v46 = vld [vmem:[#allocation36_spill] sm:$0xff]  ;;  %v3427_v28 = vld [vmem:[%s7314_s7 + $0x80] sm:$0xff] }
 0x475   : > { %3469 = vmatmul.f32.gmra.mxu0 %v3375_v15  ;;  %v7965_v15 = vmax.f32 %v7859_v23, 0.0  ;;  %v7968_v25 = vmax.f32 %v7967_v46, 0.0  ;;  %3539 = vmatpush.msra.mxu1 %v3427_v28  ;;  %v3383_v28 = vmax.f32 %v6762_v20, 0.0 }
 0x477   : > { %v6972_v32 = vpop.f32.mrf.mxu2  ;;  %v6974_v42 = vpop.f32.mrf.mxu3 }
 0x478   : > { %v6976_v38 = vpop.f32.mrf.mxu1 }
 0x47a   : > { %v6981_v54 = vpop.f32.mrf.mxu0 }
 0x47b   : > { %3198 = vmatmul.f32.gmra.mxu1 %v7960_v36 }
 0x47c   : > { %3275 = vmatmul.f32.gmra.mxu2 %v7962_v57  ;;  %3352 = vmatmul.f32.gmra.mxu3 %v7964_v62  ;;  %v7969_v57 = vld [vmem:[#allocation10_spill] sm:$0xff] }
 0x47d   : > { %3472 = vmatmul.f32.gmra.mxu0 %v3377_v43  ;;  %v3634_v43 = vld [vmem:[%s7316_s9 + $0x68] sm:$0xff]  ;;  %v7970_v37 = vmax.f32 %v7969_v57, 0.0 }
 0x47e   : > { %3643 = vmatpush.msra.mxu2 %v3634_v43  ;;  %v7971_v62 = vld [vmem:[#allocation18_spill] sm:$0xff]  ;;  %v7975_v43 = vmax.f32 %v6627_v35, 0.0 }
 0x47f   : > { %v6993_v53 = vpop.f32.mrf.mxu2  ;;  %v6995_v3 = vpop.f32.mrf.mxu3  ;;  %v7972_v7 = vmax.f32 %v7971_v62, 0.0 }
 0x480   : > { %v6997_v16 = vpop.f32.mrf.mxu1 }
 0x482   : > { %v7012_v24 = vpop.f32.mrf.mxu0 }
 0x483   : > { %3201 = vmatmul.f32.gmra.mxu1 %v7965_v15  ;;  %v7974_v15 = vmax.f32 %v7973_v17, 0.0 }
 0x484   : > { %3278 = vmatmul.f32.gmra.mxu2 %v7966_v31  ;;  %3355 = vmatmul.f32.gmra.mxu3 %v7968_v25 }
 0x485   : > { %3475 = vmatmul.f32.gmra.mxu0 %v3379_v63  ;;  %v3633_v63 = vld [vmem:[%s7316_s9 + $0x60] sm:$0xff] }
 0x486   : > { %3644 = vmatpush.msra.mxu2 %v3633_v63 }
 0x487   : > { %v7014_v23 = vpop.f32.mrf.mxu2  ;;  %v7016_v9 = vpop.f32.mrf.mxu3 }
 0x488   : > { %v3157_v36 = vpop.f32.mrf.mxu1 }
 0x48a   : > { %v7028_v25 = vpop.f32.mrf.mxu0 }
 0x48b   : > { %3204 = vmatmul.f32.gmra.mxu1 %v7970_v37 }
 0x48c   : > { %3281 = vmatmul.f32.gmra.mxu2 %v7972_v7  ;;  %3358 = vmatmul.f32.gmra.mxu3 %v7974_v15  ;;  %v7976_v7 = vld [vmem:[#allocation34_spill] sm:$0xff] }
 0x48d   : > { %3478 = vmatmul.f32.gmra.mxu0 %v3381_v11  ;;  %v3632_v11 = vld [vmem:[%s7316_s9 + $0x58] sm:$0xff]  ;;  %v7041_v20 = vperm.slane %v7976_v7, 1  ;;  %v3389_v7 = vmax.f32 %v6822_v6, 0.0  ;;  %v3391_v6 = vmax.f32 %v6848_v51, 0.0  ;;  %v3393_v51 = vmax.f32 %v6874_v22, 0.0 }
 0x48e   : > { %3645 = vmatpush.msra.mxu2 %v3632_v11  ;;  %v3395_v22 = vmax.f32 %v6888_v19, 0.0  ;;  %v3627_v19 = vld [vmem:[%s7316_s9 + $0x30] sm:$0xff] }
 0x48f   : > { %v3234_v31 = vpop.f32.mrf.mxu2  ;;  %v3311_v46 = vpop.f32.mrf.mxu3  ;;  %v3081_v35 = vadd.f32 %v6850_v56, %v7041_v20  ;;  %v3084_v56 = vadd.f32 %v6876_v8, %v7041_v20 }
 0x490   : > { %v3160_v41 = vpop.f32.mrf.mxu1 }
 0x491   : > { %v3161_v4 = vadd.f32 %v3160_v41, %v3084_v56 }
 0x492   : > { %v7043_v13 = vpop.f32.mrf.mxu0 }
 0x493   : > { %3207 = vmatmul.f32.gmra.mxu1 %v2610_v50  ;;  %v7977_v50 = vmax.f32 %v6656_v48, 0.0  ;;  %v7980_v48 = vmax.f32 %v6680_v58, 0.0  ;;  %v3630_v58 = vld [vmem:[%s7316_s9 + $0x48] sm:$0xff] }
 0x494   : > { %3284 = vmatmul.f32.gmra.mxu2 %v2611_v18  ;;  %3361 = vmatmul.f32.gmra.mxu3 %v7975_v43  ;;  %v3158_v18 = vadd.f32 %v3157_v36, %v3081_v35 }
 0x495   : > { %3481 = vmatmul.f32.gmra.mxu0 %v3383_v28 }
 0x496   : > { %v3235_v28 = vadd.f32 %v3234_v31, %v3158_v18 }
 0x497   : > { %v3237_v57 = vpop.f32.mrf.mxu2  ;;  %v3314_v37 = vpop.f32.mrf.mxu3 }
 0x498   : > { %v3163_v62 = vpop.f32.mrf.mxu1  ;;  %v3312_v36 = vadd.f32 %v3311_v46, %v3235_v28  ;;  %v3238_v10 = vadd.f32 %v3237_v57, %v3161_v4 }
 0x49a   : > { %v3372_v11 = vmax.f32 %v3312_v36, 0.0  ;;  %v3315_v8 = vadd.f32 %v3314_v37, %v3238_v10  ;;  %v3093_v36 = vadd.f32 %v6924_v34, %v7041_v20  ;;  %v3096_v34 = vadd.f32 %v6942_v61, %v7041_v20 }
 0x49b   : > { %3210 = vmatmul.f32.gmra.mxu1 %v2614_v33  ;;  %v7057_v33 = vpop.f32.mrf.mxu0  ;;  %v3099_v61 = vadd.f32 %v6963_v39, %v7041_v20 }
 0x49c   : > { %3287 = vmatmul.f32.gmra.mxu2 %v2615_v59  ;;  %3364 = vmatmul.f32.gmra.mxu3 %v7977_v50  ;;  %v3631_v59 = vld [vmem:[%s7316_s9 + $0x50] sm:$0xff]  ;;  %v3374_v57 = vmax.f32 %v3315_v8, 0.0 }
 0x49d   : > { %3484 = vmatmul.f32.gmra.mxu0 %v3385_v55  ;;  %3646 = vmatpush.msra.mxu2 %v3631_v59  ;;  %v3087_v55 = vadd.f32 %v6890_v21, %v7041_v20  ;;  %v3090_v21 = vadd.f32 %v6907_v0, %v7041_v20  ;;  %v3628_v0 = vld [vmem:[%s7316_s9 + $0x38] sm:$0xff] }
 0x49f   : > { %v3240_v17 = vpop.f32.mrf.mxu2  ;;  %v3317_v15 = vpop.f32.mrf.mxu3  ;;  %3647 = vmatpush.msra.mxu2 %v3630_v58  ;;  %v3164_v41 = vadd.f32 %v3163_v62, %v3087_v55 }
 0x4a0   : > { %v3166_v63 = vpop.f32.mrf.mxu1 }
 0x4a1   : > { %v3241_v28 = vadd.f32 %v3240_v17, %v3164_v41 }
 0x4a3   : > { %3213 = vmatmul.f32.gmra.mxu1 %v7978_v14  ;;  %v7074_v46 = vpop.f32.mrf.mxu0  ;;  %v3318_v37 = vadd.f32 %v3317_v15, %v3241_v28  ;;  %v3167_v14 = vadd.f32 %v3166_v63, %v3090_v21 }
 0x4a4   : > { %3290 = vmatmul.f32.gmra.mxu2 %v7979_v30  ;;  %3367 = vmatmul.f32.gmra.mxu3 %v7980_v48 }
 0x4a5   : > { %3487 = vmatmul.f32.gmra.mxu0 %v3387_v26  ;;  %v3629_v26 = vld [vmem:[%s7316_s9 + $0x40] sm:$0xff]  ;;  %v3376_v17 = vmax.f32 %v3318_v37, 0.0 }
 0x4a6   : > { %3648 = vmatpush.msra.mxu2 %v3629_v26 }
 0x4a7   : > { %v3243_v12 = vpop.f32.mrf.mxu2  ;;  %v3320_v31 = vpop.f32.mrf.mxu3 }
 0x4a8   : > { %v3169_v43 = vpop.f32.mrf.mxu1  ;;  %v3244_v56 = vadd.f32 %v3243_v12, %v3167_v14  ;;  %3649 = vmatpush.msra.mxu2 %v3628_v0 }
 0x4a9   : > { %v3170_v15 = vadd.f32 %v3169_v43, %v3093_v36 }
 0x4aa   : > { %v3321_v4 = vadd.f32 %v3320_v31, %v3244_v56  ;;  %3650 = vmatpush.msra.mxu2 %v3627_v19  ;;  %v3102_v56 = vadd.f32 %v6981_v54, %v7041_v20 }
 0x4ab   : > { %3540 = vmatmul.f32.vlgmr.msra.gmra.mxu1 %v3372_v11  ;;  %v7082_v48 = vpop.f32.mrf.mxu0 }
 0x4ad   : > { %3490 = vmatmul.f32.gmra.mxu0 %v3389_v7  ;;  %v3378_v7 = vmax.f32 %v3321_v4, 0.0 }
 0x4af   : > { %v3246_v50 = vpop.f32.mrf.mxu2  ;;  %v3323_v35 = vpop.f32.mrf.mxu3 }
 0x4b0   : > { %v3172_v18 = vpop.f32.mrf.mxu1  ;;  %v3247_v58 = vadd.f32 %v3246_v50, %v3170_v15 }
 0x4b1   : > { %v3173_v55 = vadd.f32 %v3172_v18, %v3096_v34 }
 0x4b2   : > { %v3324_v31 = vadd.f32 %v3323_v35, %v3247_v58 }
 0x4b3   : > { %3543 = vmatmul.f32.gmra.mxu1 %v3374_v57  ;;  %v7090_v12 = vpop.f32.mrf.mxu0 }
 0x4b4   : > { %v3380_v43 = vmax.f32 %v3324_v31, 0.0 }
 0x4b5   : > { %3493 = vmatmul.f32.gmra.mxu0 %v3391_v6  ;;  %v3397_v6 = vmax.f32 %v6905_v27, 0.0  ;;  %v3399_v27 = vmax.f32 %v6922_v47, 0.0 }
 0x4b7   : > { %v3249_v62 = vpop.f32.mrf.mxu2  ;;  %v3326_v30 = vpop.f32.mrf.mxu3 }
 0x4b8   : > { %v3175_v59 = vpop.f32.mrf.mxu1  ;;  %v3250_v28 = vadd.f32 %v3249_v62, %v3173_v55 }
 0x4b9   : > { %v3176_v18 = vadd.f32 %v3175_v59, %v3099_v61  ;;  %v2821_v59 = vadd.f32 %v6764_v60, %v6589_v40  ;;  %v3105_v60 = vadd.f32 %v7012_v24, %v7041_v20 }
 0x4ba   : > { %v3327_v35 = vadd.f32 %v3326_v30, %v3250_v28 }
 0x4bb   : > { %3546 = vmatmul.f32.gmra.mxu1 %v3376_v17  ;;  %v7096_v50 = vpop.f32.mrf.mxu0  ;;  %v3626_v17 = vld [vmem:[%s7316_s9 + $0x28] sm:$0xff]  ;;  %v2898_v0 = vadd.f32 %v6938_v52, %v2821_v59  ;;  %v2824_v52 = vadd.f32 %v6781_v2, %v6589_v40  ;;  %v3624_v2 = vld [vmem:[%s7316_s9 + $0x18] sm:$0xff] }
 0x4bc   : > { %v3382_v14 = vmax.f32 %v3327_v35, 0.0  ;;  %3651 = vmatpush.msra.mxu2 %v3626_v17 }
 0x4bd   : > { %3496 = vmatmul.f32.gmra.mxu0 %v3393_v51  ;;  %v2975_v54 = vadd.f32 %v6957_v29, %v2898_v0  ;;  %v2901_v31 = vadd.f32 %v6961_v1, %v2824_v52  ;;  %v2827_v1 = vadd.f32 %v6798_v49, %v6589_v40 }
 0x4bf   : > { %v3252_v63 = vpop.f32.mrf.mxu2  ;;  %v3329_v11 = vpop.f32.mrf.mxu3  ;;  %v3052_v58 = vadd.f32 %v6959_v5, %v2975_v54  ;;  %v2978_v24 = vadd.f32 %v6972_v32, %v2901_v31  ;;  %v3108_v5 = vadd.f32 %v7028_v25, %v7041_v20  ;;  %v2904_v32 = vadd.f32 %v6976_v38, %v2827_v1  ;;  %v3622_v54 = vld [vmem:[%s7316_s9 + $0x8] sm:$0xff]  ;;  %v3621_v31 = vld [vmem:[%s7316_s9] sm:$0xff] }
 0x4c0   : > { %v3178_v10 = vpop.f32.mrf.mxu1  ;;  %v3253_v62 = vadd.f32 %v3252_v63, %v3176_v18  ;;  %v3123_v1 = vadd.f32 %v7090_v12, %v7041_v20 }
 0x4c1   : > { %v3179_v51 = vadd.f32 %v3178_v10, %v3102_v56  ;;  %v3403_v28 = vmax.f32 %v3052_v58, 0.0  ;;  %v2981_v25 = vadd.f32 %v6993_v53, %v2904_v32 }
 0x4c2   : > { %v3330_v39 = vadd.f32 %v3329_v11, %v3253_v62  ;;  %v3625_v11 = vld [vmem:[%s7316_s9 + $0x20] sm:$0xff]  ;;  %v3111_v62 = vadd.f32 %v7043_v13, %v7041_v20  ;;  %v3623_v13 = vld [vmem:[%s7316_s9 + $0x10] sm:$0xff] }
 0x4c3   : > { %3549 = vmatmul.f32.gmra.mxu1 %v3378_v7  ;;  %v7109_v30 = vpop.f32.mrf.mxu0  ;;  %v3401_v7 = vmax.f32 %v6940_v44, 0.0  ;;  %3652 = vmatpush.msra.mxu2 %v3625_v11 }
 0x4c4   : > { %v3384_v15 = vmax.f32 %v3330_v39, 0.0 }
 0x4c5   : > { %3499 = vmatmul.f32.gmra.mxu0 %v3395_v22  ;;  %3653 = vmatpush.msra.mxu2 %v3624_v2 }
 0x4c7   : > { %v3255_v8 = vpop.f32.mrf.mxu2  ;;  %v3332_v41 = vpop.f32.mrf.mxu3  ;;  %3654 = vmatpush.msra.mxu2 %v3623_v13 }
 0x4c8   : > { %v3181_v57 = vpop.f32.mrf.mxu1  ;;  %v3256_v63 = vadd.f32 %v3255_v8, %v3179_v51 }
 0x4c9   : > { %v3182_v22 = vadd.f32 %v3181_v57, %v3105_v60  ;;  %v3055_v57 = vadd.f32 %v6974_v42, %v2978_v24  ;;  %v2830_v42 = vadd.f32 %v6824_v45, %v6589_v40  ;;  %v3753_v40 = vld [vmem:[#allocation4 + $0x78] sm:$0xff]  ;;  %v3114_v45 = vadd.f32 %v7057_v33, %v7041_v20  ;;  %3655 = vmatpush.msra.mxu2 %v3622_v54 }
 0x4ca   : > { %v3333_v10 = vadd.f32 %v3332_v41, %v3256_v63  ;;  %3758 = vmatpush.msra.mxu3 %v3753_v40  ;;  %v3117_v33 = vadd.f32 %v7074_v46, %v7041_v20  ;;  %v7174_v40 = vld [vmem:[%s7315_s8] ss:$0 sm:$0xff] }
 0x4cb   : > { %3552 = vmatmul.f32.gmra.mxu1 %v3380_v43  ;;  %v7124_v34 = vpop.f32.mrf.mxu0  ;;  %v2907_v56 = vadd.f32 %v6997_v16, %v2830_v42  ;;  %3656 = vmatpush.msra.mxu2 %v3621_v31 }
 0x4cc   : > { %v3386_v55 = vmax.f32 %v3333_v10, 0.0 }
 0x4cd   : > { %3502 = vmatmul.f32.gmra.mxu0 %v3397_v6  ;;  %v2984_v51 = vadd.f32 %v7014_v23, %v2907_v56  ;;  %v3749_v56 = vld [vmem:[#allocation4 + $0x58] sm:$0xff] }
 0x4cf   : > { %v3258_v26 = vpop.f32.mrf.mxu2  ;;  %v3335_v21 = vpop.f32.mrf.mxu3 }
 0x4d0   : > { %v3184_v37 = vpop.f32.mrf.mxu1  ;;  %v3259_v8 = vadd.f32 %v3258_v26, %v3182_v22 }
 0x4d1   : > { %v3185_v6 = vadd.f32 %v3184_v37, %v3108_v5  ;;  %v3058_v37 = vadd.f32 %v6995_v3, %v2981_v25  ;;  %v3126_v25 = vadd.f32 %v7096_v50, %v7041_v20 }
 0x4d2   : > { %v3336_v41 = vadd.f32 %v3335_v21, %v3259_v8 }
 0x4d3   : > { %3555 = vmatmul.f32.gmra.mxu1 %v3382_v14  ;;  %v7137_v26 = vpop.f32.mrf.mxu0  ;;  %v3405_v14 = vmax.f32 %v3055_v57, 0.0  ;;  %v3407_v53 = vmax.f32 %v3058_v37, 0.0 }
 0x4d4   : > { %v3388_v35 = vmax.f32 %v3336_v41, 0.0  ;;  %v3751_v41 = vld [vmem:[#allocation4 + $0x68] sm:$0xff] }
 0x4d5   : > { %3505 = vmatmul.f32.gmra.mxu0 %v3399_v27 }
 0x4d7   : > { %v3261_v36 = vpop.f32.mrf.mxu2  ;;  %v3338_v4 = vpop.f32.mrf.mxu3 }
 0x4d8   : > { %v3187_v47 = vpop.f32.mrf.mxu1  ;;  %v3262_v18 = vadd.f32 %v3261_v36, %v3185_v6 }
 0x4d9   : > { %v3188_v38 = vadd.f32 %v3187_v47, %v3111_v62 }
 0x4da   : > { %v3339_v49 = vadd.f32 %v3338_v4, %v3262_v18  ;;  %v3061_v4 = vadd.f32 %v7016_v9, %v2984_v51  ;;  %v3750_v18 = vld [vmem:[#allocation4 + $0x60] sm:$0xff] }
 0x4db   : > { %3558 = vmatmul.f32.gmra.mxu1 %v3384_v15  ;;  %v7147_v36 = vpop.f32.mrf.mxu0 }
 0x4dc   : > { %v3390_v39 = vmax.f32 %v3339_v49, 0.0 }
 0x4dd   : > { %3508 = vmatmul.f32.gmra.mxu0 %v3401_v7  ;;  %v3409_v7 = vmax.f32 %v3061_v4, 0.0 }
 0x4df   : > { %v3264_v44 = vpop.f32.mrf.mxu2  ;;  %v3341_v43 = vpop.f32.mrf.mxu3 }
 0x4e0   : > { %v3190_v29 = vpop.f32.mrf.mxu1  ;;  %v3265_v59 = vadd.f32 %v3264_v44, %v3188_v38 }
 0x4e1   : > { %v3191_v47 = vadd.f32 %v3190_v29, %v3114_v45  ;;  %v3752_v29 = vld [vmem:[#allocation4 + $0x70] sm:$0xff]  ;;  %v3132_v45 = vadd.f32 %v7124_v34, %v7041_v20 }
 0x4e2   : > { %v3342_v3 = vadd.f32 %v3341_v43, %v3265_v59  ;;  %3759 = vmatpush.msra.mxu3 %v3752_v29 }
 0x4e3   : > { %3561 = vmatmul.f32.gmra.mxu1 %v3386_v55  ;;  %v3464_v60 = vpop.f32.mrf.mxu0  ;;  %v3120_v55 = vadd.f32 %v7082_v48, %v7041_v20 }
 0x4e4   : > { %v3392_v0 = vmax.f32 %v3342_v3, 0.0  ;;  %3760 = vmatpush.msra.mxu3 %v3751_v41  ;;  %v3465_v4 = vadd.f32 %v7174_v40, %v3464_v60 }
 0x4e5   : > { %3511 = vmatmul.f32.gmra.mxu0 %v3403_v28 }
 0x4e6   : > { %3761 = vmatpush.msra.mxu3 %v3750_v18 }
 0x4e7   : > { %v3267_v19 = vpop.f32.mrf.mxu2  ;;  %v3344_v21 = vpop.f32.mrf.mxu3 }
 0x4e8   : > { %v3193_v61 = vpop.f32.mrf.mxu1  ;;  %v3268_v15 = vadd.f32 %v3267_v19, %v3191_v47  ;;  %3762 = vmatpush.msra.mxu3 %v3749_v56 }
 0x4e9   : > { %v3194_v10 = vadd.f32 %v3193_v61, %v3117_v33 }
 0x4ea   : > { %v3345_v11 = vadd.f32 %v3344_v21, %v3268_v15 }
 0x4eb   : > { %3564 = vmatmul.f32.gmra.mxu1 %v3388_v35  ;;  %v3467_v43 = vpop.f32.mrf.mxu0 }
 0x4ec   : > { %v3394_v58 = vmax.f32 %v3345_v11, 0.0  ;;  %v3135_v11 = vadd.f32 %v7137_v26, %v7041_v20  ;;  %v3468_v34 = vadd.f32 %v7174_v40, %v3467_v43 }
 0x4ed   : > { %3514 = vmatmul.f32.gmra.mxu0 %v3405_v14 }
 0x4ef   : > { %v3270_v27 = vpop.f32.mrf.mxu2  ;;  %v3347_v16 = vpop.f32.mrf.mxu3 }
 0x4f0   : > { %v3196_v17 = vpop.f32.mrf.mxu1  ;;  %v3271_v22 = vadd.f32 %v3270_v27, %v3194_v10  ;;  %v3129_v27 = vadd.f32 %v7109_v30, %v7041_v20  ;;  %v3748_v30 = vld [vmem:[#allocation4 + $0x50] sm:$0xff] }
 0x4f1   : > { %v3197_v8 = vadd.f32 %v3196_v17, %v3120_v55  ;;  %3763 = vmatpush.msra.mxu3 %v3748_v30  ;;  %v3747_v55 = vld [vmem:[#allocation4 + $0x48] sm:$0xff] }
 0x4f2   : > { %v3348_v46 = vadd.f32 %v3347_v16, %v3271_v22 }
 0x4f3   : > { %3567 = vmatmul.f32.gmra.mxu1 %v3390_v39  ;;  %v3470_v35 = vpop.f32.mrf.mxu0  ;;  %3764 = vmatpush.msra.mxu3 %v3747_v55 }
 0x4f4   : > { %v3396_v24 = vmax.f32 %v3348_v46, 0.0  ;;  %v3138_v46 = vadd.f32 %v7147_v36, %v7041_v20 }
 0x4f5   : > { %3517 = vmatmul.f32.gmra.mxu0 %v3407_v53 }
 0x4f7   : > { %v3273_v63 = vpop.f32.mrf.mxu2  ;;  %v3350_v9 = vpop.f32.mrf.mxu3 }
 0x4f8   : > { %v3199_v23 = vpop.f32.mrf.mxu1  ;;  %v3274_v2 = vadd.f32 %v3273_v63, %v3197_v8 }
 0x4f9   : > { %v3200_v19 = vadd.f32 %v3199_v23, %v3123_v1 }
 0x4fa   : > { %v3351_v57 = vadd.f32 %v3350_v9, %v3274_v2 }
 0x4fb   : > { %3570 = vmatmul.f32.gmra.mxu1 %v3392_v0  ;;  %v3473_v38 = vpop.f32.mrf.mxu0 }
 0x4fc   : > { %v3398_v48 = vmax.f32 %v3351_v57, 0.0  ;;  %v3474_v20 = vadd.f32 %v7174_v40, %v3473_v38 }
 0x4fd   : > { %3520 = vmatmul.f32.gmra.mxu0 %v3409_v7 }
 0x4ff   : > { %v3276_v44 = vpop.f32.mrf.mxu2  ;;  %v3353_v5 = vpop.f32.mrf.mxu3 }
 0x500   : > { %v3202_v52 = vpop.f32.mrf.mxu1  ;;  %v3277_v32 = vadd.f32 %v3276_v44, %v3200_v19 }
 0x501   : > { %v3203_v62 = vadd.f32 %v3202_v52, %v3126_v25 }
 0x502   : > { %v3354_v21 = vadd.f32 %v3353_v5, %v3277_v32 }
 0x503   : > { %3573 = vmatmul.f32.gmra.mxu1 %v3394_v58  ;;  %v3476_v16 = vpop.f32.mrf.mxu0 }
 0x504   : > { %v3400_v12 = vmax.f32 %v3354_v21, 0.0  ;;  %v3477_v25 = vadd.f32 %v7174_v40, %v3476_v16 }
 0x507   : > { %v3279_v6 = vpop.f32.mrf.mxu2  ;;  %v3356_v14 = vpop.f32.mrf.mxu3 }
 0x508   : > { %v3205_v28 = vpop.f32.mrf.mxu1  ;;  %v3280_v37 = vadd.f32 %v3279_v6, %v3203_v62  ;;  %v3746_v6 = vld [vmem:[#allocation4 + $0x40] sm:$0xff] }
 0x509   : > { %v3206_v59 = vadd.f32 %v3205_v28, %v3129_v27  ;;  %v3471_v28 = vadd.f32 %v7174_v40, %v3470_v35  ;;  %3765 = vmatpush.msra.mxu3 %v3746_v6 }
 0x50a   : > { %v3357_v17 = vadd.f32 %v3356_v14, %v3280_v37  ;;  %v3745_v14 = vld [vmem:[#allocation4 + $0x38] sm:$0xff] }
 0x50b   : > { %3576 = vmatmul.f32.gmra.mxu1 %v3396_v24  ;;  %v3479_v52 = vpop.f32.mrf.mxu0  ;;  %3766 = vmatpush.msra.mxu3 %v3745_v14  ;;  %v3867_v14 = vld [vmem:[#allocation6 + $0x60] sm:$0xff] }
 0x50c   : > { %v3402_v51 = vmax.f32 %v3357_v17, 0.0  ;;  %v3480_v37 = vadd.f32 %v7174_v40, %v3479_v52 }
 0x50f   : > { %v3282_v49 = vpop.f32.mrf.mxu2  ;;  %v3359_v39 = vpop.f32.mrf.mxu3 }
 0x510   : > { %v3208_v61 = vpop.f32.mrf.mxu1  ;;  %v3283_v13 = vadd.f32 %v3282_v49, %v3206_v59 }
 0x511   : > { %v3209_v47 = vadd.f32 %v3208_v61, %v3132_v45 }
 0x512   : > { %v3360_v3 = vadd.f32 %v3359_v39, %v3283_v13  ;;  %v3743_v13 = vld [vmem:[#allocation4 + $0x28] sm:$0xff] }
 0x513   : > { %3579 = vmatmul.f32.gmra.mxu1 %v3398_v48  ;;  %v3482_v1 = vpop.f32.mrf.mxu0 }
 0x514   : > { %v3404_v15 = vmax.f32 %v3360_v3, 0.0  ;;  %v3483_v56 = vadd.f32 %v7174_v40, %v3482_v1  ;;  %v3738_v1 = vld [vmem:[#allocation4] sm:$0xff] }
 0x517   : > { %v3285_v50 = vpop.f32.mrf.mxu2  ;;  %v3362_v23 = vpop.f32.mrf.mxu3 }
 0x518   : > { %v3211_v42 = vpop.f32.mrf.mxu1  ;;  %v3286_v63 = vadd.f32 %v3285_v50, %v3209_v47 }
 0x519   : > { %v3212_v9 = vadd.f32 %v3211_v42, %v3135_v11  ;;  %v3744_v42 = vld [vmem:[#allocation4 + $0x30] sm:$0xff] }
 0x51a   : > { %v3363_v10 = vadd.f32 %v3362_v23, %v3286_v63  ;;  %3767 = vmatpush.msra.mxu3 %v3744_v42 }
 0x51b   : > { %3582 = vmatmul.f32.gmra.mxu1 %v3400_v12  ;;  %v3485_v35 = vpop.f32.mrf.mxu0 }
 0x51c   : > { %v3406_v60 = vmax.f32 %v3363_v10, 0.0  ;;  %3768 = vmatpush.msra.mxu3 %v3743_v13  ;;  %v3486_v50 = vadd.f32 %v7174_v40, %v3485_v35 }
 0x51f   : > { %v3288_v33 = vpop.f32.mrf.mxu2  ;;  %v3365_v29 = vpop.f32.mrf.mxu3 }
 0x520   : > { %v3214_v53 = vpop.f32.mrf.mxu1  ;;  %v3289_v22 = vadd.f32 %v3288_v33, %v3212_v9 }
 0x521   : > { %v3215_v43 = vadd.f32 %v3214_v53, %v3138_v46 }
 0x522   : > { %v3366_v8 = vadd.f32 %v3365_v29, %v3289_v22 }
 0x523   : > { %3585 = vmatmul.f32.gmra.mxu1 %v3402_v51  ;;  %v3488_v12 = vpop.f32.mrf.mxu0 }
 0x524   : > { %v3408_v2 = vmax.f32 %v3366_v8, 0.0  ;;  %v3489_v47 = vadd.f32 %v7174_v40, %v3488_v12  ;;  %v3866_v12 = vld [vmem:[#allocation6 + $0x58] sm:$0xff] }
 0x527   : > { %v3291_v26 = vpop.f32.mrf.mxu2  ;;  %v3368_v19 = vpop.f32.mrf.mxu3 }
 0x528   : > { %v3541_v0 = vpop.f32.mrf.mxu1  ;;  %v3292_v5 = vadd.f32 %v3291_v26, %v3215_v43  ;;  %v3739_v26 = vld [vmem:[#allocation4 + $0x8] sm:$0xff] }
 0x529   : > { %v3542_v7 = vadd.f32 %v3541_v0, %v3465_v4  ;;  %v3742_v4 = vld [vmem:[#allocation4 + $0x20] sm:$0xff] }
 0x52a   : > { %v3369_v61 = vadd.f32 %v3368_v19, %v3292_v5  ;;  %3769 = vmatpush.msra.mxu3 %v3742_v4 }
 0x52b   : > { %v3601_v54 = vmax.f32 %v3542_v7, 0.0  ;;  %3588 = vmatmul.f32.gmra.mxu1 %v3404_v15  ;;  %v3491_v39 = vpop.f32.mrf.mxu0  ;;  %v3741_v7 = vld [vmem:[#allocation4 + $0x18] sm:$0xff] }
 0x52c   : > { %v3410_v48 = vmax.f32 %v3369_v61, 0.0  ;;  %3770 = vmatpush.msra.mxu3 %v3741_v7 }
 0x52d   : > { %3657 = vmatmul.f32.vlgmr.msra.gmra.mxu2 %v3601_v54  ;;  %v3492_v54 = vadd.f32 %v7174_v40, %v3491_v39  ;;  %v7202_v39 = vld [vmem:[%s7317_s10] ss:$0 sm:$0xff] }
 0x530   : > { %v3544_v58 = vpop.f32.mrf.mxu1 }
 0x531   : > { %v3545_v44 = vadd.f32 %v3544_v58, %v3468_v34  ;;  %v3740_v34 = vld [vmem:[#allocation4 + $0x10] sm:$0xff] }
 0x532   : > { %3771 = vmatpush.msra.mxu3 %v3740_v34 }
 0x533   : > { %v3602_v31 = vmax.f32 %v3545_v44, 0.0  ;;  %3591 = vmatmul.f32.gmra.mxu1 %v3406_v60  ;;  %v3494_v30 = vpop.f32.mrf.mxu0  ;;  %v3870_v44 = vld [vmem:[#allocation6 + $0x78] sm:$0xff] }
 0x534   : > { %v3495_v52 = vadd.f32 %v7174_v40, %v3494_v30  ;;  %3875 = vmatpush.msra.mxu0 %v3870_v44  ;;  %3772 = vmatpush.msra.mxu3 %v3739_v26  ;;  %v3861_v26 = vld [vmem:[#allocation6 + $0x30] sm:$0xff] }
 0x535   : > { %3660 = vmatmul.f32.gmra.mxu2 %v3602_v31 }
 0x536   : > { %3773 = vmatpush.msra.mxu3 %v3738_v1  ;;  %v3860_v1 = vld [vmem:[#allocation6 + $0x28] sm:$0xff] }
 0x538   : > { %v3547_v24 = vpop.f32.mrf.mxu1 }
 0x539   : > { %v3548_v41 = vadd.f32 %v3547_v24, %v3471_v28  ;;  %v3869_v28 = vld [vmem:[#allocation6 + $0x70] sm:$0xff] }
 0x53a   : > { %3876 = vmatpush.msra.mxu0 %v3869_v28 }
 0x53b   : > { %v3603_v57 = vmax.f32 %v3548_v41, 0.0  ;;  %3594 = vmatmul.f32.gmra.mxu1 %v3408_v2  ;;  %v3497_v63 = vpop.f32.mrf.mxu0 }
 0x53c   : > { %v3498_v29 = vadd.f32 %v7174_v40, %v3497_v63 }
 0x53d   : > { %3663 = vmatmul.f32.gmra.mxu2 %v3603_v57 }
 0x540   : > { %v3550_v36 = vpop.f32.mrf.mxu1 }
 0x541   : > { %v3551_v32 = vadd.f32 %v3550_v36, %v3474_v20  ;;  %v3868_v20 = vld [vmem:[#allocation6 + $0x68] sm:$0xff] }
 0x542   : > { %3877 = vmatpush.msra.mxu0 %v3868_v20 }
 0x543   : > { %v3604_v18 = vmax.f32 %v3551_v32, 0.0  ;;  %3597 = vmatmul.f32.gmra.mxu1 %v3410_v48  ;;  %v3500_v9 = vpop.f32.mrf.mxu0 }
 0x544   : > { %v3501_v43 = vadd.f32 %v7174_v40, %v3500_v9  ;;  %3878 = vmatpush.msra.mxu0 %v3867_v14 }
 0x545   : > { %3666 = vmatmul.f32.gmra.mxu2 %v3604_v18 }
 0x546   : > { %3879 = vmatpush.msra.mxu0 %v3866_v12 }
 0x548   : > { %v3553_v21 = vpop.f32.mrf.mxu1 }
 0x549   : > { %v3554_v62 = vadd.f32 %v3553_v21, %v3477_v25 }
 0x54b   : > { %v3605_v49 = vmax.f32 %v3554_v62, 0.0  ;;  %v3503_v31 = vpop.f32.mrf.mxu0 }
 0x54c   : > { %v3504_v57 = vadd.f32 %v7174_v40, %v3503_v31 }
 0x54d   : > { %3669 = vmatmul.f32.gmra.mxu2 %v3605_v49 }
 0x550   : > { %v3556_v38 = vpop.f32.mrf.mxu1 }
 0x551   : > { %v3557_v27 = vadd.f32 %v3556_v38, %v3480_v37 }
 0x553   : > { %v3606_v17 = vmax.f32 %v3557_v27, 0.0  ;;  %v3506_v5 = vpop.f32.mrf.mxu0 }
 0x554   : > { %v3507_v48 = vadd.f32 %v7174_v40, %v3506_v5 }
 0x555   : > { %3672 = vmatmul.f32.gmra.mxu2 %v3606_v17 }
 0x558   : > { %v3559_v59 = vpop.f32.mrf.mxu1 }
 0x559   : > { %v3560_v53 = vadd.f32 %v3559_v59, %v3483_v56  ;;  %v3865_v59 = vld [vmem:[#allocation6 + $0x50] sm:$0xff] }
 0x55a   : > { %3880 = vmatpush.msra.mxu0 %v3865_v59  ;;  %v3855_v59 = vld [vmem:[#allocation6] sm:$0xff] }
 0x55b   : > { %v3607_v51 = vmax.f32 %v3560_v53, 0.0  ;;  %v3509_v36 = vpop.f32.mrf.mxu0 }
 0x55c   : > { %v3510_v21 = vadd.f32 %v7174_v40, %v3509_v36 }
 0x55d   : > { %3675 = vmatmul.f32.gmra.mxu2 %v3607_v51 }
 0x560   : > { %v3562_v45 = vpop.f32.mrf.mxu1 }
 0x561   : > { %v3563_v3 = vadd.f32 %v3562_v45, %v3486_v50 }
 0x563   : > { %v3608_v16 = vmax.f32 %v3563_v3, 0.0  ;;  %v3512_v25 = vpop.f32.mrf.mxu0 }
 0x564   : > { %v3513_v37 = vadd.f32 %v7174_v40, %v3512_v25  ;;  %v3857_v25 = vld [vmem:[#allocation6 + $0x10] sm:$0xff] }
 0x565   : > { %3678 = vmatmul.f32.gmra.mxu2 %v3608_v16 }
 0x568   : > { %v3565_v23 = vpop.f32.mrf.mxu1 }
 0x569   : > { %v3566_v0 = vadd.f32 %v3565_v23, %v3489_v47 }
 0x56b   : > { %v3609_v15 = vmax.f32 %v3566_v0, 0.0  ;;  %v3515_v38 = vpop.f32.mrf.mxu0 }
 0x56c   : > { %v3516_v53 = vadd.f32 %v7174_v40, %v3515_v38  ;;  %v3856_v38 = vld [vmem:[#allocation6 + $0x8] sm:$0xff] }
 0x56d   : > { %3681 = vmatmul.f32.gmra.mxu2 %v3609_v15 }
 0x570   : > { %v3568_v33 = vpop.f32.mrf.mxu1 }
 0x571   : > { %v3569_v11 = vadd.f32 %v3568_v33, %v3492_v54  ;;  %v3864_v54 = vld [vmem:[#allocation6 + $0x48] sm:$0xff] }
 0x572   : > { %3881 = vmatpush.msra.mxu0 %v3864_v54 }
 0x573   : > { %v3610_v10 = vmax.f32 %v3569_v11, 0.0  ;;  %v3518_v3 = vpop.f32.mrf.mxu0 }
 0x574   : > { %v3519_v4 = vadd.f32 %v7174_v40, %v3518_v3 }
 0x575   : > { %3684 = vmatmul.f32.gmra.mxu2 %v3610_v10 }
 0x578   : > { %v3571_v58 = vpop.f32.mrf.mxu1 }
 0x579   : > { %v3572_v60 = vadd.f32 %v3571_v58, %v3495_v52 }
 0x57b   : > { %v3611_v22 = vmax.f32 %v3572_v60, 0.0  ;;  %v3521_v33 = vpop.f32.mrf.mxu0 }
 0x57c   : > { %v3522_v11 = vadd.f32 %v7174_v40, %v3521_v33 }
 0x57d   : > { %3687 = vmatmul.f32.gmra.mxu2 %v3611_v22  ;;  %v3863_v22 = vld [vmem:[#allocation6 + $0x40] sm:$0xff] }
 0x57e   : > { %3882 = vmatpush.msra.mxu0 %v3863_v22 }
 0x580   : > { %v3574_v55 = vpop.f32.mrf.mxu1 }
 0x581   : > { %v3575_v46 = vadd.f32 %v3574_v55, %v3498_v29  ;;  %v3862_v55 = vld [vmem:[#allocation6 + $0x38] sm:$0xff] }
 0x582   : > { %3883 = vmatpush.msra.mxu0 %v3862_v55 }
 0x583   : > { %v3612_v8 = vmax.f32 %v3575_v46, 0.0 }
 0x584   : > { %3884 = vmatpush.msra.mxu0 %v3861_v26 }
 0x585   : > { %3690 = vmatmul.f32.gmra.mxu2 %v3612_v8 }
 0x586   : > { %3885 = vmatpush.msra.mxu0 %v3860_v1 }
 0x588   : > { %v3577_v24 = vpop.f32.mrf.mxu1 }
 0x589   : > { %v3578_v2 = vadd.f32 %v3577_v24, %v3501_v43 }
 0x58b   : > { %v3613_v41 = vmax.f32 %v3578_v2, 0.0 }
 0x58d   : > { %3693 = vmatmul.f32.gmra.mxu2 %v3613_v41 }
 0x590   : > { %v3580_v6 = vpop.f32.mrf.mxu1 }
 0x591   : > { %v3581_v19 = vadd.f32 %v3580_v6, %v3504_v57 }
 0x593   : > { %v3614_v61 = vmax.f32 %v3581_v19, 0.0 }
 0x595   : > { %3696 = vmatmul.f32.gmra.mxu2 %v3614_v61  ;;  %v3859_v61 = vld [vmem:[#allocation6 + $0x20] sm:$0xff] }
 0x596   : > { %3886 = vmatpush.msra.mxu0 %v3859_v61 }
 0x598   : > { %v3583_v32 = vpop.f32.mrf.mxu1 }
 0x599   : > { %v3584_v18 = vadd.f32 %v3583_v32, %v3507_v48  ;;  %v3858_v32 = vld [vmem:[#allocation6 + $0x18] sm:$0xff] }
 0x59a   : > { %3887 = vmatpush.msra.mxu0 %v3858_v32 }
 0x59b   : > { %v3615_v35 = vmax.f32 %v3584_v18, 0.0 }
 0x59c   : > { %3888 = vmatpush.msra.mxu0 %v3857_v25 }
 0x59d   : > { %3699 = vmatmul.f32.gmra.mxu2 %v3615_v35 }
 0x59e   : > { %3889 = vmatpush.msra.mxu0 %v3856_v38 }
 0x5a0   : > { %v3586_v62 = vpop.f32.mrf.mxu1  ;;  %3890 = vmatpush.msra.mxu0 %v3855_v59 }
 0x5a1   : > { %v3587_v49 = vadd.f32 %v3586_v62, %v3510_v21 }
 0x5a3   : > { %v3616_v42 = vmax.f32 %v3587_v49, 0.0 }
 0x5a5   : > { %3702 = vmatmul.f32.gmra.mxu2 %v3616_v42 }
 0x5a8   : > { %v3589_v27 = vpop.f32.mrf.mxu1 }
 0x5a9   : > { %v3590_v17 = vadd.f32 %v3589_v27, %v3513_v37 }
 0x5ab   : > { %v3617_v56 = vmax.f32 %v3590_v17, 0.0 }
 0x5ad   : > { %3705 = vmatmul.f32.gmra.mxu2 %v3617_v56 }
 0x5b0   : > { %v3592_v51 = vpop.f32.mrf.mxu1  ;;  %v3658_v13 = vpop.f32.mrf.mxu2 }
 0x5b1   : > { %v3593_v50 = vadd.f32 %v3592_v51, %v3516_v53  ;;  %v3659_v45 = vadd.f32 %v7202_v39, %v3658_v13 }
 0x5b3   : > { %v3618_v30 = vmax.f32 %v3593_v50, 0.0  ;;  %v3718_v16 = vmax.f32 %v3659_v45, 0.0 }
 0x5b5   : > { %3708 = vmatmul.f32.gmra.mxu2 %v3618_v30  ;;  %3774 = vmatmul.f32.vlgmr.msra.gmra.mxu3 %v3718_v16 }
 0x5b8   : > { %v3595_v47 = vpop.f32.mrf.mxu1  ;;  %v3661_v23 = vpop.f32.mrf.mxu2 }
 0x5b9   : > { %v3596_v0 = vadd.f32 %v3595_v47, %v3519_v4  ;;  %v3662_v15 = vadd.f32 %v7202_v39, %v3661_v23 }
 0x5bb   : > { %v3619_v63 = vmax.f32 %v3596_v0, 0.0  ;;  %v3719_v7 = vmax.f32 %v3662_v15, 0.0  ;;  %v7227_v15 = vld [vmem:[%s7319_s12] ss:$0 sm:$0xff] }
 0x5bd   : > { %3711 = vmatmul.f32.gmra.mxu2 %v3619_v63  ;;  %3777 = vmatmul.f32.gmra.mxu3 %v3719_v7 }
 0x5c0   : > { %v3598_v10 = vpop.f32.mrf.mxu1  ;;  %v3664_v34 = vpop.f32.mrf.mxu2 }
 0x5c1   : > { %v3599_v9 = vadd.f32 %v3598_v10, %v3522_v11  ;;  %v3665_v52 = vadd.f32 %v7202_v39, %v3664_v34 }
 0x5c3   : > { %v3620_v58 = vmax.f32 %v3599_v9, 0.0  ;;  %v3720_v60 = vmax.f32 %v3665_v52, 0.0 }
 0x5c5   : > { %3714 = vmatmul.f32.gmra.mxu2 %v3620_v58  ;;  %3780 = vmatmul.f32.gmra.mxu3 %v3720_v60 }
 0x5c8   : > { %v3667_v44 = vpop.f32.mrf.mxu2 }
 0x5c9   : > { %v3668_v29 = vadd.f32 %v7202_v39, %v3667_v44 }
 0x5cb   : > { %v3721_v31 = vmax.f32 %v3668_v29, 0.0 }
 0x5cd   : > { %3783 = vmatmul.f32.gmra.mxu3 %v3721_v31 }
 0x5d0   : > { %v3670_v46 = vpop.f32.mrf.mxu2 }
 0x5d1   : > { %v3671_v40 = vadd.f32 %v7202_v39, %v3670_v46 }
 0x5d3   : > { %v3722_v8 = vmax.f32 %v3671_v40, 0.0 }
 0x5d5   : > { %3786 = vmatmul.f32.gmra.mxu3 %v3722_v8 }
 0x5d8   : > { %v3673_v28 = vpop.f32.mrf.mxu2 }
 0x5d9   : > { %v3674_v43 = vadd.f32 %v7202_v39, %v3673_v28 }
 0x5db   : > { %v3723_v24 = vmax.f32 %v3674_v43, 0.0 }
 0x5dd   : > { %3789 = vmatmul.f32.gmra.mxu3 %v3723_v24 }
 0x5e0   : > { %v3676_v2 = vpop.f32.mrf.mxu2 }
 0x5e1   : > { %v3677_v5 = vadd.f32 %v7202_v39, %v3676_v2 }
 0x5e3   : > { %v3724_v41 = vmax.f32 %v3677_v5, 0.0 }
 0x5e5   : > { %3792 = vmatmul.f32.gmra.mxu3 %v3724_v41 }
 0x5e8   : > { %v3679_v57 = vpop.f32.mrf.mxu2 }
 0x5e9   : > { %v3680_v6 = vadd.f32 %v7202_v39, %v3679_v57 }
 0x5eb   : > { %v3725_v19 = vmax.f32 %v3680_v6, 0.0 }
 0x5ed   : > { %3795 = vmatmul.f32.gmra.mxu3 %v3725_v19 }
 0x5f0   : > { %v3682_v20 = vpop.f32.mrf.mxu2 }
 0x5f1   : > { %v3683_v36 = vadd.f32 %v7202_v39, %v3682_v20 }
 0x5f3   : > { %v3726_v48 = vmax.f32 %v3683_v36, 0.0 }
 0x5f5   : > { %3798 = vmatmul.f32.gmra.mxu3 %v3726_v48 }
 0x5f8   : > { %v3685_v18 = vpop.f32.mrf.mxu2 }
 0x5f9   : > { %v3686_v35 = vadd.f32 %v7202_v39, %v3685_v18 }
 0x5fb   : > { %v3727_v14 = vmax.f32 %v3686_v35, 0.0 }
 0x5fd   : > { %3801 = vmatmul.f32.gmra.mxu3 %v3727_v14 }
 0x600   : > { %v3688_v21 = vpop.f32.mrf.mxu2 }
 0x601   : > { %v3689_v62 = vadd.f32 %v7202_v39, %v3688_v21 }
 0x603   : > { %v3728_v49 = vmax.f32 %v3689_v62, 0.0 }
 0x605   : > { %3804 = vmatmul.f32.gmra.mxu3 %v3728_v49 }
 0x608   : > { %v3691_v42 = vpop.f32.mrf.mxu2 }
 0x609   : > { %v3692_v12 = vadd.f32 %v7202_v39, %v3691_v42 }
 0x60b   : > { %v3729_v37 = vmax.f32 %v3692_v12, 0.0 }
 0x60d   : > { %3807 = vmatmul.f32.gmra.mxu3 %v3729_v37 }
 0x610   : > { %v3694_v27 = vpop.f32.mrf.mxu2 }
 0x611   : > { %v3695_v17 = vadd.f32 %v7202_v39, %v3694_v27 }
 0x613   : > { %v3730_v56 = vmax.f32 %v3695_v17, 0.0 }
 0x615   : > { %3810 = vmatmul.f32.gmra.mxu3 %v3730_v56 }
 0x618   : > { %v3697_v53 = vpop.f32.mrf.mxu2 }
 0x619   : > { %v3698_v51 = vadd.f32 %v7202_v39, %v3697_v53 }
 0x61b   : > { %v3731_v13 = vmax.f32 %v3698_v51, 0.0 }
 0x61d   : > { %3813 = vmatmul.f32.gmra.mxu3 %v3731_v13 }
 0x620   : > { %v3700_v50 = vpop.f32.mrf.mxu2 }
 0x621   : > { %v3701_v45 = vadd.f32 %v7202_v39, %v3700_v50 }
 0x623   : > { %v3732_v3 = vmax.f32 %v3701_v45, 0.0 }
 0x625   : > { %3816 = vmatmul.f32.gmra.mxu3 %v3732_v3 }
 0x628   : > { %v3703_v30 = vpop.f32.mrf.mxu2 }
 0x629   : > { %v3704_v16 = vadd.f32 %v7202_v39, %v3703_v30  ;;  %v7251_v30 = vld [vmem:[%s7321_s14] ss:$0 sm:$0xff] }
 0x62b   : > { %v3733_v4 = vmax.f32 %v3704_v16, 0.0 }
 0x62d   : > { %3819 = vmatmul.f32.gmra.mxu3 %v3733_v4 }
 0x630   : > { %v3706_v47 = vpop.f32.mrf.mxu2 }
 0x631   : > { %v3707_v23 = vadd.f32 %v7202_v39, %v3706_v47 }
 0x633   : > { %v3734_v0 = vmax.f32 %v3707_v23, 0.0 }
 0x635   : > { %3822 = vmatmul.f32.gmra.mxu3 %v3734_v0 }
 0x638   : > { %v3709_v63 = vpop.f32.mrf.mxu2  ;;  %v3775_v7 = vpop.f32.mrf.mxu3 }
 0x639   : > { %v3710_v54 = vadd.f32 %v7202_v39, %v3709_v63  ;;  %v3776_v33 = vadd.f32 %v7227_v15, %v3775_v7 }
 0x63b   : > { %v3735_v11 = vmax.f32 %v3710_v54, 0.0  ;;  %v3835_v10 = vmax.f32 %v3776_v33, 0.0 }
 0x63d   : > { %3825 = vmatmul.f32.gmra.mxu3 %v3735_v11  ;;  %3891 = vmatmul.f32.vlgmr.msra.gmra.mxu0 %v3835_v10 }
 0x640   : > { %v3712_v34 = vpop.f32.mrf.mxu2  ;;  %v3778_v9 = vpop.f32.mrf.mxu3 }
 0x641   : > { %v3713_v52 = vadd.f32 %v7202_v39, %v3712_v34  ;;  %v3779_v58 = vadd.f32 %v7227_v15, %v3778_v9 }
 0x643   : > { %v3736_v60 = vmax.f32 %v3713_v52, 0.0  ;;  %v3836_v22 = vmax.f32 %v3779_v58, 0.0 }
 0x645   : > { %3828 = vmatmul.f32.gmra.mxu3 %v3736_v60  ;;  %3894 = vmatmul.f32.gmra.mxu0 %v3836_v22 }
 0x648   : > { %v3715_v44 = vpop.f32.mrf.mxu2  ;;  %v3781_v29 = vpop.f32.mrf.mxu3 }
 0x649   : > { %v3716_v31 = vadd.f32 %v7202_v39, %v3715_v44  ;;  %v3782_v55 = vadd.f32 %v7227_v15, %v3781_v29 }
 0x64b   : > { %v3737_v46 = vmax.f32 %v3716_v31, 0.0  ;;  %v3837_v40 = vmax.f32 %v3782_v55, 0.0 }
 0x64d   : > { %3831 = vmatmul.f32.gmra.mxu3 %v3737_v46  ;;  %3897 = vmatmul.f32.gmra.mxu0 %v3837_v40 }
 0x650   : > { %v3784_v8 = vpop.f32.mrf.mxu3 }
 0x651   : > { %v3785_v26 = vadd.f32 %v7227_v15, %v3784_v8 }
 0x653   : > { %v3838_v28 = vmax.f32 %v3785_v26, 0.0 }
 0x655   : > { %3900 = vmatmul.f32.gmra.mxu0 %v3838_v28 }
 0x658   : > { %v3787_v43 = vpop.f32.mrf.mxu3 }
 0x659   : > { %v3788_v24 = vadd.f32 %v7227_v15, %v3787_v43 }
 0x65b   : > { %v3839_v2 = vmax.f32 %v3788_v24, 0.0 }
 0x65d   : > { %3903 = vmatmul.f32.gmra.mxu0 %v3839_v2 }
 0x660   : > { %v3790_v5 = vpop.f32.mrf.mxu3 }
 0x661   : > { %v3791_v41 = vadd.f32 %v7227_v15, %v3790_v5 }
 0x663   : > { %v3840_v39 = vmax.f32 %v3791_v41, 0.0 }
 0x665   : > { %3906 = vmatmul.f32.gmra.mxu0 %v3840_v39 }
 0x668   : > { %v3793_v1 = vpop.f32.mrf.mxu3 }
 0x669   : > { %v3794_v57 = vadd.f32 %v7227_v15, %v3793_v1 }
 0x66b   : > { %v3841_v6 = vmax.f32 %v3794_v57, 0.0 }
 0x66d   : > { %3909 = vmatmul.f32.gmra.mxu0 %v3841_v6 }
 0x670   : > { %v3796_v19 = vpop.f32.mrf.mxu3 }
 0x671   : > { %v3797_v61 = vadd.f32 %v7227_v15, %v3796_v19 }
 0x673   : > { %v3842_v20 = vmax.f32 %v3797_v61, 0.0 }
 0x675   : > { %3912 = vmatmul.f32.gmra.mxu0 %v3842_v20 }
 0x678   : > { %v3799_v36 = vpop.f32.mrf.mxu3 }
 0x679   : > { %v3800_v48 = vadd.f32 %v7227_v15, %v3799_v36 }
 0x67b   : > { %v3843_v32 = vmax.f32 %v3800_v48, 0.0 }
 0x67d   : > { %3915 = vmatmul.f32.gmra.mxu0 %v3843_v32 }
 0x680   : > { %v3802_v18 = vpop.f32.mrf.mxu3 }
 0x681   : > { %v3803_v35 = vadd.f32 %v7227_v15, %v3802_v18 }
 0x683   : > { %v3844_v14 = vmax.f32 %v3803_v35, 0.0 }
 0x685   : > { %3918 = vmatmul.f32.gmra.mxu0 %v3844_v14 }
 0x688   : > { %v3805_v25 = vpop.f32.mrf.mxu3 }
 0x689   : > { %v3806_v21 = vadd.f32 %v7227_v15, %v3805_v25 }
 0x68b   : > { %v3845_v62 = vmax.f32 %v3806_v21, 0.0 }
 0x68d   : > { %3921 = vmatmul.f32.gmra.mxu0 %v3845_v62 }
 0x690   : > { %v3808_v49 = vpop.f32.mrf.mxu3 }
 0x691   : > { %v3809_v42 = vadd.f32 %v7227_v15, %v3808_v49 }
 0x693   : > { %v3846_v12 = vmax.f32 %v3809_v42, 0.0 }
 0x695   : > { %3924 = vmatmul.f32.gmra.mxu0 %v3846_v12 }
 0x698   : > { %v3811_v37 = vpop.f32.mrf.mxu3 }
 0x699   : > { %v3812_v38 = vadd.f32 %v7227_v15, %v3811_v37 }
 0x69b   : > { %v3847_v27 = vmax.f32 %v3812_v38, 0.0 }
 0x69d   : > { %3927 = vmatmul.f32.gmra.mxu0 %v3847_v27 }
 0x6a0   : > { %v3814_v17 = vpop.f32.mrf.mxu3 }
 0x6a1   : > { %v3815_v56 = vadd.f32 %v7227_v15, %v3814_v17 }
 0x6a3   : > { %v3848_v59 = vmax.f32 %v3815_v56, 0.0 }
 0x6a5   : > { %3930 = vmatmul.f32.gmra.mxu0 %v3848_v59 }
 0x6a8   : > { %v3817_v53 = vpop.f32.mrf.mxu3 }
 0x6a9   : > { %v3818_v51 = vadd.f32 %v7227_v15, %v3817_v53 }
 0x6ab   : > { %v3849_v13 = vmax.f32 %v3818_v51, 0.0 }
 0x6ad   : > { %3933 = vmatmul.f32.gmra.mxu0 %v3849_v13 }
 0x6b0   : > { %v3820_v50 = vpop.f32.mrf.mxu3 }
 0x6b1   : > { %v3821_v45 = vadd.f32 %v7227_v15, %v3820_v50 }
 0x6b3   : > { %v3850_v3 = vmax.f32 %v3821_v45, 0.0 }
 0x6b5   : > { %3936 = vmatmul.f32.gmra.mxu0 %v3850_v3 }
 0x6b8   : > { %v3823_v16 = vpop.f32.mrf.mxu3 }
 0x6b9   : > { %v3824_v4 = vadd.f32 %v7227_v15, %v3823_v16 }
 0x6ba   : > { %v3892_v47 = vpop.f32.mrf.mxu0 }
 0x6bb   : > { %v3851_v23 = vmax.f32 %v3824_v4, 0.0  ;;  %v3893_v0 = vadd.f32 %v7251_v30, %v3892_v47 }
 0x6bd   : > { %3952 = vst [vmem:[%s7259_s22] sm:$0xff] %v3893_v0  ;;  %3939 = vmatmul.f32.gmra.mxu0 %v3851_v23 }
 0x6c0   : > { %v3826_v63 = vpop.f32.mrf.mxu3 }
 0x6c1   : > { %v3827_v7 = vadd.f32 %v7227_v15, %v3826_v63 }
 0x6c2   : > { %v3895_v54 = vpop.f32.mrf.mxu0 }
 0x6c3   : > { %v3852_v33 = vmax.f32 %v3827_v7, 0.0  ;;  %v3896_v11 = vadd.f32 %v7251_v30, %v3895_v54 }
 0x6c5   : > { %3953 = vst [vmem:[%s7259_s22 + $0x8] sm:$0xff] %v3896_v11  ;;  %3942 = vmatmul.f32.gmra.mxu0 %v3852_v33 }
 0x6c8   : > { %v3829_v10 = vpop.f32.mrf.mxu3 }
 0x6c9   : > { %v3830_v34 = vadd.f32 %v7227_v15, %v3829_v10 }
 0x6ca   : > { %v3898_v9 = vpop.f32.mrf.mxu0 }
 0x6cb   : > { %v3853_v52 = vmax.f32 %v3830_v34, 0.0  ;;  %v3899_v58 = vadd.f32 %v7251_v30, %v3898_v9 }
 0x6cd   : > { %3954 = vst [vmem:[%s7259_s22 + $0x10] sm:$0xff] %v3899_v58  ;;  %3945 = vmatmul.f32.gmra.mxu0 %v3853_v52 }
 0x6d0   : > { %v3832_v60 = vpop.f32.mrf.mxu3 }
 0x6d1   : > { %v3833_v22 = vadd.f32 %v7227_v15, %v3832_v60 }
 0x6d2   : > { %v3901_v44 = vpop.f32.mrf.mxu0 }
 0x6d3   : > { %v3854_v29 = vmax.f32 %v3833_v22, 0.0  ;;  %v3902_v31 = vadd.f32 %v7251_v30, %v3901_v44 }
 0x6d5   : > { %3955 = vst [vmem:[%s7259_s22 + $0x18] sm:$0xff] %v3902_v31  ;;  %3948 = vmatmul.f32.gmra.mxu0 %v3854_v29 }
 0x6da   : > { %v3904_v55 = vpop.f32.mrf.mxu0 }
 0x6db   : > { %v3905_v46 = vadd.f32 %v7251_v30, %v3904_v55 }
 0x6dd   : > { %3956 = vst [vmem:[%s7259_s22 + $0x20] sm:$0xff] %v3905_v46 }
 0x6e2   : > { %v3907_v40 = vpop.f32.mrf.mxu0 }
 0x6e3   : > { %v3908_v8 = vadd.f32 %v7251_v30, %v3907_v40 }
 0x6e5   : > { %3957 = vst [vmem:[%s7259_s22 + $0x28] sm:$0xff] %v3908_v8 }
 0x6ea   : > { %v3910_v26 = vpop.f32.mrf.mxu0 }
 0x6eb   : > { %v3911_v15 = vadd.f32 %v7251_v30, %v3910_v26 }
 0x6ed   : > { %3958 = vst [vmem:[%s7259_s22 + $0x30] sm:$0xff] %v3911_v15 }
 0x6f2   : > { %v3913_v28 = vpop.f32.mrf.mxu0 }
 0x6f3   : > { %v3914_v43 = vadd.f32 %v7251_v30, %v3913_v28 }
 0x6f5   : > { %3959 = vst [vmem:[%s7259_s22 + $0x38] sm:$0xff] %v3914_v43 }
 0x6fa   : > { %v3916_v24 = vpop.f32.mrf.mxu0 }
 0x6fb   : > { %v3917_v2 = vadd.f32 %v7251_v30, %v3916_v24 }
 0x6fd   : > { %3960 = vst [vmem:[%s7259_s22 + $0x40] sm:$0xff] %v3917_v2 }
 0x702   : > { %v3919_v5 = vpop.f32.mrf.mxu0 }
 0x703   : > { %v3920_v41 = vadd.f32 %v7251_v30, %v3919_v5 }
 0x705   : > { %3961 = vst [vmem:[%s7259_s22 + $0x48] sm:$0xff] %v3920_v41 }
 0x70a   : > { %v3922_v39 = vpop.f32.mrf.mxu0 }
 0x70b   : > { %v3923_v1 = vadd.f32 %v7251_v30, %v3922_v39 }
 0x70d   : > { %3962 = vst [vmem:[%s7259_s22 + $0x50] sm:$0xff] %v3923_v1 }
 0x712   : > { %v3925_v57 = vpop.f32.mrf.mxu0 }
 0x713   : > { %v3926_v6 = vadd.f32 %v7251_v30, %v3925_v57 }
 0x715   : > { %3963 = vst [vmem:[%s7259_s22 + $0x58] sm:$0xff] %v3926_v6 }
 0x71a   : > { %v3928_v19 = vpop.f32.mrf.mxu0 }
 0x71b   : > { %v3929_v61 = vadd.f32 %v7251_v30, %v3928_v19 }
 0x71d   : > { %3964 = vst [vmem:[%s7259_s22 + $0x60] sm:$0xff] %v3929_v61 }
 0x722   : > { %v3931_v20 = vpop.f32.mrf.mxu0 }
 0x723   : > { %v3932_v36 = vadd.f32 %v7251_v30, %v3931_v20 }
 0x725   : > { %3965 = vst [vmem:[%s7259_s22 + $0x68] sm:$0xff] %v3932_v36 }
 0x72a   : > { %v3934_v48 = vpop.f32.mrf.mxu0 }
 0x72b   : > { %v3935_v32 = vadd.f32 %v7251_v30, %v3934_v48 }
 0x72d   : > { %3966 = vst [vmem:[%s7259_s22 + $0x70] sm:$0xff] %v3935_v32 }
 0x732   : > { %v3937_v18 = vpop.f32.mrf.mxu0 }
 0x733   : > { %v3938_v35 = vadd.f32 %v7251_v30, %v3937_v18 }
 0x735   : > { %3967 = vst [vmem:[%s7259_s22 + $0x78] sm:$0xff] %v3938_v35 }
 0x73a   : > { %v3940_v14 = vpop.f32.mrf.mxu0 }
 0x73b   : > { %v3941_v25 = vadd.f32 %v7251_v30, %v3940_v14 }
 0x73d   : > { %3968 = vst [vmem:[%s7259_s22 + $0x80] sm:$0xff] %v3941_v25 }
 0x742   : > { %v3943_v21 = vpop.f32.mrf.mxu0 }
 0x743   : > { %v3944_v62 = vadd.f32 %v7251_v30, %v3943_v21 }
 0x745   : > { %3969 = vst [vmem:[%s7259_s22 + $0x88] sm:$0xff] %v3944_v62 }
 0x74a   : > { %v3946_v49 = vpop.f32.mrf.mxu0 }
 0x74b   : > { %v3947_v42 = vadd.f32 %v7251_v30, %v3946_v49 }
 0x74d   : > { %3970 = vst [vmem:[%s7259_s22 + $0x90] sm:$0xff] %v3947_v42 }
 0x752   : > { %v3949_v12 = vpop.f32.mrf.mxu0 }
 0x753   : > { %v3950_v37 = vadd.f32 %v7251_v30, %v3949_v12 }
 0x755   : > { %3971 = vst [vmem:[%s7259_s22 + $0x98] sm:$0xff] %v3950_v37 }
 0x756 PF: > { %s27_s18 = sadd.s32 1, %s4318_s18  }
 0x757   : > { %p24_p7 = scmp.ge.s32.totalorder %s27_s18, 4  }
 0x759   :  { %26 = sbr.rel (!%p24_p7) target bundleno = 6 (0x6), region = 123 }
 0x75e   :  { %3994 = vsyncpa [#allocation3], 1 }
 0x75f   :  { %3996 = vsyncpa [#allocation3 + $0x1], 1 }
 0x760   :  { %3997 = vsyncpa [#allocation5], 1 }

</bundles_post_ra>
